<compile_context>
chip_gen: v7x
topology: tpu7x:2x2x1
jax: 0.10.0
libtpu: 0.0.40
codegen_flags: <defaults>
</compile_context>

<pallas_src>
import math

import jax
import jax.numpy as jnp
from jax.experimental import pallas as pl
from jax.experimental.pallas import tpu as pltpu

# ----------------------------- static problem sizes -------------------------
IMG_H = 16
IMG_W = 16
HW = IMG_H * IMG_W              # 256 lanes per input channel (row-major)
C_IN = 3                        # input channels
C_OUT = 3                       # conv filters
K = 5                           # conv kernel size
P = 4                           # pool size
FC_OUT = 10                     # output classes

H_CONV = IMG_H - K + 1          # 12
W_CONV = IMG_W - K + 1          # 12
HP = H_CONV // P                # 3
WP = W_CONV // P                # 3
FEAT = C_OUT * HP * WP          # 27 (== the module's fc_input_size for 16x16)

NTAPS = P * P                   # 16 taps per pool window
LANE = 128                      # one tap plane / padded class dim
IN_LANES = C_IN * HW            # 768
CONV_COLS = NTAPS * LANE        # 2048

BB_MAX = 128                    # max images per grid step (multiple of 8)


# ----------------------------- Pallas kernel --------------------------------
def simple_cnn_kernel(x_ref, cw_ref, cb_ref, fw_ref, fb_ref, o_ref):
    """x_ref  : VMEM (BB, 768)        f32  BB images, lane = ic*256 + 16*r + c
       cw_ref : VMEM (768, 2048)      f32  zero-expanded conv weight (taps baked in)
       cb_ref : VMEM (1, 128)         f32  conv bias, lane oc*9+j (j<9), 0 elsewhere
       fw_ref : VMEM (128, 128)       f32  zero-expanded FC weight
       fb_ref : VMEM (1, 128)         f32  zero-padded FC bias
       o_ref  : VMEM (BB, 128)        f32  padded logits for this batch block
    """
    # Conv as one MXU matmul: column t*128 + (oc*9 + ph*3 + pw) is the conv
    # output at (oc, 4*ph + dr, 4*pw + dc) with t = dr*4 + dc.  Unused lanes
    # (>= 27 within each plane) have all-zero weight columns -> exactly 0.
    taps = jnp.dot(x_ref[...], cw_ref[...], preferred_element_type=jnp.float32)

    # 4x4 max-pool: pairwise-max tree over the 16 lane-aligned tap planes.
    planes = [taps[:, t * LANE:(t + 1) * LANE] for t in range(NTAPS)]
    while len(planes) > 1:
        planes = [jnp.maximum(a, b) for a, b in zip(planes[0::2], planes[1::2])]
    pooled = planes[0]                                   # (BB, 128)

    # Bias commutes with the max over a window, so it is added after pooling;
    # then ReLU.  Unused lanes stay exactly 0 (bias row is 0 there).
    pooled = jnp.maximum(pooled + cb_ref[...], 0.0)

    # Fused FC on the MXU, lane-dense (BB, 128) store (classes 10..127 are 0).
    o_ref[...] = (jnp.dot(pooled, fw_ref[...], preferred_element_type=jnp.float32)
                  + fb_ref[...])


# ----------------------------- parameter glue (plain JAX) -------------------
def _expanded_conv_weight(conv_w):
    """(C_OUT, C_IN, K, K) OIHW -> (768, 2048) matrix with the valid-conv taps
    baked in so one matmul produces every (pool window, tap, channel) value."""
    dt = conv_w.dtype
    kh = jnp.arange(K)
    r_in = jnp.arange(IMG_H)
    r_out = jnp.arange(H_CONV)
    c_in = jnp.arange(IMG_W)
    c_out = jnp.arange(W_CONV)
    # eye_h[kh, r_in, r_out] = 1 iff r_in == r_out + kh  (same for columns)
    eye_h = (r_in[None, :, None] == r_out[None, None, :] + kh[:, None, None]).astype(dt)
    eye_w = (c_in[None, :, None] == c_out[None, None, :] + kh[:, None, None]).astype(dt)
    # A[ic, r_in, c_in, oc, r_out, c_out] = conv_w[oc, ic, r_in-r_out, c_in-c_out]
    A = jnp.einsum("oihw,hab,wcd->iacobd", conv_w, eye_h, eye_w)
    A = A.reshape(IN_LANES, C_OUT, HP, P, WP, P)         # r_out = ph*4+dr, c_out = pw*4+dc
    A = jnp.transpose(A, (0, 3, 5, 1, 2, 4))             # (768, dr, dc, oc, ph, pw)
    A = A.reshape(IN_LANES, NTAPS, FEAT)                 # plane t = dr*4+dc, idx = oc*9+ph*3+pw
    full = jnp.zeros((IN_LANES, NTAPS, LANE), dt).at[:, :, :FEAT].set(A)
    return full.reshape(IN_LANES, CONV_COLS)


def _expanded_fc_weight(fc_w):
    """Torch-layout (10, 27) -> (128, 128), rows = pooled-feature lanes."""
    full = jnp.zeros((LANE, LANE), fc_w.dtype)
    return full.at[:FEAT, :FC_OUT].set(fc_w.T)


def _round_up(n, m):
    return ((n + m - 1) // m) * m


# ----------------------------- wrapper ---------------------------------------
@jax.jit
def _forward_jit(x_nchw, conv_w, conv_b, fc_w, fc_b):
    B = x_nchw.shape[0]
    bb = min(BB_MAX, _round_up(max(B, 1), 8))            # images per grid step
    b_pad = _round_up(B, bb)

    xf = x_nchw.reshape(B, IN_LANES)                     # lane = ic*256 + 16*r + c
    if b_pad != B:
        xf = jnp.pad(xf, ((0, b_pad - B), (0, 0)))

    cw_exp = _expanded_conv_weight(conv_w)               # (768, 2048)
    cb_row = jnp.zeros((1, LANE), conv_b.dtype).at[0, :FEAT].set(jnp.repeat(conv_b, HP * WP))
    fw_exp = _expanded_fc_weight(fc_w)                   # (128, 128)
    fb_row = jnp.zeros((1, LANE), fc_b.dtype).at[0, :FC_OUT].set(fc_b)

    out = pl.pallas_call(
        simple_cnn_kernel,
        out_shape=jax.ShapeDtypeStruct((b_pad, LANE), jnp.float32),
        grid=(b_pad // bb,),
        in_specs=[
            pl.BlockSpec((bb, IN_LANES), lambda i: (i, 0)),          # image block
            pl.BlockSpec((IN_LANES, CONV_COLS), lambda i: (0, 0)),   # conv weight
            pl.BlockSpec((1, LANE), lambda i: (0, 0)),               # conv bias
            pl.BlockSpec((LANE, LANE), lambda i: (0, 0)),            # fc weight
            pl.BlockSpec((1, LANE), lambda i: (0, 0)),               # fc bias
        ],
        out_specs=pl.BlockSpec((bb, LANE), lambda i: (i, 0)),
        compiler_params=pltpu.CompilerParams(
            dimension_semantics=("parallel",),    # both v7x TCs when B >= 2*bb
            vmem_limit_bytes=32 * 1024 * 1024),   # 6 MiB expanded conv weight x2 buffers
    )(xf, cw_exp, cb_row, fw_exp, fb_row)
    return out[:B, :FC_OUT]


def simple_cnn_forward(x_nchw, conv_w, conv_b, fc_w, fc_b):
    """Batched SimpleCNN forward: applies the module's (batch-1) forward to
    each image independently.  x_nchw: (B, 3, 16, 16) f32 -> logits (B, 10)."""
    return _forward_jit(x_nchw, conv_w, conv_b, fc_w, fc_b)


# ----------------------------- pure-JAX reference -----------------------------
def reference_forward(x, conv_w, conv_b, fc_w, fc_b):
    y = jax.lax.conv_general_dilated(
        x, conv_w, window_strides=(1, 1), padding="VALID",
        dimension_numbers=("NCHW", "OIHW", "NCHW"))
    y = y + conv_b[None, :, None, None]
    y = jax.lax.reduce_window(
        y, -jnp.inf, jax.lax.max,
        window_dimensions=(1, 1, P, P), window_strides=(1, 1, P, P),
        padding="VALID")
    y = jnp.maximum(y, 0.0)
    y = y.reshape(y.shape[0], -1)
    return y @ fc_w.T + fc_b[None, :]


# ----------------------------- main -------------------------------------------
if __name__ == "__main__":
    key = jax.random.PRNGKey(0)
    kx, kcw, kcb, kfw, kfb = jax.random.split(key, 5)

    # Deterministic PyTorch-default-style uniform init (synthetic weights).
    bc = 1.0 / math.sqrt(C_IN * K * K)        # conv fan-in = 75
    bf = 1.0 / math.sqrt(FEAT)                # fc fan-in = 27

    B = 30                                    # small; exercises batch padding too
    x = jax.random.normal(kx, (B, C_IN, IMG_H, IMG_W), dtype=jnp.float32)
    conv_w = jax.random.uniform(kcw, (C_OUT, C_IN, K, K), jnp.float32, -bc, bc)
    conv_b = jax.random.uniform(kcb, (C_OUT,), jnp.float32, -bc, bc)
    fc_w = jax.random.uniform(kfw, (FC_OUT, FEAT), jnp.float32, -bf, bf)
    fc_b = jax.random.uniform(kfb, (FC_OUT,), jnp.float32, -bf, bf)

    out = simple_cnn_forward(x, conv_w, conv_b, fc_w, fc_b)
    out = jax.block_until_ready(out)

    ref = reference_forward(x, conv_w, conv_b, fc_w, fc_b)

    assert out.shape == (B, FC_OUT), out.shape
    if not jnp.allclose(out, ref, rtol=1e-3, atol=1e-3):
        raise AssertionError(f"mismatch:\nkernel={out}\nref   ={ref}")

    print("KERNEL_OK")
</pallas_src>

<mosaic_0001>
module attributes {stable_mosaic.version = 11 : i64} {
  func.func @simple_cnn_kernel(%arg0: i32, %arg1: memref<32x768xf32, #tpu.memory_space<vmem>>, %arg2: memref<768x2048xf32, #tpu.memory_space<vmem>>, %arg3: memref<1x128xf32, #tpu.memory_space<vmem>>, %arg4: memref<128x128xf32, #tpu.memory_space<vmem>>, %arg5: memref<1x128xf32, #tpu.memory_space<vmem>>, %arg6: memref<32x128xf32, #tpu.memory_space<vmem>>) attributes {dimension_semantics = [#tpu.dimension_semantics<parallel>], iteration_bounds = array<i64: 1>, scalar_prefetch = 0 : i64, scratch_operands = 0 : i64, tpu.core_type = #tpu.core_type<tc>, window_params = [{transform_indices = @transform_0, window_bounds = array<i64: 32, 768>}, {pipeline_mode = #tpu.pipeline_mode<synchronous>, transform_indices = @transform_1, window_bounds = array<i64: 768, 2048>}, {pipeline_mode = #tpu.pipeline_mode<synchronous>, transform_indices = @transform_2, window_bounds = array<i64: 1, 128>}, {pipeline_mode = #tpu.pipeline_mode<synchronous>, transform_indices = @transform_3, window_bounds = array<i64: 128, 128>}, {pipeline_mode = #tpu.pipeline_mode<synchronous>, transform_indices = @transform_4, window_bounds = array<i64: 1, 128>}, {transform_indices = @transform_5, window_bounds = array<i64: 32, 128>}]} {
    %c0 = arith.constant 0 : index
    %c0_0 = arith.constant 0 : index
    %0 = vector.load %arg1[%c0, %c0_0] : memref<32x768xf32, #tpu.memory_space<vmem>>, vector<32x768xf32>
    %c0_1 = arith.constant 0 : index
    %c0_2 = arith.constant 0 : index
    %1 = vector.load %arg2[%c0_1, %c0_2] : memref<768x2048xf32, #tpu.memory_space<vmem>>, vector<768x2048xf32>
    %cst = arith.constant dense<0.000000e+00> : vector<32x2048xf32>
    %2 = tpu.matmul %0, %1, %cst {dimension_numbers = #tpu.dot_dimension_numbers<[1], [0], [0], [1], [0, 0, 1, 1], [], []>} : vector<32x768xf32>, vector<768x2048xf32>, vector<32x2048xf32> -> vector<32x2048xf32>
    %3 = vector.extract_strided_slice %2 {offsets = [0, 0], sizes = [32, 128], strides = [1, 1]} : vector<32x2048xf32> to vector<32x128xf32>
    %4 = vector.extract_strided_slice %2 {offsets = [0, 128], sizes = [32, 128], strides = [1, 1]} : vector<32x2048xf32> to vector<32x128xf32>
    %5 = vector.extract_strided_slice %2 {offsets = [0, 256], sizes = [32, 128], strides = [1, 1]} : vector<32x2048xf32> to vector<32x128xf32>
    %6 = vector.extract_strided_slice %2 {offsets = [0, 384], sizes = [32, 128], strides = [1, 1]} : vector<32x2048xf32> to vector<32x128xf32>
    %7 = vector.extract_strided_slice %2 {offsets = [0, 512], sizes = [32, 128], strides = [1, 1]} : vector<32x2048xf32> to vector<32x128xf32>
    %8 = vector.extract_strided_slice %2 {offsets = [0, 640], sizes = [32, 128], strides = [1, 1]} : vector<32x2048xf32> to vector<32x128xf32>
    %9 = vector.extract_strided_slice %2 {offsets = [0, 768], sizes = [32, 128], strides = [1, 1]} : vector<32x2048xf32> to vector<32x128xf32>
    %10 = vector.extract_strided_slice %2 {offsets = [0, 896], sizes = [32, 128], strides = [1, 1]} : vector<32x2048xf32> to vector<32x128xf32>
    %11 = vector.extract_strided_slice %2 {offsets = [0, 1024], sizes = [32, 128], strides = [1, 1]} : vector<32x2048xf32> to vector<32x128xf32>
    %12 = vector.extract_strided_slice %2 {offsets = [0, 1152], sizes = [32, 128], strides = [1, 1]} : vector<32x2048xf32> to vector<32x128xf32>
    %13 = vector.extract_strided_slice %2 {offsets = [0, 1280], sizes = [32, 128], strides = [1, 1]} : vector<32x2048xf32> to vector<32x128xf32>
    %14 = vector.extract_strided_slice %2 {offsets = [0, 1408], sizes = [32, 128], strides = [1, 1]} : vector<32x2048xf32> to vector<32x128xf32>
    %15 = vector.extract_strided_slice %2 {offsets = [0, 1536], sizes = [32, 128], strides = [1, 1]} : vector<32x2048xf32> to vector<32x128xf32>
    %16 = vector.extract_strided_slice %2 {offsets = [0, 1664], sizes = [32, 128], strides = [1, 1]} : vector<32x2048xf32> to vector<32x128xf32>
    %17 = vector.extract_strided_slice %2 {offsets = [0, 1792], sizes = [32, 128], strides = [1, 1]} : vector<32x2048xf32> to vector<32x128xf32>
    %18 = vector.extract_strided_slice %2 {offsets = [0, 1920], sizes = [32, 128], strides = [1, 1]} : vector<32x2048xf32> to vector<32x128xf32>
    %19 = arith.maximumf %3, %4 : vector<32x128xf32>
    %20 = arith.maximumf %5, %6 : vector<32x128xf32>
    %21 = arith.maximumf %7, %8 : vector<32x128xf32>
    %22 = arith.maximumf %9, %10 : vector<32x128xf32>
    %23 = arith.maximumf %11, %12 : vector<32x128xf32>
    %24 = arith.maximumf %13, %14 : vector<32x128xf32>
    %25 = arith.maximumf %15, %16 : vector<32x128xf32>
    %26 = arith.maximumf %17, %18 : vector<32x128xf32>
    %27 = arith.maximumf %19, %20 : vector<32x128xf32>
    %28 = arith.maximumf %21, %22 : vector<32x128xf32>
    %29 = arith.maximumf %23, %24 : vector<32x128xf32>
    %30 = arith.maximumf %25, %26 : vector<32x128xf32>
    %31 = arith.maximumf %27, %28 : vector<32x128xf32>
    %32 = arith.maximumf %29, %30 : vector<32x128xf32>
    %33 = arith.maximumf %31, %32 : vector<32x128xf32>
    %c0_3 = arith.constant 0 : index
    %c0_4 = arith.constant 0 : index
    %34 = vector.load %arg3[%c0_3, %c0_4] : memref<1x128xf32, #tpu.memory_space<vmem>>, vector<1x128xf32>
    %35 = vector.broadcast %34 : vector<1x128xf32> to vector<32x128xf32>
    %36 = arith.addf %33, %35 : vector<32x128xf32>
    %cst_5 = arith.constant 0.000000e+00 : f32
    %37 = vector.broadcast %cst_5 : f32 to vector<32x128xf32>
    %38 = arith.maximumf %36, %37 : vector<32x128xf32>
    %c0_6 = arith.constant 0 : index
    %c0_7 = arith.constant 0 : index
    %39 = vector.load %arg4[%c0_6, %c0_7] : memref<128x128xf32, #tpu.memory_space<vmem>>, vector<128x128xf32>
    %cst_8 = arith.constant dense<0.000000e+00> : vector<32x128xf32>
    %40 = tpu.matmul %38, %39, %cst_8 {dimension_numbers = #tpu.dot_dimension_numbers<[1], [0], [0], [1], [0, 0, 1, 1], [], []>} : vector<32x128xf32>, vector<128x128xf32>, vector<32x128xf32> -> vector<32x128xf32>
    %c0_9 = arith.constant 0 : index
    %c0_10 = arith.constant 0 : index
    %41 = vector.load %arg5[%c0_9, %c0_10] : memref<1x128xf32, #tpu.memory_space<vmem>>, vector<1x128xf32>
    %42 = vector.broadcast %41 : vector<1x128xf32> to vector<32x128xf32>
    %43 = arith.addf %40, %42 : vector<32x128xf32>
    %c0_11 = arith.constant 0 : index
    %c0_12 = arith.constant 0 : index
    %44 = vector.load %arg6[%c0_11, %c0_12] : memref<32x128xf32, #tpu.memory_space<vmem>>, vector<32x128xf32>
    tpu.vector_store %arg6[%c0_11, %c0_12], %43 {strides = array<i32>} : memref<32x128xf32, #tpu.memory_space<vmem>>, vector<32x128xf32>,
    return
  }
  func.func @transform_0(%arg0: i32) -> (i32, i32) {
    %c0_i32 = arith.constant 0 : i32
    %c0_i32_0 = arith.constant 0 : i32
    return %arg0, %c0_i32 : i32, i32
  }
  func.func @transform_1(%arg0: i32) -> (i32, i32) {
    %c0_i32 = arith.constant 0 : i32
    %c0_i32_0 = arith.constant 0 : i32
    %c0_i32_1 = arith.constant 0 : i32
    return %c0_i32, %c0_i32_0 : i32, i32
  }
  func.func @transform_2(%arg0: i32) -> (i32, i32) {
    %c0_i32 = arith.constant 0 : i32
    %c0_i32_0 = arith.constant 0 : i32
    %c0_i32_1 = arith.constant 0 : i32
    return %c0_i32, %c0_i32_0 : i32, i32
  }
  func.func @transform_3(%arg0: i32) -> (i32, i32) {
    %c0_i32 = arith.constant 0 : i32
    %c0_i32_0 = arith.constant 0 : i32
    %c0_i32_1 = arith.constant 0 : i32
    return %c0_i32, %c0_i32_0 : i32, i32
  }
  func.func @transform_4(%arg0: i32) -> (i32, i32) {
    %c0_i32 = arith.constant 0 : i32
    %c0_i32_0 = arith.constant 0 : i32
    %c0_i32_1 = arith.constant 0 : i32
    return %c0_i32, %c0_i32_0 : i32, i32
  }
  func.func @transform_5(%arg0: i32) -> (i32, i32) {
    %c0_i32 = arith.constant 0 : i32
    %c0_i32_0 = arith.constant 0 : i32
    return %arg0, %c0_i32 : i32, i32
  }
}

</mosaic_0001>

<bundles_post_ra>
// kernel: _forward_jit.1
= control target key start
LH: loop header
LB: loop body
LE: loop exit
PB: predicated region body
PF: predicated region fallthrough
CT: control target
= control target key end

     0   :  { %s10791_s1 = inlined_call_operand.vmem [shape: f32[768,2048], index: 1, kind: input, shape index: {}]   ;;  %s10792_s0 = inlined_call_operand.vmem [shape: f32[32,768], index: 0, kind: input, shape index: {}]   ;;  %s10793_s3 = inlined_call_operand.vmem [shape: f32[128,128], index: 3, kind: input, shape index: {}]   ;;  %s10794_s2 = inlined_call_operand.vmem [shape: f32[1,128], index: 2, kind: input, shape index: {}]   ;;  %s10795_s4 = inlined_call_operand.vmem [shape: f32[1,128], index: 4, kind: input, shape index: {}]   ;;  %s10796_s5 = inlined_call_operand.vmem [shape: f32[32,128], index: 5, kind: output, shape index: {}]  }
   0x1   :  { %v45_v0 = vld [vmem:[%s10791_s1 + $0x8] sm:$0xff]  ;;  %v47_v2 = vld [vmem:[%s10791_s1 + $0x18] sm:$0xff]  ;;  %v44_v5 = vld [vmem:[%s10791_s1] sm:$0xff] }
   0x2   :  { %v61_v1 = vld [vmem:[%s10791_s1 + $0x88] sm:$0xff]  ;;  %v63_v4 = vld [vmem:[%s10791_s1 + $0x98] sm:$0xff]  ;;  %v60_v6 = vld [vmem:[%s10791_s1 + $0x80] sm:$0xff] }
   0x3   :  { %v3967_v3 = vpack.c.bf16 %v61_v1, %v45_v0  ;;  %v4159_v7 = vpack.c.bf16 %v63_v4, %v47_v2  ;;  %v3969_v8 = vpack.c.bf16 %v60_v6, %v44_v5  ;;  %v46_v9 = vld [vmem:[%s10791_s1 + $0x10] sm:$0xff]  ;;  %v77_v11 = vld [vmem:[%s10791_s1 + $0x108] sm:$0xff]  ;;  %v79_v14 = vld [vmem:[%s10791_s1 + $0x118] sm:$0xff] }
   0x4   :  { %v62_v10 = vld [vmem:[%s10791_s1 + $0x90] sm:$0xff]  ;;  %v93_v13 = vld [vmem:[%s10791_s1 + $0x188] sm:$0xff]  ;;  %v95_v15 = vld [vmem:[%s10791_s1 + $0x198] sm:$0xff] }
   0x5   :  { %3968 = vmatprep.subr.bf16.mxu0 %v3967_v3  ;;  %v4161_v12 = vpack.c.bf16 %v62_v10, %v46_v9  ;;  %4160 = vmatprep.subr.bf16.mxu1 %v4159_v7  ;;  %v3971_v16 = vpack.c.bf16 %v93_v13, %v77_v11  ;;  %v4163_v17 = vpack.c.bf16 %v95_v15, %v79_v14  ;;  %v76_v18 = vld [vmem:[%s10791_s1 + $0x100] sm:$0xff]  ;;  %v78_v20 = vld [vmem:[%s10791_s1 + $0x110] sm:$0xff]  ;;  %v109_v23 = vld [vmem:[%s10791_s1 + $0x208] sm:$0xff] }
   0x6   :  { %3970 = vmatpush1.bf16.msra.mxu0 %v3969_v8  ;;  %v92_v19 = vld [vmem:[%s10791_s1 + $0x180] sm:$0xff]  ;;  %v94_v22 = vld [vmem:[%s10791_s1 + $0x190] sm:$0xff]  ;;  %v125_v24 = vld [vmem:[%s10791_s1 + $0x288] sm:$0xff] }
   0x7   :  { %4162 = vmatpush1.bf16.msra.mxu1 %v4161_v12  ;;  %v3973_v21 = vpack.c.bf16 %v92_v19, %v76_v18  ;;  %3972 = vmatprep.subr.bf16.mxu0 %v3971_v16  ;;  %v4165_v25 = vpack.c.bf16 %v94_v22, %v78_v20  ;;  %v3975_v26 = vpack.c.bf16 %v125_v24, %v109_v23  ;;  %v111_v27 = vld [vmem:[%s10791_s1 + $0x218] sm:$0xff]  ;;  %v108_v29 = vld [vmem:[%s10791_s1 + $0x200] sm:$0xff]  ;;  %v110_v32 = vld [vmem:[%s10791_s1 + $0x210] sm:$0xff] }
   0x8   :  { %4164 = vmatprep.subr.bf16.mxu1 %v4163_v17  ;;  %v127_v28 = vld [vmem:[%s10791_s1 + $0x298] sm:$0xff]  ;;  %v124_v31 = vld [vmem:[%s10791_s1 + $0x280] sm:$0xff]  ;;  %v126_v33 = vld [vmem:[%s10791_s1 + $0x290] sm:$0xff] }
   0x9   :  { %v4167_v30 = vpack.c.bf16 %v127_v28, %v111_v27  ;;  %v3977_v34 = vpack.c.bf16 %v124_v31, %v108_v29  ;;  %v141_v35 = vld [vmem:[%s10791_s1 + $0x308] sm:$0xff]  ;;  %v143_v37 = vld [vmem:[%s10791_s1 + $0x318] sm:$0xff]  ;;  %v4169_v38 = vpack.c.bf16 %v126_v33, %v110_v32  ;;  %v140_v41 = vld [vmem:[%s10791_s1 + $0x300] sm:$0xff] }
   0xa   :  { %3974 = vmatpush1.bf16.msra.mxu0 %v3973_v21  ;;  %v157_v36 = vld [vmem:[%s10791_s1 + $0x388] sm:$0xff]  ;;  %v159_v40 = vld [vmem:[%s10791_s1 + $0x398] sm:$0xff]  ;;  %v156_v42 = vld [vmem:[%s10791_s1 + $0x380] sm:$0xff] }
   0xb   :  { %4166 = vmatpush1.bf16.msra.mxu1 %v4165_v25  ;;  %3976 = vmatprep.subr.bf16.mxu0 %v3975_v26  ;;  %v3979_v39 = vpack.c.bf16 %v157_v36, %v141_v35  ;;  %v4171_v43 = vpack.c.bf16 %v159_v40, %v143_v37  ;;  %v142_v44 = vld [vmem:[%s10791_s1 + $0x310] sm:$0xff]  ;;  %v173_v46 = vld [vmem:[%s10791_s1 + $0x408] sm:$0xff]  ;;  %v175_v48 = vld [vmem:[%s10791_s1 + $0x418] sm:$0xff]  ;;  %v3981_v50 = vpack.c.bf16 %v156_v42, %v140_v41 }
   0xc   :  { %4168 = vmatprep.subr.bf16.mxu1 %v4167_v30  ;;  %v158_v45 = vld [vmem:[%s10791_s1 + $0x390] sm:$0xff]  ;;  %v189_v47 = vld [vmem:[%s10791_s1 + $0x488] sm:$0xff]  ;;  %v191_v49 = vld [vmem:[%s10791_s1 + $0x498] sm:$0xff] }
   0xd   :  { %v4173_v51 = vpack.c.bf16 %v158_v45, %v142_v44  ;;  %v3983_v52 = vpack.c.bf16 %v189_v47, %v173_v46  ;;  %v172_v53 = vld [vmem:[%s10791_s1 + $0x400] sm:$0xff]  ;;  %v174_v55 = vld [vmem:[%s10791_s1 + $0x410] sm:$0xff]  ;;  %v4175_v56 = vpack.c.bf16 %v191_v49, %v175_v48  ;;  %v205_v58 = vld [vmem:[%s10791_s1 + $0x508] sm:$0xff] }
   0xe   :  { %3978 = vmatpush1.bf16.msra.mxu0 %v3977_v34  ;;  %v188_v54 = vld [vmem:[%s10791_s1 + $0x480] sm:$0xff]  ;;  %v190_v57 = vld [vmem:[%s10791_s1 + $0x490] sm:$0xff]  ;;  %v221_v59 = vld [vmem:[%s10791_s1 + $0x588] sm:$0xff] }
   0xf   :  { %4170 = vmatpush1.bf16.msra.mxu1 %v4169_v38  ;;  %3980 = vmatprep.subr.bf16.mxu0 %v3979_v39  ;;  %v207_v60 = vld [vmem:[%s10791_s1 + $0x518] sm:$0xff]  ;;  %v3985_v62 = vpack.c.bf16 %v188_v54, %v172_v53  ;;  %v4177_v63 = vpack.c.bf16 %v190_v57, %v174_v55  ;;  %v3987_v0 = vpack.c.bf16 %v221_v59, %v205_v58  ;;  %v204_v1 = vld [vmem:[%s10791_s1 + $0x500] sm:$0xff]  ;;  %v206_v3 = vld [vmem:[%s10791_s1 + $0x510] sm:$0xff] }
  0x10   :  { %4172 = vmatprep.subr.bf16.mxu1 %v4171_v43  ;;  %v223_v61 = vld [vmem:[%s10791_s1 + $0x598] sm:$0xff]  ;;  %v220_v2 = vld [vmem:[%s10791_s1 + $0x580] sm:$0xff]  ;;  %v222_v5 = vld [vmem:[%s10791_s1 + $0x590] sm:$0xff] }
  0x11   :  { %v4179_v4 = vpack.c.bf16 %v223_v61, %v207_v60  ;;  %v237_v6 = vld [vmem:[%s10791_s1 + $0x608] sm:$0xff]  ;;  %v239_v8 = vld [vmem:[%s10791_s1 + $0x618] sm:$0xff]  ;;  %v3989_v10 = vpack.c.bf16 %v220_v2, %v204_v1  ;;  %v4181_v11 = vpack.c.bf16 %v222_v5, %v206_v3  ;;  %v236_v13 = vld [vmem:[%s10791_s1 + $0x600] sm:$0xff] }
  0x12   :  { %3982 = vmatpush1.bf16.msra.mxu0 %v3981_v50  ;;  %v253_v7 = vld [vmem:[%s10791_s1 + $0x688] sm:$0xff]  ;;  %v255_v9 = vld [vmem:[%s10791_s1 + $0x698] sm:$0xff]  ;;  %v252_v14 = vld [vmem:[%s10791_s1 + $0x680] sm:$0xff] }
  0x13   :  { %4174 = vmatpush1.bf16.msra.mxu1 %v4173_v51  ;;  %3984 = vmatprep.subr.bf16.mxu0 %v3983_v52  ;;  %v3991_v12 = vpack.c.bf16 %v253_v7, %v237_v6  ;;  %v238_v15 = vld [vmem:[%s10791_s1 + $0x610] sm:$0xff]  ;;  %v4183_v16 = vpack.c.bf16 %v255_v9, %v239_v8  ;;  %v269_v18 = vld [vmem:[%s10791_s1 + $0x708] sm:$0xff]  ;;  %v271_v20 = vld [vmem:[%s10791_s1 + $0x718] sm:$0xff]  ;;  %v3993_v22 = vpack.c.bf16 %v252_v14, %v236_v13 }
  0x14   :  { %4176 = vmatprep.subr.bf16.mxu1 %v4175_v56  ;;  %v254_v17 = vld [vmem:[%s10791_s1 + $0x690] sm:$0xff]  ;;  %v285_v19 = vld [vmem:[%s10791_s1 + $0x788] sm:$0xff]  ;;  %v287_v21 = vld [vmem:[%s10791_s1 + $0x798] sm:$0xff] }
  0x15   :  { %v4185_v23 = vpack.c.bf16 %v254_v17, %v238_v15  ;;  %v3995_v24 = vpack.c.bf16 %v285_v19, %v269_v18  ;;  %v268_v25 = vld [vmem:[%s10791_s1 + $0x700] sm:$0xff]  ;;  %v270_v27 = vld [vmem:[%s10791_s1 + $0x710] sm:$0xff]  ;;  %v4187_v28 = vpack.c.bf16 %v287_v21, %v271_v20  ;;  %v301_v30 = vld [vmem:[%s10791_s1 + $0x808] sm:$0xff] }
  0x16   :  { %3986 = vmatpush1.bf16.msra.mxu0 %v3985_v62  ;;  %v284_v26 = vld [vmem:[%s10791_s1 + $0x780] sm:$0xff]  ;;  %v286_v29 = vld [vmem:[%s10791_s1 + $0x790] sm:$0xff]  ;;  %v317_v31 = vld [vmem:[%s10791_s1 + $0x888] sm:$0xff] }
  0x17   :  { %4178 = vmatpush1.bf16.msra.mxu1 %v4177_v63  ;;  %3988 = vmatprep.subr.bf16.mxu0 %v3987_v0  ;;  %v303_v32 = vld [vmem:[%s10791_s1 + $0x818] sm:$0xff]  ;;  %v3997_v34 = vpack.c.bf16 %v284_v26, %v268_v25  ;;  %v4189_v35 = vpack.c.bf16 %v286_v29, %v270_v27  ;;  %v3999_v36 = vpack.c.bf16 %v317_v31, %v301_v30  ;;  %v300_v37 = vld [vmem:[%s10791_s1 + $0x800] sm:$0xff]  ;;  %v302_v39 = vld [vmem:[%s10791_s1 + $0x810] sm:$0xff] }
  0x18   :  { %4180 = vmatprep.subr.bf16.mxu1 %v4179_v4  ;;  %v319_v33 = vld [vmem:[%s10791_s1 + $0x898] sm:$0xff]  ;;  %v316_v38 = vld [vmem:[%s10791_s1 + $0x880] sm:$0xff]  ;;  %v318_v41 = vld [vmem:[%s10791_s1 + $0x890] sm:$0xff] }
  0x19   :  { %v4191_v40 = vpack.c.bf16 %v319_v33, %v303_v32  ;;  %v333_v42 = vld [vmem:[%s10791_s1 + $0x908] sm:$0xff]  ;;  %v335_v44 = vld [vmem:[%s10791_s1 + $0x918] sm:$0xff]  ;;  %v4001_v46 = vpack.c.bf16 %v316_v38, %v300_v37  ;;  %v4193_v47 = vpack.c.bf16 %v318_v41, %v302_v39  ;;  %v332_v49 = vld [vmem:[%s10791_s1 + $0x900] sm:$0xff] }
  0x1a   :  { %3990 = vmatpush1.bf16.msra.mxu0 %v3989_v10  ;;  %v349_v43 = vld [vmem:[%s10791_s1 + $0x988] sm:$0xff]  ;;  %v351_v45 = vld [vmem:[%s10791_s1 + $0x998] sm:$0xff]  ;;  %v348_v50 = vld [vmem:[%s10791_s1 + $0x980] sm:$0xff] }
  0x1b   :  { %4182 = vmatpush1.bf16.msra.mxu1 %v4181_v11  ;;  %3992 = vmatprep.subr.bf16.mxu0 %v3991_v12  ;;  %v4003_v48 = vpack.c.bf16 %v349_v43, %v333_v42  ;;  %v334_v51 = vld [vmem:[%s10791_s1 + $0x910] sm:$0xff]  ;;  %v4195_v52 = vpack.c.bf16 %v351_v45, %v335_v44  ;;  %v365_v54 = vld [vmem:[%s10791_s1 + $0xa08] sm:$0xff]  ;;  %v367_v56 = vld [vmem:[%s10791_s1 + $0xa18] sm:$0xff]  ;;  %v4005_v58 = vpack.c.bf16 %v348_v50, %v332_v49 }
  0x1c   :  { %4184 = vmatprep.subr.bf16.mxu1 %v4183_v16  ;;  %v350_v53 = vld [vmem:[%s10791_s1 + $0x990] sm:$0xff]  ;;  %v381_v55 = vld [vmem:[%s10791_s1 + $0xa88] sm:$0xff]  ;;  %v383_v57 = vld [vmem:[%s10791_s1 + $0xa98] sm:$0xff] }
  0x1d   :  { %v4197_v59 = vpack.c.bf16 %v350_v53, %v334_v51  ;;  %v4007_v60 = vpack.c.bf16 %v381_v55, %v365_v54  ;;  %v364_v61 = vld [vmem:[%s10791_s1 + $0xa00] sm:$0xff]  ;;  %v366_v63 = vld [vmem:[%s10791_s1 + $0xa10] sm:$0xff]  ;;  %v4199_v0 = vpack.c.bf16 %v383_v57, %v367_v56  ;;  %v397_v2 = vld [vmem:[%s10791_s1 + $0xb08] sm:$0xff] }
  0x1e   :  { %3994 = vmatpush1.bf16.msra.mxu0 %v3993_v22  ;;  %v380_v62 = vld [vmem:[%s10791_s1 + $0xa80] sm:$0xff]  ;;  %v382_v1 = vld [vmem:[%s10791_s1 + $0xa90] sm:$0xff]  ;;  %v413_v3 = vld [vmem:[%s10791_s1 + $0xb88] sm:$0xff] }
  0x1f   :  { %4186 = vmatpush1.bf16.msra.mxu1 %v4185_v23  ;;  %3996 = vmatprep.subr.bf16.mxu0 %v3995_v24  ;;  %v399_v4 = vld [vmem:[%s10791_s1 + $0xb18] sm:$0xff]  ;;  %v4009_v6 = vpack.c.bf16 %v380_v62, %v364_v61  ;;  %v396_v7 = vld [vmem:[%s10791_s1 + $0xb00] sm:$0xff]  ;;  %v4201_v8 = vpack.c.bf16 %v382_v1, %v366_v63  ;;  %v4011_v9 = vpack.c.bf16 %v413_v3, %v397_v2  ;;  %v398_v11 = vld [vmem:[%s10791_s1 + $0xb10] sm:$0xff] }
  0x20   :  { %4188 = vmatprep.subr.bf16.mxu1 %v4187_v28  ;;  %v415_v5 = vld [vmem:[%s10791_s1 + $0xb98] sm:$0xff]  ;;  %v412_v10 = vld [vmem:[%s10791_s1 + $0xb80] sm:$0xff]  ;;  %v414_v12 = vld [vmem:[%s10791_s1 + $0xb90] sm:$0xff] }
  0x21   :  { %v4203_v13 = vpack.c.bf16 %v415_v5, %v399_v4  ;;  %v429_v14 = vld [vmem:[%s10791_s1 + $0xc08] sm:$0xff]  ;;  %v431_v17 = vld [vmem:[%s10791_s1 + $0xc18] sm:$0xff]  ;;  %v4013_v19 = vpack.c.bf16 %v412_v10, %v396_v7  ;;  %v4205_v20 = vpack.c.bf16 %v414_v12, %v398_v11  ;;  %v428_v22 = vld [vmem:[%s10791_s1 + $0xc00] sm:$0xff] }
  0x22   :  { %3998 = vmatpush1.bf16.msra.mxu0 %v3997_v34  ;;  %v445_v15 = vld [vmem:[%s10791_s1 + $0xc88] sm:$0xff]  ;;  %v447_v18 = vld [vmem:[%s10791_s1 + $0xc98] sm:$0xff]  ;;  %v444_v23 = vld [vmem:[%s10791_s1 + $0xc80] sm:$0xff] }
  0x23   :  { %4190 = vmatpush1.bf16.msra.mxu1 %v4189_v35  ;;  %4000 = vmatprep.subr.bf16.mxu0 %v3999_v36  ;;  %v21_v16 = vld [vmem:[%s10792_s0 + $0x8] sm:$0xff]  ;;  %v4015_v21 = vpack.c.bf16 %v445_v15, %v429_v14  ;;  %v430_v24 = vld [vmem:[%s10791_s1 + $0xc10] sm:$0xff]  ;;  %v4207_v25 = vpack.c.bf16 %v447_v18, %v431_v17  ;;  %v463_v29 = vld [vmem:[%s10791_s1 + $0xd18] sm:$0xff]  ;;  %v4017_v31 = vpack.c.bf16 %v444_v23, %v428_v22 }
  0x24   :  { %4192 = vmatprep.subr.bf16.mxu1 %v4191_v40  ;;  %1644 = vmatprep.mubr.f32.mxu0 %v21_v16  ;;  %v446_v26 = vld [vmem:[%s10791_s1 + $0xc90] sm:$0xff]  ;;  %v461_v27 = vld [vmem:[%s10791_s1 + $0xd08] sm:$0xff]  ;;  %v479_v30 = vld [vmem:[%s10791_s1 + $0xd98] sm:$0xff] }
  0x25   :  { %1911 = vmatprep.mubr.f32.mxu1 %v21_v16  ;;  %v477_v28 = vld [vmem:[%s10791_s1 + $0xd88] sm:$0xff]  ;;  %v4209_v32 = vpack.c.bf16 %v446_v26, %v430_v24  ;;  %v460_v34 = vld [vmem:[%s10791_s1 + $0xd00] sm:$0xff]  ;;  %v462_v36 = vld [vmem:[%s10791_s1 + $0xd10] sm:$0xff]  ;;  %v4211_v37 = vpack.c.bf16 %v479_v30, %v463_v29 }
  0x26   :  { %4002 = vmatpush1.bf16.msra.mxu0 %v4001_v46  ;;  %v4019_v33 = vpack.c.bf16 %v477_v28, %v461_v27  ;;  %v476_v35 = vld [vmem:[%s10791_s1 + $0xd80] sm:$0xff]  ;;  %v478_v38 = vld [vmem:[%s10791_s1 + $0xd90] sm:$0xff]  ;;  %v493_v39 = vld [vmem:[%s10791_s1 + $0xe08] sm:$0xff] }
  0x27   :  { %4194 = vmatpush1.bf16.msra.mxu1 %v4193_v47  ;;  %4004 = vmatprep.subr.bf16.mxu0 %v4003_v48  ;;  %v509_v40 = vld [vmem:[%s10791_s1 + $0xe88] sm:$0xff]  ;;  %v495_v41 = vld [vmem:[%s10791_s1 + $0xe18] sm:$0xff]  ;;  %v4021_v43 = vpack.c.bf16 %v476_v35, %v460_v34  ;;  %v4213_v44 = vpack.c.bf16 %v478_v38, %v462_v36  ;;  %v492_v46 = vld [vmem:[%s10791_s1 + $0xe00] sm:$0xff] }
  0x28   :  { %4196 = vmatprep.subr.bf16.mxu1 %v4195_v52  ;;  %v511_v42 = vld [vmem:[%s10791_s1 + $0xe98] sm:$0xff]  ;;  %v4023_v45 = vpack.c.bf16 %v509_v40, %v493_v39  ;;  %v508_v47 = vld [vmem:[%s10791_s1 + $0xe80] sm:$0xff]  ;;  %v494_v48 = vld [vmem:[%s10791_s1 + $0xe10] sm:$0xff] }
  0x29   :  { %v4215_v49 = vpack.c.bf16 %v511_v42, %v495_v41  ;;  %v510_v50 = vld [vmem:[%s10791_s1 + $0xe90] sm:$0xff]  ;;  %v525_v51 = vld [vmem:[%s10791_s1 + $0xf08] sm:$0xff]  ;;  %v527_v53 = vld [vmem:[%s10791_s1 + $0xf18] sm:$0xff]  ;;  %v4025_v55 = vpack.c.bf16 %v508_v47, %v492_v46 }
  0x2a   :  { %4006 = vmatpush1.bf16.msra.mxu0 %v4005_v58  ;;  %v541_v52 = vld [vmem:[%s10791_s1 + $0xf88] sm:$0xff]  ;;  %v543_v54 = vld [vmem:[%s10791_s1 + $0xf98] sm:$0xff]  ;;  %v4217_v56 = vpack.c.bf16 %v510_v50, %v494_v48  ;;  %v524_v58 = vld [vmem:[%s10791_s1 + $0xf00] sm:$0xff] }
  0x2b   :  { %4198 = vmatpush1.bf16.msra.mxu1 %v4197_v59  ;;  %4008 = vmatprep.subr.bf16.mxu0 %v4007_v60  ;;  %v4027_v57 = vpack.c.bf16 %v541_v52, %v525_v51  ;;  %v540_v59 = vld [vmem:[%s10791_s1 + $0xf80] sm:$0xff]  ;;  %v526_v60 = vld [vmem:[%s10791_s1 + $0xf10] sm:$0xff]  ;;  %v4219_v61 = vpack.c.bf16 %v543_v54, %v527_v53  ;;  %v557_v63 = vld [vmem:[%s10791_s1 + $0x1008] sm:$0xff] }
  0x2c   :  { %4200 = vmatprep.subr.bf16.mxu1 %v4199_v0  ;;  %v542_v62 = vld [vmem:[%s10791_s1 + $0xf90] sm:$0xff]  ;;  %v573_v0 = vld [vmem:[%s10791_s1 + $0x1088] sm:$0xff]  ;;  %v559_v1 = vld [vmem:[%s10791_s1 + $0x1018] sm:$0xff]  ;;  %v4029_v3 = vpack.c.bf16 %v540_v59, %v524_v58 }
  0x2d   :  { %v575_v2 = vld [vmem:[%s10791_s1 + $0x1098] sm:$0xff]  ;;  %v4221_v4 = vpack.c.bf16 %v542_v62, %v526_v60  ;;  %v4031_v5 = vpack.c.bf16 %v573_v0, %v557_v63  ;;  %v572_v7 = vld [vmem:[%s10791_s1 + $0x1080] sm:$0xff]  ;;  %v574_v10 = vld [vmem:[%s10791_s1 + $0x1090] sm:$0xff] }
  0x2e   :  { %4010 = vmatpush1.bf16.msra.mxu0 %v4009_v6  ;;  %v556_v6 = vld [vmem:[%s10791_s1 + $0x1000] sm:$0xff]  ;;  %v589_v11 = vld [vmem:[%s10791_s1 + $0x1108] sm:$0xff]  ;;  %v607_v14 = vld [vmem:[%s10791_s1 + $0x1198] sm:$0xff] }
  0x2f   :  { %4202 = vmatpush1.bf16.msra.mxu1 %v4201_v8  ;;  %4012 = vmatprep.subr.bf16.mxu0 %v4011_v9  ;;  %v558_v8 = vld [vmem:[%s10791_s1 + $0x1010] sm:$0xff]  ;;  %v4223_v9 = vpack.c.bf16 %v575_v2, %v559_v1  ;;  %v605_v12 = vld [vmem:[%s10791_s1 + $0x1188] sm:$0xff]  ;;  %v20_v15 = vld [vmem:[%s10792_s0] sm:$0xff]  ;;  %v4033_v16 = vpack.c.bf16 %v572_v7, %v556_v6 }
  0x30   :  { %4204 = vmatprep.subr.bf16.mxu1 %v4203_v13  ;;  %v591_v13 = vld [vmem:[%s10791_s1 + $0x1118] sm:$0xff]  ;;  %v4225_v17 = vpack.c.bf16 %v574_v10, %v558_v8  ;;  %v4035_v18 = vpack.c.bf16 %v605_v12, %v589_v11  ;;  %v606_v23 = vld [vmem:[%s10791_s1 + $0x1190] sm:$0xff]  ;;  %v621_v24 = vld [vmem:[%s10791_s1 + $0x1208] sm:$0xff] }
  0x31   :  { %v4227_v22 = vpack.c.bf16 %v607_v14, %v591_v13  ;;  %v623_v26 = vld [vmem:[%s10791_s1 + $0x1218] sm:$0xff]  ;;  %v638_v35 = vld [vmem:[%s10791_s1 + $0x1290] sm:$0xff]  ;;  %v653_v36 = vld [vmem:[%s10791_s1 + $0x1308] sm:$0xff] }
  0x32   :  { %4014 = vmatpush1.bf16.msra.mxu0 %v4013_v19  ;;  %v588_v19 = vld [vmem:[%s10791_s1 + $0x1100] sm:$0xff]  ;;  %v639_v27 = vld [vmem:[%s10791_s1 + $0x1298] sm:$0xff]  ;;  %v670_v47 = vld [vmem:[%s10791_s1 + $0x1390] sm:$0xff] }
  0x33   :  { %4206 = vmatpush1.bf16.msra.mxu1 %v4205_v20  ;;  %4016 = vmatprep.subr.bf16.mxu0 %v4015_v21  ;;  %v604_v20 = vld [vmem:[%s10791_s1 + $0x1180] sm:$0xff]  ;;  %v590_v21 = vld [vmem:[%s10791_s1 + $0x1110] sm:$0xff]  ;;  %v4231_v34 = vpack.c.bf16 %v639_v27, %v623_v26  ;;  %v655_v38 = vld [vmem:[%s10791_s1 + $0x1318] sm:$0xff] }
  0x34   :  { %4208 = vmatprep.subr.bf16.mxu1 %v4207_v25  ;;  %v637_v25 = vld [vmem:[%s10791_s1 + $0x1288] sm:$0xff]  ;;  %v4037_v28 = vpack.c.bf16 %v604_v20, %v588_v19  ;;  %v4229_v29 = vpack.c.bf16 %v606_v23, %v590_v21  ;;  %v671_v39 = vld [vmem:[%s10791_s1 + $0x1398] sm:$0xff]  ;;  %v684_v53 = vld [vmem:[%s10791_s1 + $0x1400] sm:$0xff] }
  0x35   :  { %v4039_v30 = vpack.c.bf16 %v637_v25, %v621_v24  ;;  %v4235_v46 = vpack.c.bf16 %v671_v39, %v655_v38  ;;  %v685_v48 = vld [vmem:[%s10791_s1 + $0x1408] sm:$0xff]  ;;  %v687_v50 = vld [vmem:[%s10791_s1 + $0x1418] sm:$0xff]  ;;  %v702_v58 = vld [vmem:[%s10791_s1 + $0x1490] sm:$0xff] }
  0x36   :  { %4018 = vmatpush1.bf16.msra.mxu0 %v4017_v31  ;;  %v620_v31 = vld [vmem:[%s10791_s1 + $0x1200] sm:$0xff]  ;;  %v703_v51 = vld [vmem:[%s10791_s1 + $0x1498] sm:$0xff]  ;;  %v717_v60 = vld [vmem:[%s10791_s1 + $0x1508] sm:$0xff] }
  0x37   :  { %4210 = vmatpush1.bf16.msra.mxu1 %v4209_v32  ;;  %4020 = vmatprep.subr.bf16.mxu0 %v4019_v33  ;;  %v636_v32 = vld [vmem:[%s10791_s1 + $0x1280] sm:$0xff]  ;;  %v622_v33 = vld [vmem:[%s10791_s1 + $0x1210] sm:$0xff]  ;;  %v4239_v59 = vpack.c.bf16 %v703_v51, %v687_v50  ;;  %v27_v62 = vld [vmem:[%s10792_s0 + $0x38] sm:$0xff] }
  0x38   :  { %4212 = vmatprep.subr.bf16.mxu1 %v4211_v37  ;;  %v669_v37 = vld [vmem:[%s10791_s1 + $0x1388] sm:$0xff]  ;;  %v4041_v40 = vpack.c.bf16 %v636_v32, %v620_v31  ;;  %v4233_v41 = vpack.c.bf16 %v638_v35, %v622_v33  ;;  %v719_v63 = vld [vmem:[%s10791_s1 + $0x1518] sm:$0xff]  ;;  %v26_v1 = vld [vmem:[%s10792_s0 + $0x30] sm:$0xff] }
  0x39   :  { %v4043_v42 = vpack.c.bf16 %v669_v37, %v653_v36  ;;  %v735_v0 = vld [vmem:[%s10791_s1 + $0x1598] sm:$0xff]  ;;  %v732_v6 = vld [vmem:[%s10791_s1 + $0x1580] sm:$0xff]  ;;  %v718_v7 = vld [vmem:[%s10791_s1 + $0x1510] sm:$0xff] }
  0x3a   :  { %4022 = vmatpush1.bf16.msra.mxu0 %v4021_v43  ;;  %v652_v43 = vld [vmem:[%s10791_s1 + $0x1300] sm:$0xff]  ;;  %v33_v8 = vld [vmem:[%s10792_s0 + $0x68] sm:$0xff]  ;;  %v734_v10 = vld [vmem:[%s10791_s1 + $0x1590] sm:$0xff] }
  0x3b   :  { %4214 = vmatpush1.bf16.msra.mxu1 %v4213_v44  ;;  %4024 = vmatprep.subr.bf16.mxu0 %v4023_v45  ;;  %v668_v44 = vld [vmem:[%s10791_s1 + $0x1380] sm:$0xff]  ;;  %v654_v45 = vld [vmem:[%s10791_s1 + $0x1310] sm:$0xff]  ;;  %v749_v11 = vld [vmem:[%s10791_s1 + $0x1608] sm:$0xff]  ;;  %v4245_v19 = vpack.c.bf16 %v734_v10, %v718_v7 }
  0x3c   :  { %4216 = vmatprep.subr.bf16.mxu1 %v4215_v49  ;;  %v701_v49 = vld [vmem:[%s10791_s1 + $0x1488] sm:$0xff]  ;;  %v4045_v52 = vpack.c.bf16 %v668_v44, %v652_v43  ;;  %v4237_v54 = vpack.c.bf16 %v670_v47, %v654_v45  ;;  %v751_v13 = vld [vmem:[%s10791_s1 + $0x1618] sm:$0xff]  ;;  %v764_v21 = vld [vmem:[%s10791_s1 + $0x1680] sm:$0xff] }
  0x3d   :  { %v765_v12 = vld [vmem:[%s10791_s1 + $0x1688] sm:$0xff]  ;;  %v767_v14 = vld [vmem:[%s10791_s1 + $0x1698] sm:$0xff]  ;;  %v766_v23 = vld [vmem:[%s10791_s1 + $0x1690] sm:$0xff] }
  0x3e   :  { %4026 = vmatpush1.bf16.msra.mxu0 %v4025_v55  ;;  %v4047_v55 = vpack.c.bf16 %v701_v49, %v685_v48  ;;  %v4055_v20 = vpack.c.bf16 %v765_v12, %v749_v11  ;;  %v4247_v24 = vpack.c.bf16 %v767_v14, %v751_v13  ;;  %v781_v25 = vld [vmem:[%s10791_s1 + $0x1708] sm:$0xff]  ;;  %v38_v27 = vld [vmem:[%s10792_s0 + $0x90] sm:$0xff]  ;;  %v23_v31 = vld [vmem:[%s10792_s0 + $0x18] sm:$0xff] }
  0x3f   :  { %4218 = vmatpush1.bf16.msra.mxu1 %v4217_v56  ;;  %4028 = vmatprep.subr.bf16.mxu0 %v4027_v57  ;;  %v700_v56 = vld [vmem:[%s10791_s1 + $0x1480] sm:$0xff]  ;;  %v686_v57 = vld [vmem:[%s10791_s1 + $0x1410] sm:$0xff]  ;;  %v797_v26 = vld [vmem:[%s10791_s1 + $0x1788] sm:$0xff] }
  0x40   :  { %4220 = vmatprep.subr.bf16.mxu1 %v4219_v61  ;;  %v733_v61 = vld [vmem:[%s10791_s1 + $0x1588] sm:$0xff]  ;;  %v4049_v2 = vpack.c.bf16 %v700_v56, %v684_v53  ;;  %v4059_v33 = vpack.c.bf16 %v797_v26, %v781_v25  ;;  %v796_v35 = vld [vmem:[%s10791_s1 + $0x1780] sm:$0xff]  ;;  %v782_v36 = vld [vmem:[%s10791_s1 + $0x1710] sm:$0xff] }
  0x41   :  { %v798_v38 = vld [vmem:[%s10791_s1 + $0x1790] sm:$0xff]  ;;  %v813_v39 = vld [vmem:[%s10791_s1 + $0x1808] sm:$0xff]  ;;  %v828_v47 = vld [vmem:[%s10791_s1 + $0x1880] sm:$0xff] }
  0x42   :  { %4030 = vmatpush1.bf16.msra.mxu0 %v4029_v3  ;;  %v716_v3 = vld [vmem:[%s10791_s1 + $0x1500] sm:$0xff]  ;;  %v4253_v44 = vpack.c.bf16 %v798_v38, %v782_v36  ;;  %v814_v48 = vld [vmem:[%s10791_s1 + $0x1810] sm:$0xff]  ;;  %v845_v51 = vld [vmem:[%s10791_s1 + $0x1908] sm:$0xff] }
  0x43   :  { %4222 = vmatpush1.bf16.msra.mxu1 %v4221_v4  ;;  %4032 = vmatprep.subr.bf16.mxu0 %v4031_v5  ;;  %v4241_v4 = vpack.c.bf16 %v702_v58, %v686_v57  ;;  %v4051_v5 = vpack.c.bf16 %v733_v61, %v717_v60  ;;  %v830_v50 = vld [vmem:[%s10791_s1 + $0x1890] sm:$0xff]  ;;  %v847_v53 = vld [vmem:[%s10791_s1 + $0x1918] sm:$0xff]  ;;  %v844_v58 = vld [vmem:[%s10791_s1 + $0x1900] sm:$0xff] }
  0x44   :  { %4224 = vmatprep.subr.bf16.mxu1 %v4223_v9  ;;  %v4243_v9 = vpack.c.bf16 %v735_v0, %v719_v63  ;;  %v4257_v56 = vpack.c.bf16 %v830_v50, %v814_v48  ;;  %v846_v60 = vld [vmem:[%s10791_s1 + $0x1910] sm:$0xff]  ;;  %v877_v63 = vld [vmem:[%s10791_s1 + $0x1a08] sm:$0xff]  ;;  %v892_v7 = vld [vmem:[%s10791_s1 + $0x1a80] sm:$0xff] }
  0x45   :  { %1645 = vmatmul.mubr.f32.vlgmr.msra.gmra.mrb[0].mxu0 %v20_v15  ;;  %v893_v0 = vld [vmem:[%s10791_s1 + $0x1a88] sm:$0xff]  ;;  %v894_v10 = vld [vmem:[%s10791_s1 + $0x1a90] sm:$0xff]  ;;  %v911_v13 = vld [vmem:[%s10791_s1 + $0x1b18] sm:$0xff] }
  0x46   :  { %4034 = vmatpush1.bf16.msra.mxu0 %v4033_v16  ;;  %1912 = vmatmul.mubr.f32.vlgmr.msra.gmra.mrb[0].mxu1 %v20_v15  ;;  %v32_v15 = vld [vmem:[%s10792_s0 + $0x60] sm:$0xff]  ;;  %v4053_v16 = vpack.c.bf16 %v732_v6, %v716_v3  ;;  %v909_v11 = vld [vmem:[%s10791_s1 + $0x1b08] sm:$0xff]  ;;  %v927_v14 = vld [vmem:[%s10791_s1 + $0x1b98] sm:$0xff] }
  0x47   :  { %4226 = vmatpush1.bf16.msra.mxu1 %v4225_v17  ;;  %4036 = vmatprep.subr.bf16.mxu0 %v4035_v18  ;;  %v748_v17 = vld [vmem:[%s10791_s1 + $0x1600] sm:$0xff]  ;;  %v39_v18 = vld [vmem:[%s10792_s0 + $0x98] sm:$0xff]  ;;  %v925_v12 = vld [vmem:[%s10791_s1 + $0x1b88] sm:$0xff] }
  0x48   :  { %4228 = vmatprep.subr.bf16.mxu1 %v4227_v22  ;;  %1650 = vmatprep.mubr.f32.mxu0 %v27_v62  ;;  %v750_v22 = vld [vmem:[%s10791_s1 + $0x1610] sm:$0xff]  ;;  %v876_v6 = vld [vmem:[%s10791_s1 + $0x1a00] sm:$0xff]  ;;  %v943_v25 = vld [vmem:[%s10791_s1 + $0x1c18] sm:$0xff] }
  0x49   :  { %1917 = vmatprep.mubr.f32.mxu1 %v27_v62  ;;  %1651 = vmatmul.mubr.f32.gmra.mrb[2].mxu0 %v26_v1  ;;  %v4249_v32 = vpack.c.bf16 %v766_v23, %v750_v22  ;;  %v862_v62 = vld [vmem:[%s10791_s1 + $0x1990] sm:$0xff]  ;;  %v941_v23 = vld [vmem:[%s10791_s1 + $0x1c08] sm:$0xff]  ;;  %v959_v26 = vld [vmem:[%s10791_s1 + $0x1c98] sm:$0xff] }
  0x4a   :  { %4038 = vmatpush1.bf16.msra.mxu0 %v4037_v28  ;;  %1918 = vmatmul.mubr.f32.gmra.mrb[2].mxu1 %v26_v1  ;;  %v783_v28 = vld [vmem:[%s10791_s1 + $0x1718] sm:$0xff]  ;;  %v926_v22 = vld [vmem:[%s10791_s1 + $0x1b90] sm:$0xff]  ;;  %v989_v36 = vld [vmem:[%s10791_s1 + $0x1d88] sm:$0xff] }
  0x4b   :  { %4230 = vmatpush1.bf16.msra.mxu1 %v4229_v29  ;;  %4040 = vmatprep.subr.bf16.mxu0 %v4039_v30  ;;  %v799_v29 = vld [vmem:[%s10791_s1 + $0x1798] sm:$0xff]  ;;  %v4057_v30 = vpack.c.bf16 %v764_v21, %v748_v17  ;;  %v4075_v17 = vpack.c.bf16 %v925_v12, %v909_v11  ;;  %v4267_v21 = vpack.c.bf16 %v927_v14, %v911_v13  ;;  %v1021_v48 = vld [vmem:[%s10791_s1 + $0x1e88] sm:$0xff]  ;;  %v1068_v14 = vld [vmem:[%s10791_s1 + $0x2000] sm:$0xff] }
  0x4c   :  { %4232 = vmatprep.subr.bf16.mxu1 %v4231_v34  ;;  %1656 = vmatprep.mubr.f32.mxu0 %v33_v8  ;;  %v780_v34 = vld [vmem:[%s10791_s1 + $0x1700] sm:$0xff]  ;;  %v4251_v37 = vpack.c.bf16 %v799_v29, %v783_v28  ;;  %v879_v1 = vld [vmem:[%s10791_s1 + $0x1a18] sm:$0xff] }
  0x4d   :  { %1923 = vmatprep.mubr.f32.mxu1 %v33_v8  ;;  %1657 = vmatmul.mubr.f32.gmra.mrb[4].mxu0 %v32_v15  ;;  %v4061_v43 = vpack.c.bf16 %v796_v35, %v780_v34  ;;  %v878_v8 = vld [vmem:[%s10791_s1 + $0x1a10] sm:$0xff]  ;;  %v973_v35 = vld [vmem:[%s10791_s1 + $0x1d08] sm:$0xff]  ;;  %v991_v38 = vld [vmem:[%s10791_s1 + $0x1d98] sm:$0xff] }
  0x4e   :  { %4042 = vmatpush1.bf16.msra.mxu0 %v4041_v40  ;;  %1924 = vmatmul.mubr.f32.gmra.mrb[4].mxu1 %v32_v15  ;;  %v829_v40 = vld [vmem:[%s10791_s1 + $0x1888] sm:$0xff]  ;;  %v4073_v15 = vpack.c.bf16 %v892_v7, %v876_v6  ;;  %v958_v34 = vld [vmem:[%s10791_s1 + $0x1c90] sm:$0xff]  ;;  %v1023_v50 = vld [vmem:[%s10791_s1 + $0x1e98] sm:$0xff] }
  0x4f   :  { %4234 = vmatpush1.bf16.msra.mxu1 %v4233_v41  ;;  %4044 = vmatprep.subr.bf16.mxu0 %v4043_v42  ;;  %v815_v41 = vld [vmem:[%s10791_s1 + $0x1818] sm:$0xff]  ;;  %v4063_v45 = vpack.c.bf16 %v829_v40, %v813_v39  ;;  %v1054_v6 = vld [vmem:[%s10791_s1 + $0x1f90] sm:$0xff]  ;;  %v1069_v7 = vld [vmem:[%s10791_s1 + $0x2008] sm:$0xff] }
  0x50   :  { %4236 = vmatprep.subr.bf16.mxu1 %v4235_v46  ;;  %1662 = vmatprep.mubr.f32.mxu0 %v39_v18  ;;  %v831_v42 = vld [vmem:[%s10791_s1 + $0x1898] sm:$0xff]  ;;  %v812_v46 = vld [vmem:[%s10791_s1 + $0x1800] sm:$0xff] }
  0x51   :  { %1929 = vmatprep.mubr.f32.mxu1 %v39_v18  ;;  %1663 = vmatmul.mubr.f32.gmra.mrb[6].mxu0 %v38_v27  ;;  %v4255_v49 = vpack.c.bf16 %v831_v42, %v815_v41  ;;  %v908_v18 = vld [vmem:[%s10791_s1 + $0x1b00] sm:$0xff]  ;;  %v4083_v41 = vpack.c.bf16 %v989_v36, %v973_v35  ;;  %v1151_v35 = vld [vmem:[%s10791_s1 + $0x2298] sm:$0xff]  ;;  %v29_v36 = vld [vmem:[%s10792_s0 + $0x48] sm:$0xff] }
  0x52   :  { %4046 = vmatpush1.bf16.msra.mxu0 %v4045_v52  ;;  %1930 = vmatmul.mubr.f32.gmra.mrb[6].mxu1 %v38_v27  ;;  %v861_v52 = vld [vmem:[%s10791_s1 + $0x1988] sm:$0xff]  ;;  %v972_v42 = vld [vmem:[%s10791_s1 + $0x1d00] sm:$0xff] }
  0x53   :  { %4238 = vmatpush1.bf16.msra.mxu1 %v4237_v54  ;;  %4048 = vmatprep.subr.bf16.mxu0 %v4047_v55  ;;  %v863_v54 = vld [vmem:[%s10791_s1 + $0x1998] sm:$0xff]  ;;  %v4065_v55 = vpack.c.bf16 %v828_v47, %v812_v46  ;;  %v4067_v57 = vpack.c.bf16 %v861_v52, %v845_v51  ;;  %v990_v46 = vld [vmem:[%s10791_s1 + $0x1d90] sm:$0xff]  ;;  %v1005_v47 = vld [vmem:[%s10791_s1 + $0x1e08] sm:$0xff] }
  0x54   :  { %4240 = vmatprep.subr.bf16.mxu1 %v4239_v59  ;;  %1733 = vmatprep.mubr.f32.mxu0 %v23_v31  ;;  %v860_v59 = vld [vmem:[%s10791_s1 + $0x1980] sm:$0xff]  ;;  %v4259_v61 = vpack.c.bf16 %v863_v54, %v847_v53  ;;  %v4087_v53 = vpack.c.bf16 %v1021_v48, %v1005_v47  ;;  %v1181_v47 = vld [vmem:[%s10791_s1 + $0x2388] sm:$0xff]  ;;  %v1167_v48 = vld [vmem:[%s10791_s1 + $0x2318] sm:$0xff] }
  0x55   :  { %2000 = vmatprep.mubr.f32.mxu1 %v23_v31  ;;  %v4069_v3 = vpack.c.bf16 %v860_v59, %v844_v58  ;;  %v956_v31 = vld [vmem:[%s10791_s1 + $0x1c80] sm:$0xff]  ;;  %v1022_v58 = vld [vmem:[%s10791_s1 + $0x1e90] sm:$0xff]  ;;  %v1037_v59 = vld [vmem:[%s10791_s1 + $0x1f08] sm:$0xff] }
  0x56   :  { %4050 = vmatpush1.bf16.msra.mxu0 %v4049_v2  ;;  %v895_v2 = vld [vmem:[%s10791_s1 + $0x1a98] sm:$0xff]  ;;  %v1004_v54 = vld [vmem:[%s10791_s1 + $0x1e00] sm:$0xff] }
  0x57   :  { %4242 = vmatpush1.bf16.msra.mxu1 %v4241_v4  ;;  %4052 = vmatprep.subr.bf16.mxu0 %v4051_v5  ;;  %v4261_v4 = vpack.c.bf16 %v862_v62, %v846_v60  ;;  %v4071_v5 = vpack.c.bf16 %v893_v0, %v877_v63  ;;  %v1053_v60 = vld [vmem:[%s10791_s1 + $0x1f88] sm:$0xff]  ;;  %v1055_v62 = vld [vmem:[%s10791_s1 + $0x1f98] sm:$0xff] }
  0x58   :  { %4244 = vmatprep.subr.bf16.mxu1 %v4243_v9  ;;  %v4263_v9 = vpack.c.bf16 %v895_v2, %v879_v1  ;;  %v4091_v1 = vpack.c.bf16 %v1053_v60, %v1037_v59  ;;  %v1036_v2 = vld [vmem:[%s10791_s1 + $0x1f00] sm:$0xff]  ;;  %v1182_v59 = vld [vmem:[%s10791_s1 + $0x2390] sm:$0xff]  ;;  %v1197_v60 = vld [vmem:[%s10791_s1 + $0x2408] sm:$0xff] }
  0x5a   :  { %4054 = vmatpush1.bf16.msra.mxu0 %v4053_v16  ;;  %v4265_v16 = vpack.c.bf16 %v894_v10, %v878_v8  ;;  %v1085_v8 = vld [vmem:[%s10791_s1 + $0x2088] sm:$0xff]  ;;  %v1087_v10 = vld [vmem:[%s10791_s1 + $0x2098] sm:$0xff] }
  0x5b   :  { %4246 = vmatpush1.bf16.msra.mxu1 %v4245_v19  ;;  %4056 = vmatprep.subr.bf16.mxu0 %v4055_v20  ;;  %v924_v19 = vld [vmem:[%s10791_s1 + $0x1b80] sm:$0xff]  ;;  %v910_v20 = vld [vmem:[%s10791_s1 + $0x1b10] sm:$0xff]  ;;  %v4095_v13 = vpack.c.bf16 %v1085_v8, %v1069_v7 }
  0x5c   :  { %4248 = vmatprep.subr.bf16.mxu1 %v4247_v24  ;;  %v957_v24 = vld [vmem:[%s10791_s1 + $0x1c88] sm:$0xff]  ;;  %v4077_v27 = vpack.c.bf16 %v924_v19, %v908_v18  ;;  %v4269_v28 = vpack.c.bf16 %v926_v22, %v910_v20  ;;  %v1086_v18 = vld [vmem:[%s10791_s1 + $0x2090] sm:$0xff]  ;;  %v1119_v22 = vld [vmem:[%s10791_s1 + $0x2198] sm:$0xff] }
  0x5d   :  { %v4079_v29 = vpack.c.bf16 %v957_v24, %v941_v23  ;;  %v1101_v19 = vld [vmem:[%s10791_s1 + $0x2108] sm:$0xff]  ;;  %v22_v23 = vld [vmem:[%s10792_s0 + $0x10] sm:$0xff] }
  0x5e   :  { %4058 = vmatpush1.bf16.msra.mxu0 %v4057_v30  ;;  %v940_v30 = vld [vmem:[%s10791_s1 + $0x1c00] sm:$0xff]  ;;  %v1117_v20 = vld [vmem:[%s10791_s1 + $0x2188] sm:$0xff]  ;;  %v1198_v7 = vld [vmem:[%s10791_s1 + $0x2410] sm:$0xff] }
  0x5f   :  { %4250 = vmatpush1.bf16.msra.mxu1 %v4249_v32  ;;  %4060 = vmatprep.subr.bf16.mxu0 %v4059_v33  ;;  %v942_v32 = vld [vmem:[%s10791_s1 + $0x1c10] sm:$0xff]  ;;  %v4271_v33 = vpack.c.bf16 %v959_v26, %v943_v25  ;;  %v4081_v39 = vpack.c.bf16 %v956_v31, %v940_v30  ;;  %v4099_v26 = vpack.c.bf16 %v1117_v20, %v1101_v19  ;;  %v1244_v19 = vld [vmem:[%s10791_s1 + $0x2580] sm:$0xff] }
  0x60   :  { %4252 = vmatprep.subr.bf16.mxu1 %v4251_v37  ;;  %v975_v37 = vld [vmem:[%s10791_s1 + $0x1d18] sm:$0xff]  ;;  %v4273_v40 = vpack.c.bf16 %v958_v34, %v942_v32  ;;  %v1118_v31 = vld [vmem:[%s10791_s1 + $0x2190] sm:$0xff]  ;;  %v1133_v32 = vld [vmem:[%s10791_s1 + $0x2208] sm:$0xff] }
  0x61   :  { %v1135_v34 = vld [vmem:[%s10791_s1 + $0x2218] sm:$0xff]  ;;  %v1230_v20 = vld [vmem:[%s10791_s1 + $0x2510] sm:$0xff] }
  0x62   :  { %4062 = vmatpush1.bf16.msra.mxu0 %v4061_v43  ;;  %v988_v43 = vld [vmem:[%s10791_s1 + $0x1d80] sm:$0xff] }
  0x63   :  { %4254 = vmatpush1.bf16.msra.mxu1 %v4253_v44  ;;  %4064 = vmatprep.subr.bf16.mxu0 %v4063_v45  ;;  %v974_v44 = vld [vmem:[%s10791_s1 + $0x1d10] sm:$0xff]  ;;  %v4275_v45 = vpack.c.bf16 %v991_v38, %v975_v37  ;;  %v4085_v51 = vpack.c.bf16 %v988_v43, %v972_v42  ;;  %v28_v38 = vld [vmem:[%s10792_s0 + $0x40] sm:$0xff] }
  0x64   :  { %4256 = vmatprep.subr.bf16.mxu1 %v4255_v49  ;;  %v1007_v49 = vld [vmem:[%s10791_s1 + $0x1e18] sm:$0xff]  ;;  %v4277_v52 = vpack.c.bf16 %v990_v46, %v974_v44  ;;  %v1148_v42 = vld [vmem:[%s10791_s1 + $0x2280] sm:$0xff]  ;;  %v1134_v43 = vld [vmem:[%s10791_s1 + $0x2210] sm:$0xff]  ;;  %v4295_v44 = vpack.c.bf16 %v1151_v35, %v1135_v34 }
  0x65   :  { %v1165_v46 = vld [vmem:[%s10791_s1 + $0x2308] sm:$0xff]  ;;  %v1278_v34 = vld [vmem:[%s10791_s1 + $0x2690] sm:$0xff] }
  0x66   :  { %4066 = vmatpush1.bf16.msra.mxu0 %v4065_v55  ;;  %v1020_v55 = vld [vmem:[%s10791_s1 + $0x1e80] sm:$0xff]  ;;  %v1293_v35 = vld [vmem:[%s10791_s1 + $0x2708] sm:$0xff] }
  0x67   :  { %4258 = vmatpush1.bf16.msra.mxu1 %v4257_v56  ;;  %4068 = vmatprep.subr.bf16.mxu0 %v4067_v57  ;;  %v1006_v56 = vld [vmem:[%s10791_s1 + $0x1e10] sm:$0xff]  ;;  %v4279_v57 = vpack.c.bf16 %v1023_v50, %v1007_v49  ;;  %v4089_v63 = vpack.c.bf16 %v1020_v55, %v1004_v54  ;;  %v1183_v49 = vld [vmem:[%s10791_s1 + $0x2398] sm:$0xff]  ;;  %v4107_v54 = vpack.c.bf16 %v1181_v47, %v1165_v46  ;;  %v1164_v55 = vld [vmem:[%s10791_s1 + $0x2300] sm:$0xff] }
  0x68   :  { %4260 = vmatprep.subr.bf16.mxu1 %v4259_v61  ;;  %v1039_v61 = vld [vmem:[%s10791_s1 + $0x1f18] sm:$0xff]  ;;  %v4281_v0 = vpack.c.bf16 %v1022_v58, %v1006_v56  ;;  %v1180_v56 = vld [vmem:[%s10791_s1 + $0x2380] sm:$0xff]  ;;  %v4299_v58 = vpack.c.bf16 %v1183_v49, %v1167_v48  ;;  %v1310_v46 = vld [vmem:[%s10791_s1 + $0x2790] sm:$0xff] }
  0x69   :  { %v35_v50 = vld [vmem:[%s10792_s0 + $0x78] sm:$0xff]  ;;  %v1325_v47 = vld [vmem:[%s10791_s1 + $0x2808] sm:$0xff] }
  0x6a   :  { %4070 = vmatpush1.bf16.msra.mxu0 %v4069_v3  ;;  %v1052_v3 = vld [vmem:[%s10791_s1 + $0x1f80] sm:$0xff]  ;;  %v1341_v48 = vld [vmem:[%s10791_s1 + $0x2888] sm:$0xff]  ;;  %v1327_v49 = vld [vmem:[%s10791_s1 + $0x2818] sm:$0xff] }
  0x6b   :  { %4262 = vmatpush1.bf16.msra.mxu1 %v4261_v4  ;;  %4072 = vmatprep.subr.bf16.mxu0 %v4071_v5  ;;  %v1038_v4 = vld [vmem:[%s10791_s1 + $0x1f10] sm:$0xff]  ;;  %v4283_v5 = vpack.c.bf16 %v1055_v62, %v1039_v61  ;;  %v4093_v11 = vpack.c.bf16 %v1052_v3, %v1036_v2  ;;  %v1213_v61 = vld [vmem:[%s10791_s1 + $0x2488] sm:$0xff]  ;;  %v1199_v62 = vld [vmem:[%s10791_s1 + $0x2418] sm:$0xff] }
  0x6c   :  { %4264 = vmatprep.subr.bf16.mxu1 %v4263_v9  ;;  %v1071_v9 = vld [vmem:[%s10791_s1 + $0x2018] sm:$0xff]  ;;  %v4285_v12 = vpack.c.bf16 %v1054_v6, %v1038_v4  ;;  %v40_v2 = vld [vmem:[%s10792_s0 + $0xa0] sm:$0xff]  ;;  %v4111_v4 = vpack.c.bf16 %v1213_v61, %v1197_v60  ;;  %v1373_v60 = vld [vmem:[%s10791_s1 + $0x2988] sm:$0xff] }
  0x6d   :  { %v1212_v6 = vld [vmem:[%s10791_s1 + $0x2480] sm:$0xff]  ;;  %v1359_v61 = vld [vmem:[%s10791_s1 + $0x2918] sm:$0xff] }
  0x6e   :  { %4074 = vmatpush1.bf16.msra.mxu0 %v4073_v15  ;;  %v1084_v15 = vld [vmem:[%s10791_s1 + $0x2080] sm:$0xff] }
  0x6f   :  { %4266 = vmatpush1.bf16.msra.mxu1 %v4265_v16  ;;  %4076 = vmatprep.subr.bf16.mxu0 %v4075_v17  ;;  %v1070_v16 = vld [vmem:[%s10791_s1 + $0x2010] sm:$0xff]  ;;  %v4287_v17 = vpack.c.bf16 %v1087_v10, %v1071_v9  ;;  %v4097_v24 = vpack.c.bf16 %v1084_v15, %v1068_v14  ;;  %v1229_v10 = vld [vmem:[%s10791_s1 + $0x2508] sm:$0xff] }
  0x70   :  { %4268 = vmatprep.subr.bf16.mxu1 %v4267_v21  ;;  %v1103_v21 = vld [vmem:[%s10791_s1 + $0x2118] sm:$0xff]  ;;  %v4289_v25 = vpack.c.bf16 %v1086_v18, %v1070_v16  ;;  %v1214_v9 = vld [vmem:[%s10791_s1 + $0x2490] sm:$0xff]  ;;  %v25_v14 = vld [vmem:[%s10792_s0 + $0x28] sm:$0xff] }
  0x71   :  { %v4291_v30 = vpack.c.bf16 %v1119_v22, %v1103_v21  ;;  %v4305_v16 = vpack.c.bf16 %v1214_v9, %v1198_v7  ;;  %v1228_v18 = vld [vmem:[%s10791_s1 + $0x2500] sm:$0xff]  ;;  %v1246_v22 = vld [vmem:[%s10791_s1 + $0x2590] sm:$0xff]  ;;  %v1389_v7 = vld [vmem:[%s10791_s1 + $0x2a08] sm:$0xff] }
  0x72   :  { %4078 = vmatpush1.bf16.msra.mxu0 %v4077_v27  ;;  %v1100_v27 = vld [vmem:[%s10791_s1 + $0x2100] sm:$0xff]  ;;  %v1391_v9 = vld [vmem:[%s10791_s1 + $0x2a18] sm:$0xff] }
  0x73   :  { %4270 = vmatpush1.bf16.msra.mxu1 %v4269_v28  ;;  %4080 = vmatprep.subr.bf16.mxu0 %v4079_v29  ;;  %v1116_v28 = vld [vmem:[%s10791_s1 + $0x2180] sm:$0xff]  ;;  %v1102_v29 = vld [vmem:[%s10791_s1 + $0x2110] sm:$0xff] }
  0x74   :  { %4272 = vmatprep.subr.bf16.mxu1 %v4271_v33  ;;  %v1149_v33 = vld [vmem:[%s10791_s1 + $0x2288] sm:$0xff]  ;;  %v4101_v37 = vpack.c.bf16 %v1116_v28, %v1100_v27  ;;  %v4117_v27 = vpack.c.bf16 %v1244_v19, %v1228_v18  ;;  %v4309_v28 = vpack.c.bf16 %v1246_v22, %v1230_v20  ;;  %v1406_v18 = vld [vmem:[%s10791_s1 + $0x2a90] sm:$0xff]  ;;  %v1439_v22 = vld [vmem:[%s10791_s1 + $0x2b98] sm:$0xff] }
  0x75   :  { %v1421_v19 = vld [vmem:[%s10791_s1 + $0x2b08] sm:$0xff] }
  0x76   :  { %4082 = vmatpush1.bf16.msra.mxu0 %v4081_v39  ;;  %v4293_v39 = vpack.c.bf16 %v1118_v31, %v1102_v29  ;;  %v1276_v31 = vld [vmem:[%s10791_s1 + $0x2680] sm:$0xff]  ;;  %v1437_v20 = vld [vmem:[%s10791_s1 + $0x2b88] sm:$0xff] }
  0x77   :  { %4274 = vmatpush1.bf16.msra.mxu1 %v4273_v40  ;;  %4084 = vmatprep.subr.bf16.mxu0 %v4083_v41  ;;  %v4103_v40 = vpack.c.bf16 %v1149_v33, %v1133_v32  ;;  %v1132_v41 = vld [vmem:[%s10791_s1 + $0x2200] sm:$0xff]  ;;  %v1262_v32 = vld [vmem:[%s10791_s1 + $0x2610] sm:$0xff] }
  0x78   :  { %4276 = vmatprep.subr.bf16.mxu1 %v4275_v45  ;;  %v1150_v45 = vld [vmem:[%s10791_s1 + $0x2290] sm:$0xff] }
  0x7a   :  { %4086 = vmatpush1.bf16.msra.mxu0 %v4085_v51  ;;  %v4105_v51 = vpack.c.bf16 %v1148_v42, %v1132_v41  ;;  %v1292_v42 = vld [vmem:[%s10791_s1 + $0x2700] sm:$0xff] }
  0x7b   :  { %4278 = vmatpush1.bf16.msra.mxu1 %v4277_v52  ;;  %4088 = vmatprep.subr.bf16.mxu0 %v4087_v53  ;;  %v34_v52 = vld [vmem:[%s10792_s0 + $0x70] sm:$0xff]  ;;  %v4297_v53 = vpack.c.bf16 %v1150_v45, %v1134_v43  ;;  %v1308_v43 = vld [vmem:[%s10791_s1 + $0x2780] sm:$0xff] }
  0x7c   :  { %4280 = vmatprep.subr.bf16.mxu1 %v4279_v57  ;;  %v1166_v57 = vld [vmem:[%s10791_s1 + $0x2310] sm:$0xff] }
  0x7d   :  { %v4301_v3 = vpack.c.bf16 %v1182_v59, %v1166_v57  ;;  %v1357_v59 = vld [vmem:[%s10791_s1 + $0x2908] sm:$0xff] }
  0x7e   :  { %4090 = vmatpush1.bf16.msra.mxu0 %v4089_v63  ;;  %v1215_v63 = vld [vmem:[%s10791_s1 + $0x2498] sm:$0xff] }
  0x7f   :  { %4282 = vmatpush1.bf16.msra.mxu1 %v4281_v0  ;;  %4092 = vmatprep.subr.bf16.mxu0 %v4091_v1  ;;  %v41_v0 = vld [vmem:[%s10792_s0 + $0xa8] sm:$0xff]  ;;  %v4109_v1 = vpack.c.bf16 %v1180_v56, %v1164_v55  ;;  %v4303_v8 = vpack.c.bf16 %v1215_v63, %v1199_v62  ;;  %v1340_v55 = vld [vmem:[%s10791_s1 + $0x2880] sm:$0xff]  ;;  %v1326_v56 = vld [vmem:[%s10791_s1 + $0x2810] sm:$0xff] }
  0x80   :  { %4284 = vmatprep.subr.bf16.mxu1 %v4283_v5  ;;  %v1196_v5 = vld [vmem:[%s10791_s1 + $0x2400] sm:$0xff]  ;;  %v1375_v62 = vld [vmem:[%s10791_s1 + $0x2998] sm:$0xff] }
  0x81   :  { %v4113_v15 = vpack.c.bf16 %v1212_v6, %v1196_v5  ;;  %v4323_v5 = vpack.c.bf16 %v1375_v62, %v1359_v61  ;;  %v1374_v6 = vld [vmem:[%s10791_s1 + $0x2990] sm:$0xff]  ;;  %v1516_v62 = vld [vmem:[%s10791_s1 + $0x2e00] sm:$0xff] }
  0x82   :  { %4094 = vmatpush1.bf16.msra.mxu0 %v4093_v11  ;;  %v1245_v11 = vld [vmem:[%s10791_s1 + $0x2588] sm:$0xff] }
  0x83   :  { %4286 = vmatpush1.bf16.msra.mxu1 %v4285_v12  ;;  %4096 = vmatprep.subr.bf16.mxu0 %v4095_v13  ;;  %v1231_v12 = vld [vmem:[%s10791_s1 + $0x2518] sm:$0xff] }
  0x84   :  { %4288 = vmatprep.subr.bf16.mxu1 %v4287_v17  ;;  %v1247_v13 = vld [vmem:[%s10791_s1 + $0x2598] sm:$0xff]  ;;  %v4115_v17 = vpack.c.bf16 %v1245_v11, %v1229_v10 }
  0x85   :  { %1734 = vmatmul.mubr.f32.vlgmr.msra.gmra.mrb[0].mxu0 %v22_v23  ;;  %v4307_v21 = vpack.c.bf16 %v1247_v13, %v1231_v12  ;;  %v1407_v10 = vld [vmem:[%s10791_s1 + $0x2a98] sm:$0xff] }
  0x86   :  { %4098 = vmatpush1.bf16.msra.mxu0 %v4097_v24  ;;  %2001 = vmatmul.mubr.f32.vlgmr.msra.gmra.mrb[0].mxu1 %v22_v23  ;;  %v1261_v23 = vld [vmem:[%s10791_s1 + $0x2608] sm:$0xff] }
  0x87   :  { %4290 = vmatpush1.bf16.msra.mxu1 %v4289_v25  ;;  %4100 = vmatprep.subr.bf16.mxu0 %v4099_v26  ;;  %v1277_v24 = vld [vmem:[%s10791_s1 + $0x2688] sm:$0xff]  ;;  %v1263_v25 = vld [vmem:[%s10791_s1 + $0x2618] sm:$0xff] }
  0x88   :  { %4292 = vmatprep.subr.bf16.mxu1 %v4291_v30  ;;  %1739 = vmatprep.mubr.f32.mxu0 %v29_v36  ;;  %v1279_v26 = vld [vmem:[%s10791_s1 + $0x2698] sm:$0xff]  ;;  %v4119_v29 = vpack.c.bf16 %v1277_v24, %v1261_v23  ;;  %v1260_v30 = vld [vmem:[%s10791_s1 + $0x2600] sm:$0xff] }
  0x89   :  { %2006 = vmatprep.mubr.f32.mxu1 %v29_v36  ;;  %1740 = vmatmul.mubr.f32.gmra.mrb[2].mxu0 %v28_v38  ;;  %v4311_v33 = vpack.c.bf16 %v1279_v26, %v1263_v25  ;;  %v1309_v36 = vld [vmem:[%s10791_s1 + $0x2788] sm:$0xff]  ;;  %v4139_v25 = vpack.c.bf16 %v1437_v20, %v1421_v19  ;;  %v1420_v26 = vld [vmem:[%s10791_s1 + $0x2b00] sm:$0xff] }
  0x8a   :  { %4102 = vmatpush1.bf16.msra.mxu0 %v4101_v37  ;;  %2007 = vmatmul.mubr.f32.gmra.mrb[2].mxu1 %v28_v38  ;;  %v1295_v37 = vld [vmem:[%s10791_s1 + $0x2718] sm:$0xff]  ;;  %v4123_v41 = vpack.c.bf16 %v1309_v36, %v1293_v35 }
  0x8b   :  { %4294 = vmatpush1.bf16.msra.mxu1 %v4293_v39  ;;  %4104 = vmatprep.subr.bf16.mxu0 %v4103_v40  ;;  %v1311_v38 = vld [vmem:[%s10791_s1 + $0x2798] sm:$0xff]  ;;  %v4121_v39 = vpack.c.bf16 %v1276_v31, %v1260_v30  ;;  %v4313_v40 = vpack.c.bf16 %v1278_v34, %v1262_v32  ;;  %v1438_v30 = vld [vmem:[%s10791_s1 + $0x2b90] sm:$0xff]  ;;  %v1453_v31 = vld [vmem:[%s10791_s1 + $0x2c08] sm:$0xff] }
  0x8c   :  { %4296 = vmatprep.subr.bf16.mxu1 %v4295_v44  ;;  %1745 = vmatprep.mubr.f32.mxu0 %v35_v50  ;;  %v1294_v44 = vld [vmem:[%s10791_s1 + $0x2710] sm:$0xff]  ;;  %v4315_v45 = vpack.c.bf16 %v1311_v38, %v1295_v37  ;;  %v1469_v32 = vld [vmem:[%s10791_s1 + $0x2c88] sm:$0xff]  ;;  %v1471_v34 = vld [vmem:[%s10791_s1 + $0x2c98] sm:$0xff] }
  0x8d   :  { %2012 = vmatprep.mubr.f32.mxu1 %v35_v50  ;;  %1746 = vmatmul.mubr.f32.gmra.mrb[4].mxu0 %v34_v52  ;;  %v1343_v50 = vld [vmem:[%s10791_s1 + $0x2898] sm:$0xff]  ;;  %v4143_v37 = vpack.c.bf16 %v1469_v32, %v1453_v31  ;;  %v1452_v38 = vld [vmem:[%s10791_s1 + $0x2c00] sm:$0xff] }
  0x8e   :  { %4106 = vmatpush1.bf16.msra.mxu0 %v4105_v51  ;;  %2013 = vmatmul.mubr.f32.gmra.mrb[4].mxu1 %v34_v52  ;;  %v4125_v51 = vpack.c.bf16 %v1308_v43, %v1292_v42  ;;  %v4317_v52 = vpack.c.bf16 %v1310_v46, %v1294_v44  ;;  %v4319_v57 = vpack.c.bf16 %v1343_v50, %v1327_v49  ;;  %v1470_v42 = vld [vmem:[%s10791_s1 + $0x2c90] sm:$0xff]  ;;  %v1485_v43 = vld [vmem:[%s10791_s1 + $0x2d08] sm:$0xff]  ;;  %v1503_v46 = vld [vmem:[%s10791_s1 + $0x2d98] sm:$0xff] }
  0x8f   :  { %4298 = vmatpush1.bf16.msra.mxu1 %v4297_v53  ;;  %4108 = vmatprep.subr.bf16.mxu0 %v4107_v54  ;;  %v4127_v53 = vpack.c.bf16 %v1341_v48, %v1325_v47  ;;  %v1324_v54 = vld [vmem:[%s10791_s1 + $0x2800] sm:$0xff]  ;;  %v1501_v44 = vld [vmem:[%s10791_s1 + $0x2d88] sm:$0xff]  ;;  %v83_v31 = vld [vmem:[%s10791_s1 + $0x138] sm:$0xff] }
  0x90   :  { %4300 = vmatprep.subr.bf16.mxu1 %v4299_v58  ;;  %1751 = vmatprep.mubr.f32.mxu0 %v41_v0  ;;  %v1342_v58 = vld [vmem:[%s10791_s1 + $0x2890] sm:$0xff]  ;;  %v4129_v63 = vpack.c.bf16 %v1340_v55, %v1324_v54  ;;  %v4147_v49 = vpack.c.bf16 %v1501_v44, %v1485_v43  ;;  %v1484_v50 = vld [vmem:[%s10791_s1 + $0x2d00] sm:$0xff]  ;;  %v1517_v55 = vld [vmem:[%s10791_s1 + $0x2e08] sm:$0xff] }
  0x91   :  { %2018 = vmatprep.mubr.f32.mxu1 %v41_v0  ;;  %1752 = vmatmul.mubr.f32.gmra.mrb[6].mxu0 %v40_v2  ;;  %v4321_v0 = vpack.c.bf16 %v1342_v58, %v1326_v56  ;;  %v1502_v54 = vld [vmem:[%s10791_s1 + $0x2d90] sm:$0xff]  ;;  %v1533_v56 = vld [vmem:[%s10791_s1 + $0x2e88] sm:$0xff]  ;;  %v1535_v58 = vld [vmem:[%s10791_s1 + $0x2e98] sm:$0xff] }
  0x92   :  { %4110 = vmatpush1.bf16.msra.mxu0 %v4109_v1  ;;  %2019 = vmatmul.mubr.f32.gmra.mrb[6].mxu1 %v40_v2  ;;  %v4131_v1 = vpack.c.bf16 %v1373_v60, %v1357_v59  ;;  %v1356_v2 = vld [vmem:[%s10791_s1 + $0x2900] sm:$0xff]  ;;  %v4151_v61 = vpack.c.bf16 %v1533_v56, %v1517_v55  ;;  %v99_v32 = vld [vmem:[%s10791_s1 + $0x1b8] sm:$0xff]  ;;  %v30_v43 = vld [vmem:[%s10792_s0 + $0x50] sm:$0xff] }
  0x93   :  { %4302 = vmatpush1.bf16.msra.mxu1 %v4301_v3  ;;  %4112 = vmatprep.subr.bf16.mxu0 %v4111_v4  ;;  %v1372_v3 = vld [vmem:[%s10791_s1 + $0x2980] sm:$0xff]  ;;  %v1358_v4 = vld [vmem:[%s10791_s1 + $0x2910] sm:$0xff]  ;;  %v145_v56 = vld [vmem:[%s10791_s1 + $0x328] sm:$0xff] }
  0x94   :  { %4304 = vmatprep.subr.bf16.mxu1 %v4303_v8  ;;  %1822 = vmatprep.mubr.f32.mxu0 %v25_v14  ;;  %v1405_v8 = vld [vmem:[%s10791_s1 + $0x2a88] sm:$0xff]  ;;  %v4133_v11 = vpack.c.bf16 %v1372_v3, %v1356_v2  ;;  %v4325_v12 = vpack.c.bf16 %v1374_v6, %v1358_v4  ;;  %v1534_v2 = vld [vmem:[%s10791_s1 + $0x2e90] sm:$0xff]  ;;  %v1567_v6 = vld [vmem:[%s10791_s1 + $0x2f98] sm:$0xff] }
  0x95   :  { %2089 = vmatprep.mubr.f32.mxu1 %v25_v14  ;;  %v4135_v13 = vpack.c.bf16 %v1405_v8, %v1389_v7  ;;  %v1388_v14 = vld [vmem:[%s10791_s1 + $0x2a00] sm:$0xff]  ;;  %v1549_v3 = vld [vmem:[%s10791_s1 + $0x2f08] sm:$0xff] }
  0x96   :  { %4114 = vmatpush1.bf16.msra.mxu0 %v4113_v15  ;;  %v1404_v15 = vld [vmem:[%s10791_s1 + $0x2a80] sm:$0xff]  ;;  %v1565_v4 = vld [vmem:[%s10791_s1 + $0x2f88] sm:$0xff] }
  0x97   :  { %4306 = vmatpush1.bf16.msra.mxu1 %v4305_v16  ;;  %4116 = vmatprep.subr.bf16.mxu0 %v4115_v17  ;;  %v1390_v16 = vld [vmem:[%s10791_s1 + $0x2a10] sm:$0xff]  ;;  %v4327_v17 = vpack.c.bf16 %v1407_v10, %v1391_v9  ;;  %v4137_v23 = vpack.c.bf16 %v1404_v15, %v1388_v14  ;;  %v4155_v9 = vpack.c.bf16 %v1565_v4, %v1549_v3  ;;  %v1548_v10 = vld [vmem:[%s10791_s1 + $0x2f00] sm:$0xff]  ;;  %v49_v15 = vld [vmem:[%s10791_s1 + $0x28] sm:$0xff] }
  0x98   :  { %4308 = vmatprep.subr.bf16.mxu1 %v4307_v21  ;;  %v1423_v21 = vld [vmem:[%s10791_s1 + $0x2b18] sm:$0xff]  ;;  %v4329_v24 = vpack.c.bf16 %v1406_v18, %v1390_v16  ;;  %v1566_v14 = vld [vmem:[%s10791_s1 + $0x2f90] sm:$0xff]  ;;  %v65_v16 = vld [vmem:[%s10791_s1 + $0xa8] sm:$0xff] }
  0x99   :  { %v67_v18 = vld [vmem:[%s10791_s1 + $0xb8] sm:$0xff]  ;;  %v162_v3 = vld [vmem:[%s10791_s1 + $0x3b0] sm:$0xff]  ;;  %v177_v4 = vld [vmem:[%s10791_s1 + $0x428] sm:$0xff] }
  0x9a   :  { %4118 = vmatpush1.bf16.msra.mxu0 %v4117_v27  ;;  %v1436_v27 = vld [vmem:[%s10791_s1 + $0x2b80] sm:$0xff] }
  0x9b   :  { %4310 = vmatpush1.bf16.msra.mxu1 %v4309_v28  ;;  %4120 = vmatprep.subr.bf16.mxu0 %v4119_v29  ;;  %v1422_v28 = vld [vmem:[%s10791_s1 + $0x2b10] sm:$0xff]  ;;  %v4331_v29 = vpack.c.bf16 %v1439_v22, %v1423_v21  ;;  %v4141_v35 = vpack.c.bf16 %v1436_v27, %v1420_v26  ;;  %v4351_v21 = vpack.c.bf16 %v65_v16, %v49_v15  ;;  %v48_v22 = vld [vmem:[%s10791_s1 + $0x20] sm:$0xff]  ;;  %v81_v27 = vld [vmem:[%s10791_s1 + $0x128] sm:$0xff] }
  0x9c   :  { %4312 = vmatprep.subr.bf16.mxu1 %v4311_v33  ;;  %v1455_v33 = vld [vmem:[%s10791_s1 + $0x2c18] sm:$0xff]  ;;  %v4333_v36 = vpack.c.bf16 %v1438_v30, %v1422_v28  ;;  %v66_v26 = vld [vmem:[%s10791_s1 + $0xb0] sm:$0xff]  ;;  %v97_v28 = vld [vmem:[%s10791_s1 + $0x1a8] sm:$0xff] }
  0x9d   :  { %v178_v15 = vld [vmem:[%s10791_s1 + $0x430] sm:$0xff] }
  0x9e   :  { %4122 = vmatpush1.bf16.msra.mxu0 %v4121_v39  ;;  %v1468_v39 = vld [vmem:[%s10791_s1 + $0x2c80] sm:$0xff] }
  0x9f   :  { %4314 = vmatpush1.bf16.msra.mxu1 %v4313_v40  ;;  %4124 = vmatprep.subr.bf16.mxu0 %v4123_v41  ;;  %v1454_v40 = vld [vmem:[%s10791_s1 + $0x2c10] sm:$0xff]  ;;  %v4335_v41 = vpack.c.bf16 %v1471_v34, %v1455_v33  ;;  %v4145_v47 = vpack.c.bf16 %v1468_v39, %v1452_v38  ;;  %v80_v34 = vld [vmem:[%s10791_s1 + $0x120] sm:$0xff] }
  0xa0   :  { %4316 = vmatprep.subr.bf16.mxu1 %v4315_v45  ;;  %v1487_v45 = vld [vmem:[%s10791_s1 + $0x2d18] sm:$0xff]  ;;  %v4337_v48 = vpack.c.bf16 %v1470_v42, %v1454_v40  ;;  %v82_v38 = vld [vmem:[%s10791_s1 + $0x130] sm:$0xff]  ;;  %v4547_v40 = vpack.c.bf16 %v99_v32, %v83_v31  ;;  %v129_v42 = vld [vmem:[%s10791_s1 + $0x2a8] sm:$0xff] }
  0xa1   :  { %v98_v39 = vld [vmem:[%s10791_s1 + $0x1b0] sm:$0xff]  ;;  %v257_v31 = vld [vmem:[%s10791_s1 + $0x6a8] sm:$0xff] }
  0xa2   :  { %4126 = vmatpush1.bf16.msra.mxu0 %v4125_v51  ;;  %v1500_v51 = vld [vmem:[%s10791_s1 + $0x2d80] sm:$0xff]  ;;  %v5679_v32 = vld [vmem:[%s10792_s0 + $0x8] sm:$0xff] }
  0xa3   :  { %4318 = vmatpush1.bf16.msra.mxu1 %v4317_v52  ;;  %4128 = vmatprep.subr.bf16.mxu0 %v4127_v53  ;;  %v1486_v52 = vld [vmem:[%s10791_s1 + $0x2d10] sm:$0xff]  ;;  %v4339_v53 = vpack.c.bf16 %v1503_v46, %v1487_v45  ;;  %v4149_v59 = vpack.c.bf16 %v1500_v51, %v1484_v50  ;;  %v115_v45 = vld [vmem:[%s10791_s1 + $0x238] sm:$0xff]  ;;  %v37_v50 = vld [vmem:[%s10792_s0 + $0x88] sm:$0xff] }
  0xa4   :  { %4320 = vmatprep.subr.bf16.mxu1 %v4319_v57  ;;  %v1519_v57 = vld [vmem:[%s10791_s1 + $0x2e18] sm:$0xff]  ;;  %v4341_v60 = vpack.c.bf16 %v1502_v54, %v1486_v52  ;;  %v114_v52 = vld [vmem:[%s10791_s1 + $0x230] sm:$0xff]  ;;  %v36_v54 = vld [vmem:[%s10792_s0 + $0x80] sm:$0xff] }
  0xa5   :  { %v131_v46 = vld [vmem:[%s10791_s1 + $0x2b8] sm:$0xff] }
  0xa6   :  { %4130 = vmatpush1.bf16.msra.mxu0 %v4129_v63  ;;  %v1532_v63 = vld [vmem:[%s10791_s1 + $0x2e80] sm:$0xff]  ;;  %v4551_v55 = vpack.c.bf16 %v131_v46, %v115_v45  ;;  %v275_v45 = vld [vmem:[%s10791_s1 + $0x738] sm:$0xff] }
  0xa7   :  { %4322 = vmatpush1.bf16.msra.mxu1 %v4321_v0  ;;  %4132 = vmatprep.subr.bf16.mxu0 %v4131_v1  ;;  %v1518_v0 = vld [vmem:[%s10791_s1 + $0x2e10] sm:$0xff]  ;;  %v4343_v1 = vpack.c.bf16 %v1535_v58, %v1519_v57  ;;  %v4153_v7 = vpack.c.bf16 %v1532_v63, %v1516_v62  ;;  %v161_v57 = vld [vmem:[%s10791_s1 + $0x3a8] sm:$0xff]  ;;  %v144_v63 = vld [vmem:[%s10791_s1 + $0x320] sm:$0xff] }
  0xa8   :  { %4324 = vmatprep.subr.bf16.mxu1 %v4323_v5  ;;  %v1551_v5 = vld [vmem:[%s10791_s1 + $0x2f18] sm:$0xff]  ;;  %v4345_v8 = vpack.c.bf16 %v1534_v2, %v1518_v0  ;;  %v160_v0 = vld [vmem:[%s10791_s1 + $0x3a0] sm:$0xff]  ;;  %v4363_v2 = vpack.c.bf16 %v161_v57, %v145_v56  ;;  %v321_v56 = vld [vmem:[%s10791_s1 + $0x8a8] sm:$0xff] }
  0xa9   :  { %v291_v46 = vld [vmem:[%s10791_s1 + $0x7b8] sm:$0xff] }
  0xaa   :  { %4134 = vmatpush1.bf16.msra.mxu0 %v4133_v11  ;;  %v1564_v11 = vld [vmem:[%s10791_s1 + $0x2f80] sm:$0xff]  ;;  %v307_v57 = vld [vmem:[%s10791_s1 + $0x838] sm:$0xff] }
  0xab   :  { %4326 = vmatpush1.bf16.msra.mxu1 %v4325_v12  ;;  %4136 = vmatprep.subr.bf16.mxu0 %v4135_v13  ;;  %v1550_v12 = vld [vmem:[%s10791_s1 + $0x2f10] sm:$0xff]  ;;  %v4347_v13 = vpack.c.bf16 %v1567_v6, %v1551_v5  ;;  %v4157_v19 = vpack.c.bf16 %v1564_v11, %v1548_v10  ;;  %v193_v5 = vld [vmem:[%s10791_s1 + $0x4a8] sm:$0xff]  ;;  %v4365_v10 = vpack.c.bf16 %v160_v0, %v144_v63  ;;  %v320_v63 = vld [vmem:[%s10791_s1 + $0x8a0] sm:$0xff] }
  0xac   :  { %4328 = vmatprep.subr.bf16.mxu1 %v4327_v17  ;;  %v51_v17 = vld [vmem:[%s10791_s1 + $0x38] sm:$0xff]  ;;  %v4349_v20 = vpack.c.bf16 %v1566_v14, %v1550_v12  ;;  %v4367_v12 = vpack.c.bf16 %v193_v5, %v177_v4  ;;  %v192_v14 = vld [vmem:[%s10791_s1 + $0x4a0] sm:$0xff]  ;;  %v306_v0 = vld [vmem:[%s10791_s1 + $0x830] sm:$0xff] }
  0xad   :  { %v353_v4 = vld [vmem:[%s10791_s1 + $0x9a8] sm:$0xff]  ;;  %v339_v5 = vld [vmem:[%s10791_s1 + $0x938] sm:$0xff] }
  0xae   :  { %4138 = vmatpush1.bf16.msra.mxu0 %v4137_v23  ;;  %v64_v23 = vld [vmem:[%s10791_s1 + $0xa0] sm:$0xff] }
  0xaf   :  { %4330 = vmatpush1.bf16.msra.mxu1 %v4329_v24  ;;  %4140 = vmatprep.subr.bf16.mxu0 %v4139_v25  ;;  %v4543_v24 = vpack.c.bf16 %v67_v18, %v51_v17  ;;  %v50_v25 = vld [vmem:[%s10791_s1 + $0x30] sm:$0xff]  ;;  %v4353_v30 = vpack.c.bf16 %v64_v23, %v48_v22  ;;  %v209_v18 = vld [vmem:[%s10791_s1 + $0x528] sm:$0xff] }
  0xb0   :  { %4332 = vmatprep.subr.bf16.mxu1 %v4331_v29  ;;  %v24_v29 = vld [vmem:[%s10792_s0 + $0x20] sm:$0xff]  ;;  %v4545_v33 = vpack.c.bf16 %v66_v26, %v50_v25  ;;  %v194_v17 = vld [vmem:[%s10791_s1 + $0x4b0] sm:$0xff] }
  0xb1   :  { %v4561_v23 = vpack.c.bf16 %v194_v17, %v178_v15  ;;  %v208_v25 = vld [vmem:[%s10791_s1 + $0x520] sm:$0xff]  ;;  %v369_v15 = vld [vmem:[%s10791_s1 + $0xa28] sm:$0xff]  ;;  %v371_v17 = vld [vmem:[%s10791_s1 + $0xa38] sm:$0xff] }
  0xb2   :  { %4142 = vmatpush1.bf16.msra.mxu0 %v4141_v35  ;;  %v96_v35 = vld [vmem:[%s10791_s1 + $0x1a0] sm:$0xff] }
  0xb3   :  { %4334 = vmatpush1.bf16.msra.mxu1 %v4333_v36  ;;  %4144 = vmatprep.subr.bf16.mxu0 %v4143_v37  ;;  %v31_v36 = vld [vmem:[%s10792_s0 + $0x58] sm:$0xff]  ;;  %v4355_v37 = vpack.c.bf16 %v97_v28, %v81_v27  ;;  %v4357_v44 = vpack.c.bf16 %v96_v35, %v80_v34  ;;  %v224_v26 = vld [vmem:[%s10791_s1 + $0x5a0] sm:$0xff]  ;;  %v210_v27 = vld [vmem:[%s10791_s1 + $0x530] sm:$0xff] }
  0xb4   :  { %4336 = vmatprep.subr.bf16.mxu1 %v4335_v41  ;;  %v113_v41 = vld [vmem:[%s10791_s1 + $0x228] sm:$0xff]  ;;  %v259_v34 = vld [vmem:[%s10791_s1 + $0x6b8] sm:$0xff]  ;;  %v4373_v35 = vpack.c.bf16 %v224_v26, %v208_v25  ;;  %v386_v26 = vld [vmem:[%s10791_s1 + $0xab0] sm:$0xff] }
  0xb5   :  { %v4359_v51 = vpack.c.bf16 %v129_v42, %v113_v41  ;;  %v258_v42 = vld [vmem:[%s10791_s1 + $0x6b0] sm:$0xff] }
  0xb6   :  { %4146 = vmatpush1.bf16.msra.mxu0 %v4145_v47  ;;  %v4549_v47 = vpack.c.bf16 %v98_v39, %v82_v38  ;;  %v240_v38 = vld [vmem:[%s10791_s1 + $0x620] sm:$0xff] }
  0xb7   :  { %4338 = vmatpush1.bf16.msra.mxu1 %v4337_v48  ;;  %4148 = vmatprep.subr.bf16.mxu0 %v4147_v49  ;;  %v112_v48 = vld [vmem:[%s10791_s1 + $0x220] sm:$0xff] }
  0xb8   :  { %4340 = vmatprep.subr.bf16.mxu1 %v4339_v53  ;;  %v128_v49 = vld [vmem:[%s10791_s1 + $0x2a0] sm:$0xff]  ;;  %v130_v53 = vld [vmem:[%s10791_s1 + $0x2b0] sm:$0xff] }
  0xb9   :  { %v4361_v58 = vpack.c.bf16 %v128_v49, %v112_v48  ;;  %v4553_v62 = vpack.c.bf16 %v130_v53, %v114_v52  ;;  %v256_v39 = vld [vmem:[%s10791_s1 + $0x6a0] sm:$0xff]  ;;  %v274_v52 = vld [vmem:[%s10791_s1 + $0x730] sm:$0xff]  ;;  %v4571_v53 = vpack.c.bf16 %v291_v46, %v275_v45 }
  0xba   :  { %4150 = vmatpush1.bf16.msra.mxu0 %v4149_v59  ;;  %v43_v59 = vld [vmem:[%s10792_s0 + $0xb8] sm:$0xff]  ;;  %v432_v46 = vld [vmem:[%s10791_s1 + $0xc20] sm:$0xff] }
  0xbb   :  { %4342 = vmatpush1.bf16.msra.mxu1 %v4341_v60  ;;  %4152 = vmatprep.subr.bf16.mxu0 %v4151_v61  ;;  %v147_v60 = vld [vmem:[%s10791_s1 + $0x338] sm:$0xff] }
  0xbc   :  { %4344 = vmatprep.subr.bf16.mxu1 %v4343_v1  ;;  %v163_v61 = vld [vmem:[%s10791_s1 + $0x3b8] sm:$0xff]  ;;  %v146_v1 = vld [vmem:[%s10791_s1 + $0x330] sm:$0xff] }
  0xbd   :  { %v4555_v6 = vpack.c.bf16 %v163_v61, %v147_v60  ;;  %v4557_v11 = vpack.c.bf16 %v162_v3, %v146_v1  ;;  %v337_v3 = vld [vmem:[%s10791_s1 + $0x928] sm:$0xff] }
  0xbe   :  { %4154 = vmatpush1.bf16.msra.mxu0 %v4153_v7  ;;  %v179_v7 = vld [vmem:[%s10791_s1 + $0x438] sm:$0xff] }
  0xbf   :  { %4346 = vmatpush1.bf16.msra.mxu1 %v4345_v8  ;;  %4156 = vmatprep.subr.bf16.mxu0 %v4155_v9  ;;  %v195_v8 = vld [vmem:[%s10791_s1 + $0x4b8] sm:$0xff]  ;;  %v42_v9 = vld [vmem:[%s10792_s0 + $0xb0] sm:$0xff] }
  0xc0   :  { %4348 = vmatprep.subr.bf16.mxu1 %v4347_v13  ;;  %v176_v13 = vld [vmem:[%s10791_s1 + $0x420] sm:$0xff]  ;;  %v4559_v16 = vpack.c.bf16 %v195_v8, %v179_v7 }
  0xc1   :  { %v4369_v22 = vpack.c.bf16 %v192_v14, %v176_v13  ;;  %v354_v14 = vld [vmem:[%s10791_s1 + $0x9b0] sm:$0xff] }
  0xc2   :  { %4158 = vmatpush1.bf16.msra.mxu0 %v4157_v19  ;;  %v225_v19 = vld [vmem:[%s10791_s1 + $0x5a8] sm:$0xff] }
  0xc3   :  { %4350 = vmatpush1.bf16.msra.mxu1 %v4349_v20  ;;  %4352 = vmatprep.subr.bf16.mxu0 %v4351_v21  ;;  %v211_v20 = vld [vmem:[%s10791_s1 + $0x538] sm:$0xff] }
  0xc4   :  { %4544 = vmatprep.subr.bf16.mxu1 %v4543_v24  ;;  %v227_v21 = vld [vmem:[%s10791_s1 + $0x5b8] sm:$0xff]  ;;  %v4371_v24 = vpack.c.bf16 %v225_v19, %v209_v18 }
  0xc5   :  { %1823 = vmatmul.mubr.f32.vlgmr.msra.gmra.mrb[0].mxu0 %v24_v29  ;;  %v4563_v28 = vpack.c.bf16 %v227_v21, %v211_v20  ;;  %v387_v18 = vld [vmem:[%s10791_s1 + $0xab8] sm:$0xff] }
  0xc6   :  { %2090 = vmatmul.mubr.f32.vlgmr.msra.gmra.mrb[0].mxu1 %v24_v29  ;;  %4354 = vmatpush1.bf16.msra.mxu0 %v4353_v30  ;;  %v226_v29 = vld [vmem:[%s10791_s1 + $0x5b0] sm:$0xff]  ;;  %v241_v30 = vld [vmem:[%s10791_s1 + $0x628] sm:$0xff]  ;;  %v4583_v25 = vpack.c.bf16 %v387_v18, %v371_v17  ;;  %v528_v18 = vld [vmem:[%s10791_s1 + $0xf20] sm:$0xff] }
  0xc7   :  { %4546 = vmatpush1.bf16.msra.mxu1 %v4545_v33  ;;  %1828 = vmatprep.mubr.f32.mxu0 %v31_v36  ;;  %v243_v33 = vld [vmem:[%s10791_s1 + $0x638] sm:$0xff] }
  0xc8   :  { %2095 = vmatprep.mubr.f32.mxu1 %v31_v36  ;;  %4356 = vmatprep.subr.bf16.mxu0 %v4355_v37  ;;  %v4565_v36 = vpack.c.bf16 %v226_v29, %v210_v27  ;;  %v4375_v37 = vpack.c.bf16 %v257_v31, %v241_v30  ;;  %v4567_v41 = vpack.c.bf16 %v259_v34, %v243_v33  ;;  %v401_v27 = vld [vmem:[%s10791_s1 + $0xb28] sm:$0xff]  ;;  %v403_v29 = vld [vmem:[%s10791_s1 + $0xb38] sm:$0xff]  ;;  %v400_v34 = vld [vmem:[%s10791_s1 + $0xb20] sm:$0xff] }
  0xc9   :  { %1829 = vmatmul.mubr.f32.gmra.mrb[2].mxu0 %v30_v43  ;;  %4548 = vmatprep.subr.bf16.mxu1 %v4547_v40  ;;  %v242_v40 = vld [vmem:[%s10791_s1 + $0x630] sm:$0xff]  ;;  %v419_v30 = vld [vmem:[%s10791_s1 + $0xbb8] sm:$0xff] }
  0xca   :  { %2096 = vmatmul.mubr.f32.gmra.mrb[2].mxu1 %v30_v43  ;;  %4358 = vmatpush1.bf16.msra.mxu0 %v4357_v44  ;;  %v273_v43 = vld [vmem:[%s10791_s1 + $0x728] sm:$0xff]  ;;  %v4569_v48 = vpack.c.bf16 %v258_v42, %v242_v40  ;;  %v451_v42 = vld [vmem:[%s10791_s1 + $0xcb8] sm:$0xff] }
  0xcb   :  { %4550 = vmatpush1.bf16.msra.mxu1 %v4549_v47  ;;  %1834 = vmatprep.mubr.f32.mxu0 %v37_v50  ;;  %v289_v44 = vld [vmem:[%s10791_s1 + $0x7a8] sm:$0xff]  ;;  %v4377_v47 = vpack.c.bf16 %v256_v39, %v240_v38  ;;  %v418_v38 = vld [vmem:[%s10791_s1 + $0xbb0] sm:$0xff] }
  0xcc   :  { %2101 = vmatprep.mubr.f32.mxu1 %v37_v50  ;;  %4360 = vmatprep.subr.bf16.mxu0 %v4359_v51  ;;  %v4379_v49 = vpack.c.bf16 %v289_v44, %v273_v43  ;;  %v272_v50 = vld [vmem:[%s10791_s1 + $0x720] sm:$0xff]  ;;  %v433_v39 = vld [vmem:[%s10791_s1 + $0xc28] sm:$0xff] }
  0xcd   :  { %1835 = vmatmul.mubr.f32.gmra.mrb[4].mxu0 %v36_v54  ;;  %4552 = vmatprep.subr.bf16.mxu1 %v4551_v55  ;;  %v288_v51 = vld [vmem:[%s10791_s1 + $0x7a0] sm:$0xff]  ;;  %v305_v55 = vld [vmem:[%s10791_s1 + $0x828] sm:$0xff] }
  0xce   :  { %2102 = vmatmul.mubr.f32.gmra.mrb[4].mxu1 %v36_v54  ;;  %4362 = vmatpush1.bf16.msra.mxu0 %v4361_v58  ;;  %v290_v54 = vld [vmem:[%s10791_s1 + $0x7b0] sm:$0xff]  ;;  %v323_v58 = vld [vmem:[%s10791_s1 + $0x8b8] sm:$0xff]  ;;  %v4383_v61 = vpack.c.bf16 %v321_v56, %v305_v55  ;;  %v449_v40 = vld [vmem:[%s10791_s1 + $0xca8] sm:$0xff] }
  0xcf   :  { %4554 = vmatpush1.bf16.msra.mxu1 %v4553_v62  ;;  %1840 = vmatprep.mubr.f32.mxu0 %v43_v59  ;;  %v4573_v60 = vpack.c.bf16 %v290_v54, %v274_v52  ;;  %v304_v62 = vld [vmem:[%s10791_s1 + $0x820] sm:$0xff]  ;;  %v4575_v1 = vpack.c.bf16 %v323_v58, %v307_v57  ;;  %v4399_v45 = vpack.c.bf16 %v449_v40, %v433_v39  ;;  %v481_v52 = vld [vmem:[%s10791_s1 + $0xda8] sm:$0xff]  ;;  %v483_v54 = vld [vmem:[%s10791_s1 + $0xdb8] sm:$0xff] }
  0xd0   :  { %2107 = vmatprep.mubr.f32.mxu1 %v43_v59  ;;  %4364 = vmatprep.subr.bf16.mxu0 %v4363_v2  ;;  %v4381_v59 = vpack.c.bf16 %v288_v51, %v272_v50  ;;  %v322_v2 = vld [vmem:[%s10791_s1 + $0x8b0] sm:$0xff]  ;;  %v4385_v7 = vpack.c.bf16 %v320_v63, %v304_v62  ;;  %v465_v51 = vld [vmem:[%s10791_s1 + $0xd28] sm:$0xff]  ;;  %v464_v58 = vld [vmem:[%s10791_s1 + $0xd20] sm:$0xff] }
  0xd1   :  { %1841 = vmatmul.mubr.f32.gmra.mrb[6].mxu0 %v42_v9  ;;  %4556 = vmatprep.subr.bf16.mxu1 %v4555_v6  ;;  %v355_v6 = vld [vmem:[%s10791_s1 + $0x9b8] sm:$0xff]  ;;  %v4577_v8 = vpack.c.bf16 %v322_v2, %v306_v0  ;;  %v450_v50 = vld [vmem:[%s10791_s1 + $0xcb0] sm:$0xff]  ;;  %v4403_v57 = vpack.c.bf16 %v481_v52, %v465_v51  ;;  %v497_v63 = vld [vmem:[%s10791_s1 + $0xe28] sm:$0xff] }
  0xd2   :  { %2108 = vmatmul.mubr.f32.gmra.mrb[6].mxu1 %v42_v9  ;;  %4366 = vmatpush1.bf16.msra.mxu0 %v4365_v10  ;;  %v4387_v9 = vpack.c.bf16 %v353_v4, %v337_v3  ;;  %v336_v10 = vld [vmem:[%s10791_s1 + $0x920] sm:$0xff]  ;;  %v4579_v13 = vpack.c.bf16 %v355_v6, %v339_v5  ;;  %v482_v62 = vld [vmem:[%s10791_s1 + $0xdb0] sm:$0xff]  ;;  %v513_v0 = vld [vmem:[%s10791_s1 + $0xea8] sm:$0xff] }
  0xd3   :  { %4558 = vmatpush1.bf16.msra.mxu1 %v4557_v11  ;;  %4368 = vmatprep.subr.bf16.mxu0 %v4367_v12  ;;  %v352_v11 = vld [vmem:[%s10791_s1 + $0x9a0] sm:$0xff]  ;;  %v338_v12 = vld [vmem:[%s10791_s1 + $0x930] sm:$0xff]  ;;  %v515_v2 = vld [vmem:[%s10791_s1 + $0xeb8] sm:$0xff]  ;;  %v4407_v5 = vpack.c.bf16 %v513_v0, %v497_v63 }
  0xd4   :  { %4560 = vmatprep.subr.bf16.mxu1 %v4559_v16  ;;  %2178 = vmatprep.mubr.f32.mxu0 %v5679_v32  ;;  %v385_v16 = vld [vmem:[%s10791_s1 + $0xaa8] sm:$0xff]  ;;  %v4389_v19 = vpack.c.bf16 %v352_v11, %v336_v10  ;;  %v4581_v20 = vpack.c.bf16 %v354_v14, %v338_v12  ;;  %v496_v6 = vld [vmem:[%s10791_s1 + $0xe20] sm:$0xff]  ;;  %v514_v10 = vld [vmem:[%s10791_s1 + $0xeb0] sm:$0xff] }
  0xd5   :  { %2445 = vmatprep.mubr.f32.mxu1 %v5679_v32  ;;  %v4391_v21 = vpack.c.bf16 %v385_v16, %v369_v15  ;;  %v529_v11 = vld [vmem:[%s10791_s1 + $0xf28] sm:$0xff]  ;;  %v547_v14 = vld [vmem:[%s10791_s1 + $0xfb8] sm:$0xff] }
  0xd6   :  { %4370 = vmatpush1.bf16.msra.mxu0 %v4369_v22  ;;  %v368_v22 = vld [vmem:[%s10791_s1 + $0xa20] sm:$0xff]  ;;  %v545_v12 = vld [vmem:[%s10791_s1 + $0xfa8] sm:$0xff]  ;;  %v643_v51 = vld [vmem:[%s10791_s1 + $0x12b8] sm:$0xff] }
  0xd7   :  { %4562 = vmatpush1.bf16.msra.mxu1 %v4561_v23  ;;  %4372 = vmatprep.subr.bf16.mxu0 %v4371_v24  ;;  %v384_v23 = vld [vmem:[%s10791_s1 + $0xaa0] sm:$0xff]  ;;  %v370_v24 = vld [vmem:[%s10791_s1 + $0xa30] sm:$0xff]  ;;  %v4411_v17 = vpack.c.bf16 %v545_v12, %v529_v11  ;;  %v659_v63 = vld [vmem:[%s10791_s1 + $0x1338] sm:$0xff] }
  0xd8   :  { %4564 = vmatprep.subr.bf16.mxu1 %v4563_v28  ;;  %v417_v28 = vld [vmem:[%s10791_s1 + $0xba8] sm:$0xff]  ;;  %v4393_v31 = vpack.c.bf16 %v384_v23, %v368_v22  ;;  %v4585_v32 = vpack.c.bf16 %v386_v26, %v370_v24  ;;  %v546_v22 = vld [vmem:[%s10791_s1 + $0xfb0] sm:$0xff]  ;;  %v579_v26 = vld [vmem:[%s10791_s1 + $0x10b8] sm:$0xff] }
  0xd9   :  { %v4395_v33 = vpack.c.bf16 %v417_v28, %v401_v27  ;;  %v561_v23 = vld [vmem:[%s10791_s1 + $0x1028] sm:$0xff]  ;;  %v675_v0 = vld [vmem:[%s10791_s1 + $0x13b8] sm:$0xff] }
  0xda   :  { %4374 = vmatpush1.bf16.msra.mxu0 %v4373_v35  ;;  %v416_v35 = vld [vmem:[%s10791_s1 + $0xba0] sm:$0xff]  ;;  %v577_v24 = vld [vmem:[%s10791_s1 + $0x10a8] sm:$0xff] }
  0xdb   :  { %4566 = vmatpush1.bf16.msra.mxu1 %v4565_v36  ;;  %4376 = vmatprep.subr.bf16.mxu0 %v4375_v37  ;;  %v402_v36 = vld [vmem:[%s10791_s1 + $0xb30] sm:$0xff]  ;;  %v4587_v37 = vpack.c.bf16 %v419_v30, %v403_v29  ;;  %v4397_v43 = vpack.c.bf16 %v416_v35, %v400_v34  ;;  %v4415_v29 = vpack.c.bf16 %v577_v24, %v561_v23  ;;  %v560_v30 = vld [vmem:[%s10791_s1 + $0x1020] sm:$0xff]  ;;  %v593_v35 = vld [vmem:[%s10791_s1 + $0x1128] sm:$0xff] }
  0xdc   :  { %4568 = vmatprep.subr.bf16.mxu1 %v4567_v41  ;;  %v435_v41 = vld [vmem:[%s10791_s1 + $0xc38] sm:$0xff]  ;;  %v4589_v44 = vpack.c.bf16 %v418_v38, %v402_v36  ;;  %v578_v34 = vld [vmem:[%s10791_s1 + $0x10b0] sm:$0xff]  ;;  %v609_v36 = vld [vmem:[%s10791_s1 + $0x11a8] sm:$0xff] }
  0xdd   :  { %v611_v38 = vld [vmem:[%s10791_s1 + $0x11b8] sm:$0xff]  ;;  %v705_v11 = vld [vmem:[%s10791_s1 + $0x14a8] sm:$0xff]  ;;  %v706_v23 = vld [vmem:[%s10791_s1 + $0x14b0] sm:$0xff] }
  0xde   :  { %4378 = vmatpush1.bf16.msra.mxu0 %v4377_v47  ;;  %v448_v47 = vld [vmem:[%s10791_s1 + $0xca0] sm:$0xff]  ;;  %v5683_v12 = vld [vmem:[%s10792_s0 + $0x68] sm:$0xff] }
  0xdf   :  { %4570 = vmatpush1.bf16.msra.mxu1 %v4569_v48  ;;  %4380 = vmatprep.subr.bf16.mxu0 %v4379_v49  ;;  %v434_v48 = vld [vmem:[%s10791_s1 + $0xc30] sm:$0xff]  ;;  %v4591_v49 = vpack.c.bf16 %v451_v42, %v435_v41  ;;  %v4401_v55 = vpack.c.bf16 %v448_v47, %v432_v46  ;;  %v4419_v41 = vpack.c.bf16 %v609_v36, %v593_v35  ;;  %v592_v42 = vld [vmem:[%s10791_s1 + $0x1120] sm:$0xff]  ;;  %v625_v47 = vld [vmem:[%s10791_s1 + $0x1228] sm:$0xff] }
  0xe0   :  { %4572 = vmatprep.subr.bf16.mxu1 %v4571_v53  ;;  %v467_v53 = vld [vmem:[%s10791_s1 + $0xd38] sm:$0xff]  ;;  %v4593_v56 = vpack.c.bf16 %v450_v50, %v434_v48  ;;  %v610_v46 = vld [vmem:[%s10791_s1 + $0x11b0] sm:$0xff]  ;;  %v641_v48 = vld [vmem:[%s10791_s1 + $0x12a8] sm:$0xff] }
  0xe1   :  { %v627_v50 = vld [vmem:[%s10791_s1 + $0x1238] sm:$0xff]  ;;  %v721_v24 = vld [vmem:[%s10791_s1 + $0x1528] sm:$0xff]  ;;  %v722_v35 = vld [vmem:[%s10791_s1 + $0x1530] sm:$0xff] }
  0xe2   :  { %4382 = vmatpush1.bf16.msra.mxu0 %v4381_v59  ;;  %v480_v59 = vld [vmem:[%s10791_s1 + $0xda0] sm:$0xff] }
  0xe3   :  { %4574 = vmatpush1.bf16.msra.mxu1 %v4573_v60  ;;  %4384 = vmatprep.subr.bf16.mxu0 %v4383_v61  ;;  %v466_v60 = vld [vmem:[%s10791_s1 + $0xd30] sm:$0xff]  ;;  %v4595_v61 = vpack.c.bf16 %v483_v54, %v467_v53  ;;  %v4405_v3 = vpack.c.bf16 %v480_v59, %v464_v58  ;;  %v4423_v54 = vpack.c.bf16 %v641_v48, %v625_v47  ;;  %v768_v47 = vld [vmem:[%s10791_s1 + $0x16a0] sm:$0xff] }
  0xe4   :  { %4576 = vmatprep.subr.bf16.mxu1 %v4575_v1  ;;  %v499_v1 = vld [vmem:[%s10791_s1 + $0xe38] sm:$0xff]  ;;  %v4597_v4 = vpack.c.bf16 %v482_v62, %v466_v60  ;;  %v4615_v58 = vpack.c.bf16 %v643_v51, %v627_v50  ;;  %v642_v59 = vld [vmem:[%s10791_s1 + $0x12b0] sm:$0xff]  ;;  %v657_v60 = vld [vmem:[%s10791_s1 + $0x1328] sm:$0xff] }
  0xe5   :  { %v5681_v62 = vld [vmem:[%s10792_s0 + $0x38] sm:$0xff]  ;;  %v754_v48 = vld [vmem:[%s10791_s1 + $0x1630] sm:$0xff]  ;;  %v785_v51 = vld [vmem:[%s10791_s1 + $0x1728] sm:$0xff] }
  0xe6   :  { %4386 = vmatpush1.bf16.msra.mxu0 %v4385_v7  ;;  %v512_v7 = vld [vmem:[%s10791_s1 + $0xea0] sm:$0xff]  ;;  %v770_v50 = vld [vmem:[%s10791_s1 + $0x16b0] sm:$0xff] }
  0xe7   :  { %4578 = vmatpush1.bf16.msra.mxu1 %v4577_v8  ;;  %4388 = vmatprep.subr.bf16.mxu0 %v4387_v9  ;;  %v498_v8 = vld [vmem:[%s10791_s1 + $0xe30] sm:$0xff]  ;;  %v4599_v9 = vpack.c.bf16 %v515_v2, %v499_v1  ;;  %v4409_v15 = vpack.c.bf16 %v512_v7, %v496_v6  ;;  %v672_v6 = vld [vmem:[%s10791_s1 + $0x13a0] sm:$0xff] }
  0xe8   :  { %4580 = vmatprep.subr.bf16.mxu1 %v4579_v13  ;;  %v531_v13 = vld [vmem:[%s10791_s1 + $0xf38] sm:$0xff]  ;;  %v4601_v16 = vpack.c.bf16 %v514_v10, %v498_v8  ;;  %v5682_v1 = vld [vmem:[%s10792_s0 + $0x30] sm:$0xff]  ;;  %v4619_v8 = vpack.c.bf16 %v675_v0, %v659_v63  ;;  %v689_v10 = vld [vmem:[%s10791_s1 + $0x1428] sm:$0xff] }
  0xe9   :  { %v658_v7 = vld [vmem:[%s10791_s1 + $0x1330] sm:$0xff]  ;;  %v817_v63 = vld [vmem:[%s10791_s1 + $0x1828] sm:$0xff] }
  0xea   :  { %4390 = vmatpush1.bf16.msra.mxu0 %v4389_v19  ;;  %v544_v19 = vld [vmem:[%s10791_s1 + $0xfa0] sm:$0xff]  ;;  %v833_v0 = vld [vmem:[%s10791_s1 + $0x18a8] sm:$0xff] }
  0xeb   :  { %4582 = vmatpush1.bf16.msra.mxu1 %v4581_v20  ;;  %4392 = vmatprep.subr.bf16.mxu0 %v4391_v21  ;;  %v530_v20 = vld [vmem:[%s10791_s1 + $0xf30] sm:$0xff]  ;;  %v4603_v21 = vpack.c.bf16 %v547_v14, %v531_v13  ;;  %v4413_v27 = vpack.c.bf16 %v544_v19, %v528_v18  ;;  %v691_v13 = vld [vmem:[%s10791_s1 + $0x1438] sm:$0xff]  ;;  %v4431_v18 = vpack.c.bf16 %v705_v11, %v689_v10  ;;  %v688_v19 = vld [vmem:[%s10791_s1 + $0x1420] sm:$0xff] }
  0xec   :  { %4584 = vmatprep.subr.bf16.mxu1 %v4583_v25  ;;  %v563_v25 = vld [vmem:[%s10791_s1 + $0x1038] sm:$0xff]  ;;  %v4605_v28 = vpack.c.bf16 %v546_v22, %v530_v20  ;;  %v704_v20 = vld [vmem:[%s10791_s1 + $0x14a0] sm:$0xff]  ;;  %v834_v10 = vld [vmem:[%s10791_s1 + $0x18b0] sm:$0xff] }
  0xed   :  { %v707_v14 = vld [vmem:[%s10791_s1 + $0x14b8] sm:$0xff]  ;;  %v849_v11 = vld [vmem:[%s10791_s1 + $0x1928] sm:$0xff] }
  0xee   :  { %4394 = vmatpush1.bf16.msra.mxu0 %v4393_v31  ;;  %v576_v31 = vld [vmem:[%s10791_s1 + $0x10a0] sm:$0xff]  ;;  %v4623_v22 = vpack.c.bf16 %v707_v14, %v691_v13  ;;  %v851_v13 = vld [vmem:[%s10791_s1 + $0x1938] sm:$0xff] }
  0xef   :  { %4586 = vmatpush1.bf16.msra.mxu1 %v4585_v32  ;;  %4396 = vmatprep.subr.bf16.mxu0 %v4395_v33  ;;  %v562_v32 = vld [vmem:[%s10791_s1 + $0x1030] sm:$0xff]  ;;  %v4607_v33 = vpack.c.bf16 %v579_v26, %v563_v25  ;;  %v4417_v39 = vpack.c.bf16 %v576_v31, %v560_v30  ;;  %v737_v25 = vld [vmem:[%s10791_s1 + $0x15a8] sm:$0xff]  ;;  %v5685_v26 = vld [vmem:[%s10792_s0 + $0x98] sm:$0xff]  ;;  %v4433_v30 = vpack.c.bf16 %v704_v20, %v688_v19 }
  0xf0   :  { %4588 = vmatprep.subr.bf16.mxu1 %v4587_v37  ;;  %v595_v37 = vld [vmem:[%s10791_s1 + $0x1138] sm:$0xff]  ;;  %v4609_v40 = vpack.c.bf16 %v578_v34, %v562_v32  ;;  %v4435_v32 = vpack.c.bf16 %v737_v25, %v721_v24  ;;  %v736_v34 = vld [vmem:[%s10791_s1 + $0x15a0] sm:$0xff]  ;;  %v850_v20 = vld [vmem:[%s10791_s1 + $0x1930] sm:$0xff] }
  0xf1   :  { %v867_v14 = vld [vmem:[%s10791_s1 + $0x19b8] sm:$0xff]  ;;  %v864_v19 = vld [vmem:[%s10791_s1 + $0x19a0] sm:$0xff]  ;;  %v897_v24 = vld [vmem:[%s10791_s1 + $0x1aa8] sm:$0xff] }
  0xf2   :  { %4398 = vmatpush1.bf16.msra.mxu0 %v4397_v43  ;;  %v608_v43 = vld [vmem:[%s10791_s1 + $0x11a0] sm:$0xff]  ;;  %v883_v25 = vld [vmem:[%s10791_s1 + $0x1a38] sm:$0xff] }
  0xf3   :  { %4590 = vmatpush1.bf16.msra.mxu1 %v4589_v44  ;;  %4400 = vmatprep.subr.bf16.mxu0 %v4399_v45  ;;  %v594_v44 = vld [vmem:[%s10791_s1 + $0x1130] sm:$0xff]  ;;  %v4611_v45 = vpack.c.bf16 %v611_v38, %v595_v37  ;;  %v4421_v52 = vpack.c.bf16 %v608_v43, %v592_v42  ;;  %v753_v38 = vld [vmem:[%s10791_s1 + $0x1628] sm:$0xff]  ;;  %v771_v42 = vld [vmem:[%s10791_s1 + $0x16b8] sm:$0xff] }
  0xf4   :  { %4592 = vmatprep.subr.bf16.mxu1 %v4591_v49  ;;  %v5680_v49 = vld [vmem:[%s10792_s0] sm:$0xff]  ;;  %v4613_v53 = vpack.c.bf16 %v610_v46, %v594_v44  ;;  %v738_v37 = vld [vmem:[%s10791_s1 + $0x15b0] sm:$0xff] }
  0xf5   :  { %v4629_v44 = vpack.c.bf16 %v738_v37, %v722_v35  ;;  %v752_v46 = vld [vmem:[%s10791_s1 + $0x1620] sm:$0xff]  ;;  %v913_v35 = vld [vmem:[%s10791_s1 + $0x1b28] sm:$0xff]  ;;  %v915_v37 = vld [vmem:[%s10791_s1 + $0x1b38] sm:$0xff] }
  0xf6   :  { %4402 = vmatpush1.bf16.msra.mxu0 %v4401_v55  ;;  %v624_v55 = vld [vmem:[%s10791_s1 + $0x1220] sm:$0xff] }
  0xf7   :  { %4594 = vmatpush1.bf16.msra.mxu1 %v4593_v56  ;;  %4404 = vmatprep.subr.bf16.mxu0 %v4403_v57  ;;  %v640_v56 = vld [vmem:[%s10791_s1 + $0x12a0] sm:$0xff]  ;;  %v626_v57 = vld [vmem:[%s10791_s1 + $0x1230] sm:$0xff] }
  0xf8   :  { %4596 = vmatprep.subr.bf16.mxu1 %v4595_v61  ;;  %v673_v61 = vld [vmem:[%s10791_s1 + $0x13a8] sm:$0xff]  ;;  %v4425_v2 = vpack.c.bf16 %v640_v56, %v624_v55  ;;  %v4441_v55 = vpack.c.bf16 %v768_v47, %v752_v46  ;;  %v4633_v56 = vpack.c.bf16 %v770_v50, %v754_v48  ;;  %v930_v46 = vld [vmem:[%s10791_s1 + $0x1bb0] sm:$0xff]  ;;  %v963_v50 = vld [vmem:[%s10791_s1 + $0x1cb8] sm:$0xff] }
  0xf9   :  { %v945_v47 = vld [vmem:[%s10791_s1 + $0x1c28] sm:$0xff] }
  0xfa   :  { %4406 = vmatpush1.bf16.msra.mxu0 %v4405_v3  ;;  %v4617_v3 = vpack.c.bf16 %v642_v59, %v626_v57  ;;  %v800_v59 = vld [vmem:[%s10791_s1 + $0x17a0] sm:$0xff]  ;;  %v961_v48 = vld [vmem:[%s10791_s1 + $0x1ca8] sm:$0xff] }
  0xfb   :  { %4598 = vmatpush1.bf16.msra.mxu1 %v4597_v4  ;;  %4408 = vmatprep.subr.bf16.mxu0 %v4407_v5  ;;  %v4427_v4 = vpack.c.bf16 %v673_v61, %v657_v60  ;;  %v656_v5 = vld [vmem:[%s10791_s1 + $0x1320] sm:$0xff]  ;;  %v786_v60 = vld [vmem:[%s10791_s1 + $0x1730] sm:$0xff] }
  0xfc   :  { %4600 = vmatprep.subr.bf16.mxu1 %v4599_v9  ;;  %v674_v9 = vld [vmem:[%s10791_s1 + $0x13b0] sm:$0xff] }
  0xfe   :  { %4410 = vmatpush1.bf16.msra.mxu0 %v4409_v15  ;;  %v5684_v15 = vld [vmem:[%s10792_s0 + $0x60] sm:$0xff] }
  0xff   :  { %4602 = vmatpush1.bf16.msra.mxu1 %v4601_v16  ;;  %4412 = vmatprep.subr.bf16.mxu0 %v4411_v17  ;;  %v4429_v16 = vpack.c.bf16 %v672_v6, %v656_v5  ;;  %v4621_v17 = vpack.c.bf16 %v674_v9, %v658_v7  ;;  %v4447_v5 = vpack.c.bf16 %v833_v0, %v817_v63  ;;  %v816_v6 = vld [vmem:[%s10791_s1 + $0x1820] sm:$0xff] }
 0x100   :  { %4604 = vmatprep.subr.bf16.mxu1 %v4603_v21  ;;  %v690_v21 = vld [vmem:[%s10791_s1 + $0x1430] sm:$0xff]  ;;  %v832_v7 = vld [vmem:[%s10791_s1 + $0x18a0] sm:$0xff] }
 0x101   :  { %v4625_v31 = vpack.c.bf16 %v706_v23, %v690_v21  ;;  %v4643_v21 = vpack.c.bf16 %v867_v14, %v851_v13  ;;  %v881_v23 = vld [vmem:[%s10791_s1 + $0x1a28] sm:$0xff]  ;;  %v1008_v14 = vld [vmem:[%s10791_s1 + $0x1e20] sm:$0xff] }
 0x102   :  { %4414 = vmatpush1.bf16.msra.mxu0 %v4413_v27  ;;  %v723_v27 = vld [vmem:[%s10791_s1 + $0x1538] sm:$0xff] }
 0x103   :  { %4606 = vmatpush1.bf16.msra.mxu1 %v4605_v28  ;;  %4416 = vmatprep.subr.bf16.mxu0 %v4415_v29  ;;  %v739_v28 = vld [vmem:[%s10791_s1 + $0x15b8] sm:$0xff]  ;;  %v5686_v29 = vld [vmem:[%s10792_s0 + $0x90] sm:$0xff] }
 0x104   :  { %4608 = vmatprep.subr.bf16.mxu1 %v4607_v33  ;;  %v720_v33 = vld [vmem:[%s10791_s1 + $0x1520] sm:$0xff]  ;;  %v4627_v36 = vpack.c.bf16 %v739_v28, %v723_v27 }
 0x105   :  { %2179 = vmatmul.mubr.f32.vlgmr.msra.gmra.mrb[8].mxu0 %v5680_v49  ;;  %v4437_v43 = vpack.c.bf16 %v736_v34, %v720_v33  ;;  %v898_v34 = vld [vmem:[%s10791_s1 + $0x1ab0] sm:$0xff] }
 0x106   :  { %4418 = vmatpush1.bf16.msra.mxu0 %v4417_v39  ;;  %2446 = vmatmul.mubr.f32.vlgmr.msra.gmra.mrb[8].mxu1 %v5680_v49  ;;  %v769_v39 = vld [vmem:[%s10791_s1 + $0x16a8] sm:$0xff] }
 0x107   :  { %4610 = vmatpush1.bf16.msra.mxu1 %v4609_v40  ;;  %4420 = vmatprep.subr.bf16.mxu0 %v4419_v41  ;;  %v5687_v40 = vld [vmem:[%s10792_s0 + $0x18] sm:$0xff] }
 0x108   :  { %4612 = vmatprep.subr.bf16.mxu1 %v4611_v45  ;;  %2184 = vmatprep.mubr.f32.mxu0 %v5681_v62  ;;  %v755_v41 = vld [vmem:[%s10791_s1 + $0x1638] sm:$0xff]  ;;  %v4439_v45 = vpack.c.bf16 %v769_v39, %v753_v38 }
 0x109   :  { %2451 = vmatprep.mubr.f32.mxu1 %v5681_v62  ;;  %2185 = vmatmul.mubr.f32.gmra.mrb[10].mxu0 %v5682_v1  ;;  %v4631_v49 = vpack.c.bf16 %v771_v42, %v755_v41  ;;  %v802_v62 = vld [vmem:[%s10791_s1 + $0x17b0] sm:$0xff]  ;;  %v931_v38 = vld [vmem:[%s10791_s1 + $0x1bb8] sm:$0xff]  ;;  %v912_v42 = vld [vmem:[%s10791_s1 + $0x1b20] sm:$0xff] }
 0x10a   :  { %4422 = vmatpush1.bf16.msra.mxu0 %v4421_v52  ;;  %2452 = vmatmul.mubr.f32.gmra.mrb[10].mxu1 %v5682_v1  ;;  %v801_v52 = vld [vmem:[%s10791_s1 + $0x17a8] sm:$0xff]  ;;  %v819_v1 = vld [vmem:[%s10791_s1 + $0x1838] sm:$0xff] }
 0x10b   :  { %4614 = vmatpush1.bf16.msra.mxu1 %v4613_v53  ;;  %4424 = vmatprep.subr.bf16.mxu0 %v4423_v54  ;;  %v787_v53 = vld [vmem:[%s10791_s1 + $0x1738] sm:$0xff]  ;;  %v4443_v57 = vpack.c.bf16 %v801_v52, %v785_v51 }
 0x10c   :  { %4616 = vmatprep.subr.bf16.mxu1 %v4615_v58  ;;  %2190 = vmatprep.mubr.f32.mxu0 %v5683_v12  ;;  %v803_v54 = vld [vmem:[%s10791_s1 + $0x17b8] sm:$0xff]  ;;  %v784_v58 = vld [vmem:[%s10791_s1 + $0x1720] sm:$0xff] }
 0x10d   :  { %2457 = vmatprep.mubr.f32.mxu1 %v5683_v12  ;;  %2191 = vmatmul.mubr.f32.gmra.mrb[12].mxu0 %v5684_v15  ;;  %v4635_v61 = vpack.c.bf16 %v803_v54, %v787_v53  ;;  %v865_v12 = vld [vmem:[%s10791_s1 + $0x19a8] sm:$0xff]  ;;  %v4463_v53 = vpack.c.bf16 %v961_v48, %v945_v47  ;;  %v944_v54 = vld [vmem:[%s10791_s1 + $0x1c20] sm:$0xff] }
 0x10e   :  { %4426 = vmatpush1.bf16.msra.mxu0 %v4425_v2  ;;  %2458 = vmatmul.mubr.f32.gmra.mrb[12].mxu1 %v5684_v15  ;;  %v835_v2 = vld [vmem:[%s10791_s1 + $0x18b8] sm:$0xff]  ;;  %v4449_v15 = vpack.c.bf16 %v832_v7, %v816_v6  ;;  %v994_v6 = vld [vmem:[%s10791_s1 + $0x1db0] sm:$0xff]  ;;  %v1009_v7 = vld [vmem:[%s10791_s1 + $0x1e28] sm:$0xff] }
 0x10f   :  { %4618 = vmatpush1.bf16.msra.mxu1 %v4617_v3  ;;  %4428 = vmatprep.subr.bf16.mxu0 %v4427_v4  ;;  %v4445_v3 = vpack.c.bf16 %v800_v59, %v784_v58  ;;  %v4637_v4 = vpack.c.bf16 %v802_v62, %v786_v60  ;;  %v4639_v9 = vpack.c.bf16 %v835_v2, %v819_v1  ;;  %v962_v58 = vld [vmem:[%s10791_s1 + $0x1cb0] sm:$0xff]  ;;  %v977_v59 = vld [vmem:[%s10791_s1 + $0x1d28] sm:$0xff]  ;;  %v995_v62 = vld [vmem:[%s10791_s1 + $0x1db8] sm:$0xff] }
 0x110   :  { %4620 = vmatprep.subr.bf16.mxu1 %v4619_v8  ;;  %2196 = vmatprep.mubr.f32.mxu0 %v5685_v26  ;;  %v818_v8 = vld [vmem:[%s10791_s1 + $0x1830] sm:$0xff]  ;;  %v993_v60 = vld [vmem:[%s10791_s1 + $0x1da8] sm:$0xff]  ;;  %v976_v2 = vld [vmem:[%s10791_s1 + $0x1d20] sm:$0xff] }
 0x111   :  { %2463 = vmatprep.mubr.f32.mxu1 %v5685_v26  ;;  %2197 = vmatmul.mubr.f32.gmra.mrb[14].mxu0 %v5686_v29  ;;  %v899_v26 = vld [vmem:[%s10791_s1 + $0x1ab8] sm:$0xff]  ;;  %v4467_v1 = vpack.c.bf16 %v993_v60, %v977_v59 }
 0x112   :  { %4430 = vmatpush1.bf16.msra.mxu0 %v4429_v16  ;;  %2464 = vmatmul.mubr.f32.gmra.mrb[14].mxu1 %v5686_v29  ;;  %v4641_v16 = vpack.c.bf16 %v834_v10, %v818_v8  ;;  %v4455_v29 = vpack.c.bf16 %v897_v24, %v881_v23  ;;  %v4647_v33 = vpack.c.bf16 %v899_v26, %v883_v25  ;;  %v1025_v8 = vld [vmem:[%s10791_s1 + $0x1ea8] sm:$0xff]  ;;  %v1027_v10 = vld [vmem:[%s10791_s1 + $0x1eb8] sm:$0xff]  ;;  %v1040_v26 = vld [vmem:[%s10791_s1 + $0x1f20] sm:$0xff] }
 0x113   :  { %4622 = vmatpush1.bf16.msra.mxu1 %v4621_v17  ;;  %4432 = vmatprep.subr.bf16.mxu0 %v4431_v18  ;;  %v4451_v17 = vpack.c.bf16 %v865_v12, %v849_v11  ;;  %v848_v18 = vld [vmem:[%s10791_s1 + $0x1920] sm:$0xff]  ;;  %v4471_v13 = vpack.c.bf16 %v1025_v8, %v1009_v7  ;;  %v1155_v59 = vld [vmem:[%s10791_s1 + $0x22b8] sm:$0xff] }
 0x114   :  { %4624 = vmatprep.subr.bf16.mxu1 %v4623_v22  ;;  %2267 = vmatprep.mubr.f32.mxu0 %v5687_v40  ;;  %v866_v22 = vld [vmem:[%s10791_s1 + $0x19b0] sm:$0xff]  ;;  %v4453_v27 = vpack.c.bf16 %v864_v19, %v848_v18  ;;  %v1041_v19 = vld [vmem:[%s10791_s1 + $0x1f28] sm:$0xff]  ;;  %v1171_v7 = vld [vmem:[%s10791_s1 + $0x2338] sm:$0xff] }
 0x115   :  { %2534 = vmatprep.mubr.f32.mxu1 %v5687_v40  ;;  %v4645_v28 = vpack.c.bf16 %v866_v22, %v850_v20  ;;  %v1026_v18 = vld [vmem:[%s10791_s1 + $0x1eb0] sm:$0xff]  ;;  %v1057_v20 = vld [vmem:[%s10791_s1 + $0x1fa8] sm:$0xff]  ;;  %v1059_v22 = vld [vmem:[%s10791_s1 + $0x1fb8] sm:$0xff] }
 0x116   :  { %4434 = vmatpush1.bf16.msra.mxu0 %v4433_v30  ;;  %v880_v30 = vld [vmem:[%s10791_s1 + $0x1a20] sm:$0xff]  ;;  %v4475_v25 = vpack.c.bf16 %v1057_v20, %v1041_v19  ;;  %v1187_v8 = vld [vmem:[%s10791_s1 + $0x23b8] sm:$0xff]  ;;  %v1217_v19 = vld [vmem:[%s10791_s1 + $0x24a8] sm:$0xff] }
 0x117   :  { %4626 = vmatpush1.bf16.msra.mxu1 %v4625_v31  ;;  %4436 = vmatprep.subr.bf16.mxu0 %v4435_v32  ;;  %v896_v31 = vld [vmem:[%s10791_s1 + $0x1aa0] sm:$0xff]  ;;  %v882_v32 = vld [vmem:[%s10791_s1 + $0x1a30] sm:$0xff]  ;;  %v5691_v20 = vld [vmem:[%s10792_s0 + $0x78] sm:$0xff] }
 0x118   :  { %4628 = vmatprep.subr.bf16.mxu1 %v4627_v36  ;;  %v929_v36 = vld [vmem:[%s10791_s1 + $0x1ba8] sm:$0xff]  ;;  %v4457_v39 = vpack.c.bf16 %v896_v31, %v880_v30  ;;  %v4649_v40 = vpack.c.bf16 %v898_v34, %v882_v32  ;;  %v1058_v30 = vld [vmem:[%s10791_s1 + $0x1fb0] sm:$0xff]  ;;  %v1091_v34 = vld [vmem:[%s10791_s1 + $0x20b8] sm:$0xff] }
 0x119   :  { %v4459_v41 = vpack.c.bf16 %v929_v36, %v913_v35  ;;  %v1073_v31 = vld [vmem:[%s10791_s1 + $0x2028] sm:$0xff] }
 0x11a   :  { %4438 = vmatpush1.bf16.msra.mxu0 %v4437_v43  ;;  %v928_v43 = vld [vmem:[%s10791_s1 + $0x1ba0] sm:$0xff]  ;;  %v1089_v32 = vld [vmem:[%s10791_s1 + $0x20a8] sm:$0xff] }
 0x11b   :  { %4630 = vmatpush1.bf16.msra.mxu1 %v4629_v44  ;;  %4440 = vmatprep.subr.bf16.mxu0 %v4439_v45  ;;  %v914_v44 = vld [vmem:[%s10791_s1 + $0x1b30] sm:$0xff]  ;;  %v4651_v45 = vpack.c.bf16 %v931_v38, %v915_v37  ;;  %v4461_v51 = vpack.c.bf16 %v928_v43, %v912_v42  ;;  %v4479_v37 = vpack.c.bf16 %v1089_v32, %v1073_v31  ;;  %v1072_v38 = vld [vmem:[%s10791_s1 + $0x2020] sm:$0xff]  ;;  %v1105_v43 = vld [vmem:[%s10791_s1 + $0x2128] sm:$0xff] }
 0x11c   :  { %4632 = vmatprep.subr.bf16.mxu1 %v4631_v49  ;;  %v947_v49 = vld [vmem:[%s10791_s1 + $0x1c38] sm:$0xff]  ;;  %v4653_v52 = vpack.c.bf16 %v930_v46, %v914_v44  ;;  %v1090_v42 = vld [vmem:[%s10791_s1 + $0x20b0] sm:$0xff]  ;;  %v1121_v44 = vld [vmem:[%s10791_s1 + $0x21a8] sm:$0xff] }
 0x11d   :  { %v1123_v46 = vld [vmem:[%s10791_s1 + $0x21b8] sm:$0xff]  ;;  %v1218_v31 = vld [vmem:[%s10791_s1 + $0x24b0] sm:$0xff]  ;;  %v1233_v32 = vld [vmem:[%s10791_s1 + $0x2528] sm:$0xff] }
 0x11e   :  { %4442 = vmatpush1.bf16.msra.mxu0 %v4441_v55  ;;  %v960_v55 = vld [vmem:[%s10791_s1 + $0x1ca0] sm:$0xff] }
 0x11f   :  { %4634 = vmatpush1.bf16.msra.mxu1 %v4633_v56  ;;  %4444 = vmatprep.subr.bf16.mxu0 %v4443_v57  ;;  %v946_v56 = vld [vmem:[%s10791_s1 + $0x1c30] sm:$0xff]  ;;  %v4655_v57 = vpack.c.bf16 %v963_v50, %v947_v49  ;;  %v4465_v63 = vpack.c.bf16 %v960_v55, %v944_v54  ;;  %v4483_v49 = vpack.c.bf16 %v1121_v44, %v1105_v43  ;;  %v1104_v50 = vld [vmem:[%s10791_s1 + $0x2120] sm:$0xff]  ;;  %v1137_v55 = vld [vmem:[%s10791_s1 + $0x2228] sm:$0xff] }
 0x120   :  { %4636 = vmatprep.subr.bf16.mxu1 %v4635_v61  ;;  %v979_v61 = vld [vmem:[%s10791_s1 + $0x1d38] sm:$0xff]  ;;  %v4657_v0 = vpack.c.bf16 %v962_v58, %v946_v56  ;;  %v1122_v54 = vld [vmem:[%s10791_s1 + $0x21b0] sm:$0xff]  ;;  %v1153_v56 = vld [vmem:[%s10791_s1 + $0x22a8] sm:$0xff] }
 0x121   :  { %v1139_v58 = vld [vmem:[%s10791_s1 + $0x2238] sm:$0xff]  ;;  %v1234_v43 = vld [vmem:[%s10791_s1 + $0x2530] sm:$0xff] }
 0x122   :  { %4446 = vmatpush1.bf16.msra.mxu0 %v4445_v3  ;;  %v992_v3 = vld [vmem:[%s10791_s1 + $0x1da0] sm:$0xff] }
 0x123   :  { %4638 = vmatpush1.bf16.msra.mxu1 %v4637_v4  ;;  %4448 = vmatprep.subr.bf16.mxu0 %v4447_v5  ;;  %v978_v4 = vld [vmem:[%s10791_s1 + $0x1d30] sm:$0xff]  ;;  %v4659_v5 = vpack.c.bf16 %v995_v62, %v979_v61  ;;  %v4469_v11 = vpack.c.bf16 %v992_v3, %v976_v2  ;;  %v4487_v62 = vpack.c.bf16 %v1153_v56, %v1137_v55  ;;  %v1280_v55 = vld [vmem:[%s10791_s1 + $0x26a0] sm:$0xff] }
 0x124   :  { %4640 = vmatprep.subr.bf16.mxu1 %v4639_v9  ;;  %v1011_v9 = vld [vmem:[%s10791_s1 + $0x1e38] sm:$0xff]  ;;  %v4661_v12 = vpack.c.bf16 %v994_v6, %v978_v4  ;;  %v4679_v2 = vpack.c.bf16 %v1155_v59, %v1139_v58  ;;  %v1154_v3 = vld [vmem:[%s10791_s1 + $0x22b0] sm:$0xff]  ;;  %v1169_v4 = vld [vmem:[%s10791_s1 + $0x2328] sm:$0xff] }
 0x125   :  { %v5689_v6 = vld [vmem:[%s10792_s0 + $0x48] sm:$0xff]  ;;  %v1266_v56 = vld [vmem:[%s10791_s1 + $0x2630] sm:$0xff] }
 0x126   :  { %4450 = vmatpush1.bf16.msra.mxu0 %v4449_v15  ;;  %v1024_v15 = vld [vmem:[%s10791_s1 + $0x1ea0] sm:$0xff]  ;;  %v1282_v58 = vld [vmem:[%s10791_s1 + $0x26b0] sm:$0xff]  ;;  %v1297_v59 = vld [vmem:[%s10791_s1 + $0x2728] sm:$0xff] }
 0x127   :  { %4642 = vmatpush1.bf16.msra.mxu1 %v4641_v16  ;;  %4452 = vmatprep.subr.bf16.mxu0 %v4451_v17  ;;  %v1010_v16 = vld [vmem:[%s10791_s1 + $0x1e30] sm:$0xff]  ;;  %v4663_v17 = vpack.c.bf16 %v1027_v10, %v1011_v9  ;;  %v4473_v23 = vpack.c.bf16 %v1024_v15, %v1008_v14  ;;  %v5690_v9 = vld [vmem:[%s10792_s0 + $0x40] sm:$0xff] }
 0x128   :  { %4644 = vmatprep.subr.bf16.mxu1 %v4643_v21  ;;  %v1043_v21 = vld [vmem:[%s10791_s1 + $0x1f38] sm:$0xff]  ;;  %v4665_v24 = vpack.c.bf16 %v1026_v18, %v1010_v16  ;;  %v1184_v14 = vld [vmem:[%s10791_s1 + $0x23a0] sm:$0xff]  ;;  %v1170_v15 = vld [vmem:[%s10791_s1 + $0x2330] sm:$0xff]  ;;  %v4683_v16 = vpack.c.bf16 %v1187_v8, %v1171_v7 }
 0x129   :  { %v1201_v18 = vld [vmem:[%s10791_s1 + $0x2428] sm:$0xff] }
 0x12a   :  { %4454 = vmatpush1.bf16.msra.mxu0 %v4453_v27  ;;  %v1056_v27 = vld [vmem:[%s10791_s1 + $0x1fa0] sm:$0xff]  ;;  %v1329_v7 = vld [vmem:[%s10791_s1 + $0x2828] sm:$0xff] }
 0x12b   :  { %4646 = vmatpush1.bf16.msra.mxu1 %v4645_v28  ;;  %4456 = vmatprep.subr.bf16.mxu0 %v4455_v29  ;;  %v1042_v28 = vld [vmem:[%s10791_s1 + $0x1f30] sm:$0xff]  ;;  %v4667_v29 = vpack.c.bf16 %v1059_v22, %v1043_v21  ;;  %v4477_v35 = vpack.c.bf16 %v1056_v27, %v1040_v26  ;;  %v1203_v21 = vld [vmem:[%s10791_s1 + $0x2438] sm:$0xff]  ;;  %v4495_v26 = vpack.c.bf16 %v1217_v19, %v1201_v18  ;;  %v1200_v27 = vld [vmem:[%s10791_s1 + $0x2420] sm:$0xff] }
 0x12c   :  { %4648 = vmatprep.subr.bf16.mxu1 %v4647_v33  ;;  %v1075_v33 = vld [vmem:[%s10791_s1 + $0x2038] sm:$0xff]  ;;  %v4669_v36 = vpack.c.bf16 %v1058_v30, %v1042_v28  ;;  %v1216_v28 = vld [vmem:[%s10791_s1 + $0x24a0] sm:$0xff]  ;;  %v1345_v8 = vld [vmem:[%s10791_s1 + $0x28a8] sm:$0xff] }
 0x12d   :  { %v1219_v22 = vld [vmem:[%s10791_s1 + $0x24b8] sm:$0xff]  ;;  %v1346_v18 = vld [vmem:[%s10791_s1 + $0x28b0] sm:$0xff]  ;;  %v1361_v19 = vld [vmem:[%s10791_s1 + $0x2928] sm:$0xff] }
 0x12e   :  { %4458 = vmatpush1.bf16.msra.mxu0 %v4457_v39  ;;  %v1088_v39 = vld [vmem:[%s10791_s1 + $0x20a0] sm:$0xff]  ;;  %v4687_v30 = vpack.c.bf16 %v1219_v22, %v1203_v21  ;;  %v1363_v21 = vld [vmem:[%s10791_s1 + $0x2938] sm:$0xff] }
 0x12f   :  { %4650 = vmatpush1.bf16.msra.mxu1 %v4649_v40  ;;  %4460 = vmatprep.subr.bf16.mxu0 %v4459_v41  ;;  %v1074_v40 = vld [vmem:[%s10791_s1 + $0x2030] sm:$0xff]  ;;  %v4671_v41 = vpack.c.bf16 %v1091_v34, %v1075_v33  ;;  %v4481_v47 = vpack.c.bf16 %v1088_v39, %v1072_v38  ;;  %v1249_v33 = vld [vmem:[%s10791_s1 + $0x25a8] sm:$0xff]  ;;  %v4497_v38 = vpack.c.bf16 %v1216_v28, %v1200_v27  ;;  %v1379_v22 = vld [vmem:[%s10791_s1 + $0x29b8] sm:$0xff] }
 0x130   :  { %4652 = vmatprep.subr.bf16.mxu1 %v4651_v45  ;;  %v1107_v45 = vld [vmem:[%s10791_s1 + $0x2138] sm:$0xff]  ;;  %v4673_v48 = vpack.c.bf16 %v1090_v42, %v1074_v40  ;;  %v5693_v34 = vld [vmem:[%s10792_s0 + $0xa8] sm:$0xff]  ;;  %v4499_v40 = vpack.c.bf16 %v1249_v33, %v1233_v32  ;;  %v1248_v42 = vld [vmem:[%s10791_s1 + $0x25a0] sm:$0xff] }
 0x131   :  { %v1376_v27 = vld [vmem:[%s10791_s1 + $0x29a0] sm:$0xff]  ;;  %v1362_v28 = vld [vmem:[%s10791_s1 + $0x2930] sm:$0xff]  ;;  %v1409_v32 = vld [vmem:[%s10791_s1 + $0x2aa8] sm:$0xff] }
 0x132   :  { %4462 = vmatpush1.bf16.msra.mxu0 %v4461_v51  ;;  %v1120_v51 = vld [vmem:[%s10791_s1 + $0x21a0] sm:$0xff]  ;;  %v1395_v33 = vld [vmem:[%s10791_s1 + $0x2a38] sm:$0xff] }
 0x133   :  { %4654 = vmatpush1.bf16.msra.mxu1 %v4653_v52  ;;  %4464 = vmatprep.subr.bf16.mxu0 %v4463_v53  ;;  %v1106_v52 = vld [vmem:[%s10791_s1 + $0x2130] sm:$0xff]  ;;  %v4675_v53 = vpack.c.bf16 %v1123_v46, %v1107_v45  ;;  %v4485_v60 = vpack.c.bf16 %v1120_v51, %v1104_v50  ;;  %v1265_v46 = vld [vmem:[%s10791_s1 + $0x2628] sm:$0xff]  ;;  %v1283_v50 = vld [vmem:[%s10791_s1 + $0x26b8] sm:$0xff] }
 0x134   :  { %4656 = vmatprep.subr.bf16.mxu1 %v4655_v57  ;;  %v5688_v57 = vld [vmem:[%s10792_s0 + $0x10] sm:$0xff]  ;;  %v4677_v61 = vpack.c.bf16 %v1122_v54, %v1106_v52  ;;  %v1264_v54 = vld [vmem:[%s10791_s1 + $0x2620] sm:$0xff] }
 0x135   :  { %v1250_v45 = vld [vmem:[%s10791_s1 + $0x25b0] sm:$0xff] }
 0x136   :  { %4466 = vmatpush1.bf16.msra.mxu0 %v4465_v63  ;;  %v1136_v63 = vld [vmem:[%s10791_s1 + $0x2220] sm:$0xff]  ;;  %v4693_v52 = vpack.c.bf16 %v1250_v45, %v1234_v43  ;;  %v1425_v43 = vld [vmem:[%s10791_s1 + $0x2b28] sm:$0xff]  ;;  %v1427_v45 = vld [vmem:[%s10791_s1 + $0x2b38] sm:$0xff] }
 0x137   :  { %4658 = vmatpush1.bf16.msra.mxu1 %v4657_v0  ;;  %4468 = vmatprep.subr.bf16.mxu0 %v4467_v1  ;;  %v1152_v0 = vld [vmem:[%s10791_s1 + $0x22a0] sm:$0xff]  ;;  %v1138_v1 = vld [vmem:[%s10791_s1 + $0x2230] sm:$0xff] }
 0x138   :  { %4660 = vmatprep.subr.bf16.mxu1 %v4659_v5  ;;  %v1185_v5 = vld [vmem:[%s10791_s1 + $0x23a8] sm:$0xff]  ;;  %v4489_v10 = vpack.c.bf16 %v1152_v0, %v1136_v63  ;;  %v4505_v63 = vpack.c.bf16 %v1280_v55, %v1264_v54  ;;  %v4697_v0 = vpack.c.bf16 %v1282_v58, %v1266_v56  ;;  %v1442_v54 = vld [vmem:[%s10791_s1 + $0x2bb0] sm:$0xff]  ;;  %v1475_v58 = vld [vmem:[%s10791_s1 + $0x2cb8] sm:$0xff] }
 0x139   :  { %v1457_v55 = vld [vmem:[%s10791_s1 + $0x2c28] sm:$0xff] }
 0x13a   :  { %4470 = vmatpush1.bf16.msra.mxu0 %v4469_v11  ;;  %v4681_v11 = vpack.c.bf16 %v1154_v3, %v1138_v1  ;;  %v1312_v3 = vld [vmem:[%s10791_s1 + $0x27a0] sm:$0xff]  ;;  %v1473_v56 = vld [vmem:[%s10791_s1 + $0x2ca8] sm:$0xff] }
 0x13b   :  { %4662 = vmatpush1.bf16.msra.mxu1 %v4661_v12  ;;  %4472 = vmatprep.subr.bf16.mxu0 %v4471_v13  ;;  %v4491_v12 = vpack.c.bf16 %v1185_v5, %v1169_v4  ;;  %v1168_v13 = vld [vmem:[%s10791_s1 + $0x2320] sm:$0xff]  ;;  %v1298_v4 = vld [vmem:[%s10791_s1 + $0x2730] sm:$0xff] }
 0x13c   :  { %4664 = vmatprep.subr.bf16.mxu1 %v4663_v17  ;;  %v1186_v17 = vld [vmem:[%s10791_s1 + $0x23b0] sm:$0xff] }
 0x13e   :  { %4474 = vmatpush1.bf16.msra.mxu0 %v4473_v23  ;;  %v5692_v23 = vld [vmem:[%s10792_s0 + $0x70] sm:$0xff] }
 0x13f   :  { %4666 = vmatpush1.bf16.msra.mxu1 %v4665_v24  ;;  %4476 = vmatprep.subr.bf16.mxu0 %v4475_v25  ;;  %v4493_v24 = vpack.c.bf16 %v1184_v14, %v1168_v13  ;;  %v4685_v25 = vpack.c.bf16 %v1186_v17, %v1170_v15  ;;  %v4511_v13 = vpack.c.bf16 %v1345_v8, %v1329_v7  ;;  %v1328_v14 = vld [vmem:[%s10791_s1 + $0x2820] sm:$0xff] }
 0x140   :  { %4668 = vmatprep.subr.bf16.mxu1 %v4667_v29  ;;  %v1202_v29 = vld [vmem:[%s10791_s1 + $0x2430] sm:$0xff]  ;;  %v1344_v15 = vld [vmem:[%s10791_s1 + $0x28a0] sm:$0xff] }
 0x141   :  { %v4689_v39 = vpack.c.bf16 %v1218_v31, %v1202_v29  ;;  %v4707_v29 = vpack.c.bf16 %v1379_v22, %v1363_v21  ;;  %v1393_v31 = vld [vmem:[%s10791_s1 + $0x2a28] sm:$0xff]  ;;  %v1520_v22 = vld [vmem:[%s10791_s1 + $0x2e20] sm:$0xff] }
 0x142   :  { %4478 = vmatpush1.bf16.msra.mxu0 %v4477_v35  ;;  %v1235_v35 = vld [vmem:[%s10791_s1 + $0x2538] sm:$0xff] }
 0x143   :  { %4670 = vmatpush1.bf16.msra.mxu1 %v4669_v36  ;;  %4480 = vmatprep.subr.bf16.mxu0 %v4479_v37  ;;  %v1251_v36 = vld [vmem:[%s10791_s1 + $0x25b8] sm:$0xff]  ;;  %v5694_v37 = vld [vmem:[%s10792_s0 + $0xa0] sm:$0xff] }
 0x144   :  { %4672 = vmatprep.subr.bf16.mxu1 %v4671_v41  ;;  %v1232_v41 = vld [vmem:[%s10791_s1 + $0x2520] sm:$0xff]  ;;  %v4691_v44 = vpack.c.bf16 %v1251_v36, %v1235_v35 }
 0x145   :  { %2268 = vmatmul.mubr.f32.vlgmr.msra.gmra.mrb[8].mxu0 %v5688_v57  ;;  %v4501_v51 = vpack.c.bf16 %v1248_v42, %v1232_v41  ;;  %v1410_v42 = vld [vmem:[%s10791_s1 + $0x2ab0] sm:$0xff] }
 0x146   :  { %4482 = vmatpush1.bf16.msra.mxu0 %v4481_v47  ;;  %2535 = vmatmul.mubr.f32.vlgmr.msra.gmra.mrb[8].mxu1 %v5688_v57  ;;  %v1281_v47 = vld [vmem:[%s10791_s1 + $0x26a8] sm:$0xff] }
 0x147   :  { %4674 = vmatpush1.bf16.msra.mxu1 %v4673_v48  ;;  %4484 = vmatprep.subr.bf16.mxu0 %v4483_v49  ;;  %v5695_v48 = vld [vmem:[%s10792_s0 + $0x28] sm:$0xff]  ;;  %v1267_v49 = vld [vmem:[%s10791_s1 + $0x2638] sm:$0xff] }
 0x148   :  { %4676 = vmatprep.subr.bf16.mxu1 %v4675_v53  ;;  %2273 = vmatprep.mubr.f32.mxu0 %v5689_v6  ;;  %v4503_v53 = vpack.c.bf16 %v1281_v47, %v1265_v46  ;;  %v4695_v57 = vpack.c.bf16 %v1283_v50, %v1267_v49  ;;  %v1443_v46 = vld [vmem:[%s10791_s1 + $0x2bb8] sm:$0xff]  ;;  %v1424_v50 = vld [vmem:[%s10791_s1 + $0x2b20] sm:$0xff] }
 0x149   :  { %2540 = vmatprep.mubr.f32.mxu1 %v5689_v6  ;;  %2274 = vmatmul.mubr.f32.gmra.mrb[10].mxu0 %v5690_v9  ;;  %v1314_v6 = vld [vmem:[%s10791_s1 + $0x27b0] sm:$0xff] }
 0x14a   :  { %4486 = vmatpush1.bf16.msra.mxu0 %v4485_v60  ;;  %2541 = vmatmul.mubr.f32.gmra.mrb[10].mxu1 %v5690_v9  ;;  %v1313_v60 = vld [vmem:[%s10791_s1 + $0x27a8] sm:$0xff]  ;;  %v1331_v9 = vld [vmem:[%s10791_s1 + $0x2838] sm:$0xff] }
 0x14b   :  { %4678 = vmatpush1.bf16.msra.mxu1 %v4677_v61  ;;  %4488 = vmatprep.subr.bf16.mxu0 %v4487_v62  ;;  %v1299_v61 = vld [vmem:[%s10791_s1 + $0x2738] sm:$0xff]  ;;  %v4507_v1 = vpack.c.bf16 %v1313_v60, %v1297_v59 }
 0x14c   :  { %4680 = vmatprep.subr.bf16.mxu1 %v4679_v2  ;;  %2279 = vmatprep.mubr.f32.mxu0 %v5691_v20  ;;  %v1315_v62 = vld [vmem:[%s10791_s1 + $0x27b8] sm:$0xff]  ;;  %v1296_v2 = vld [vmem:[%s10791_s1 + $0x2720] sm:$0xff] }
 0x14d   :  { %2546 = vmatprep.mubr.f32.mxu1 %v5691_v20  ;;  %2280 = vmatmul.mubr.f32.gmra.mrb[12].mxu0 %v5692_v23  ;;  %v4699_v5 = vpack.c.bf16 %v1315_v62, %v1299_v61  ;;  %v1377_v20 = vld [vmem:[%s10791_s1 + $0x29a8] sm:$0xff]  ;;  %v4527_v61 = vpack.c.bf16 %v1473_v56, %v1457_v55  ;;  %v1456_v62 = vld [vmem:[%s10791_s1 + $0x2c20] sm:$0xff]  ;;  %v103_v55 = vld [vmem:[%s10791_s1 + $0x1d8] sm:$0xff] }
 0x14e   :  { %4490 = vmatpush1.bf16.msra.mxu0 %v4489_v10  ;;  %2547 = vmatmul.mubr.f32.gmra.mrb[12].mxu1 %v5692_v23  ;;  %v1347_v10 = vld [vmem:[%s10791_s1 + $0x28b8] sm:$0xff]  ;;  %v4513_v23 = vpack.c.bf16 %v1344_v15, %v1328_v14  ;;  %v1506_v14 = vld [vmem:[%s10791_s1 + $0x2db0] sm:$0xff]  ;;  %v1521_v15 = vld [vmem:[%s10791_s1 + $0x2e28] sm:$0xff] }
 0x14f   :  { %4682 = vmatpush1.bf16.msra.mxu1 %v4681_v11  ;;  %4492 = vmatprep.subr.bf16.mxu0 %v4491_v12  ;;  %v4509_v11 = vpack.c.bf16 %v1312_v3, %v1296_v2  ;;  %v4701_v12 = vpack.c.bf16 %v1314_v6, %v1298_v4  ;;  %v4703_v17 = vpack.c.bf16 %v1347_v10, %v1331_v9  ;;  %v1474_v2 = vld [vmem:[%s10791_s1 + $0x2cb0] sm:$0xff]  ;;  %v1489_v3 = vld [vmem:[%s10791_s1 + $0x2d28] sm:$0xff]  ;;  %v1507_v6 = vld [vmem:[%s10791_s1 + $0x2db8] sm:$0xff] }
 0x150   :  { %4684 = vmatprep.subr.bf16.mxu1 %v4683_v16  ;;  %2285 = vmatprep.mubr.f32.mxu0 %v5693_v34  ;;  %v1330_v16 = vld [vmem:[%s10791_s1 + $0x2830] sm:$0xff]  ;;  %v1505_v4 = vld [vmem:[%s10791_s1 + $0x2da8] sm:$0xff]  ;;  %v1488_v10 = vld [vmem:[%s10791_s1 + $0x2d20] sm:$0xff] }
 0x151   :  { %2552 = vmatprep.mubr.f32.mxu1 %v5693_v34  ;;  %2286 = vmatmul.mubr.f32.gmra.mrb[14].mxu0 %v5694_v37  ;;  %v1411_v34 = vld [vmem:[%s10791_s1 + $0x2ab8] sm:$0xff]  ;;  %v4531_v9 = vpack.c.bf16 %v1505_v4, %v1489_v3 }
 0x152   :  { %4494 = vmatpush1.bf16.msra.mxu0 %v4493_v24  ;;  %2553 = vmatmul.mubr.f32.gmra.mrb[14].mxu1 %v5694_v37  ;;  %v4705_v24 = vpack.c.bf16 %v1346_v18, %v1330_v16  ;;  %v4519_v37 = vpack.c.bf16 %v1409_v32, %v1393_v31  ;;  %v4711_v41 = vpack.c.bf16 %v1411_v34, %v1395_v33  ;;  %v1537_v16 = vld [vmem:[%s10791_s1 + $0x2ea8] sm:$0xff]  ;;  %v1539_v18 = vld [vmem:[%s10791_s1 + $0x2eb8] sm:$0xff]  ;;  %v1552_v34 = vld [vmem:[%s10791_s1 + $0x2f20] sm:$0xff] }
 0x153   :  { %4686 = vmatpush1.bf16.msra.mxu1 %v4685_v25  ;;  %4496 = vmatprep.subr.bf16.mxu0 %v4495_v26  ;;  %v4515_v25 = vpack.c.bf16 %v1377_v20, %v1361_v19  ;;  %v1360_v26 = vld [vmem:[%s10791_s1 + $0x2920] sm:$0xff]  ;;  %v4535_v21 = vpack.c.bf16 %v1537_v16, %v1521_v15  ;;  %v119_v3 = vld [vmem:[%s10791_s1 + $0x258] sm:$0xff]  ;;  %v165_v15 = vld [vmem:[%s10791_s1 + $0x3c8] sm:$0xff] }
 0x154   :  { %4688 = vmatprep.subr.bf16.mxu1 %v4687_v30  ;;  %2356 = vmatprep.mubr.f32.mxu0 %v5695_v48  ;;  %v1378_v30 = vld [vmem:[%s10791_s1 + $0x29b0] sm:$0xff]  ;;  %v4517_v35 = vpack.c.bf16 %v1376_v27, %v1360_v26  ;;  %v1553_v27 = vld [vmem:[%s10791_s1 + $0x2f28] sm:$0xff]  ;;  %v135_v4 = vld [vmem:[%s10791_s1 + $0x2d8] sm:$0xff] }
 0x155   :  { %2623 = vmatprep.mubr.f32.mxu1 %v5695_v48  ;;  %v4709_v36 = vpack.c.bf16 %v1378_v30, %v1362_v28  ;;  %v1538_v26 = vld [vmem:[%s10791_s1 + $0x2eb0] sm:$0xff]  ;;  %v1569_v28 = vld [vmem:[%s10791_s1 + $0x2fa8] sm:$0xff]  ;;  %v1571_v30 = vld [vmem:[%s10791_s1 + $0x2fb8] sm:$0xff] }
 0x156   :  { %4498 = vmatpush1.bf16.msra.mxu0 %v4497_v38  ;;  %v1392_v38 = vld [vmem:[%s10791_s1 + $0x2a20] sm:$0xff]  ;;  %v4539_v33 = vpack.c.bf16 %v1569_v28, %v1553_v27  ;;  %v197_v27 = vld [vmem:[%s10791_s1 + $0x4c8] sm:$0xff] }
 0x157   :  { %4690 = vmatpush1.bf16.msra.mxu1 %v4689_v39  ;;  %4500 = vmatprep.subr.bf16.mxu0 %v4499_v40  ;;  %v1408_v39 = vld [vmem:[%s10791_s1 + $0x2aa0] sm:$0xff]  ;;  %v1394_v40 = vld [vmem:[%s10791_s1 + $0x2a30] sm:$0xff] }
 0x158   :  { %4692 = vmatprep.subr.bf16.mxu1 %v4691_v44  ;;  %v1441_v44 = vld [vmem:[%s10791_s1 + $0x2ba8] sm:$0xff]  ;;  %v4521_v47 = vpack.c.bf16 %v1408_v39, %v1392_v38  ;;  %v4713_v48 = vpack.c.bf16 %v1410_v42, %v1394_v40  ;;  %v1570_v38 = vld [vmem:[%s10791_s1 + $0x2fb0] sm:$0xff]  ;;  %v71_v42 = vld [vmem:[%s10791_s1 + $0xd8] sm:$0xff] }
 0x159   :  { %v4523_v49 = vpack.c.bf16 %v1441_v44, %v1425_v43  ;;  %v53_v39 = vld [vmem:[%s10791_s1 + $0x48] sm:$0xff]  ;;  %v5700_v28 = vld [vmem:[%s10792_s0 + $0x80] sm:$0xff] }
 0x15a   :  { %4502 = vmatpush1.bf16.msra.mxu0 %v4501_v51  ;;  %v1440_v51 = vld [vmem:[%s10791_s1 + $0x2ba0] sm:$0xff]  ;;  %v69_v40 = vld [vmem:[%s10791_s1 + $0xc8] sm:$0xff] }
 0x15b   :  { %4694 = vmatpush1.bf16.msra.mxu1 %v4693_v52  ;;  %4504 = vmatprep.subr.bf16.mxu0 %v4503_v53  ;;  %v1426_v52 = vld [vmem:[%s10791_s1 + $0x2b30] sm:$0xff]  ;;  %v4715_v53 = vpack.c.bf16 %v1443_v46, %v1427_v45  ;;  %v4525_v59 = vpack.c.bf16 %v1440_v51, %v1424_v50  ;;  %v4735_v45 = vpack.c.bf16 %v69_v40, %v53_v39  ;;  %v52_v46 = vld [vmem:[%s10791_s1 + $0x40] sm:$0xff]  ;;  %v85_v51 = vld [vmem:[%s10791_s1 + $0x148] sm:$0xff] }
 0x15c   :  { %4696 = vmatprep.subr.bf16.mxu1 %v4695_v57  ;;  %v1459_v57 = vld [vmem:[%s10791_s1 + $0x2c38] sm:$0xff]  ;;  %v4717_v60 = vpack.c.bf16 %v1442_v54, %v1426_v52  ;;  %v70_v50 = vld [vmem:[%s10791_s1 + $0xd0] sm:$0xff]  ;;  %v101_v52 = vld [vmem:[%s10791_s1 + $0x1c8] sm:$0xff] }
 0x15d   :  { %v87_v54 = vld [vmem:[%s10791_s1 + $0x158] sm:$0xff]  ;;  %v198_v40 = vld [vmem:[%s10791_s1 + $0x4d0] sm:$0xff] }
 0x15e   :  { %4506 = vmatpush1.bf16.msra.mxu0 %v4505_v63  ;;  %v1472_v63 = vld [vmem:[%s10791_s1 + $0x2ca0] sm:$0xff] }
 0x15f   :  { %4698 = vmatpush1.bf16.msra.mxu1 %v4697_v0  ;;  %4508 = vmatprep.subr.bf16.mxu0 %v4507_v1  ;;  %v1458_v0 = vld [vmem:[%s10791_s1 + $0x2c30] sm:$0xff]  ;;  %v4719_v1 = vpack.c.bf16 %v1475_v58, %v1459_v57  ;;  %v4529_v7 = vpack.c.bf16 %v1472_v63, %v1456_v62  ;;  %v84_v57 = vld [vmem:[%s10791_s1 + $0x140] sm:$0xff]  ;;  %v4931_v63 = vpack.c.bf16 %v103_v55, %v87_v54  ;;  %v245_v54 = vld [vmem:[%s10791_s1 + $0x648] sm:$0xff] }
 0x160   :  { %4700 = vmatprep.subr.bf16.mxu1 %v4699_v5  ;;  %v1491_v5 = vld [vmem:[%s10791_s1 + $0x2d38] sm:$0xff]  ;;  %v4721_v8 = vpack.c.bf16 %v1474_v2, %v1458_v0  ;;  %v100_v58 = vld [vmem:[%s10791_s1 + $0x1c0] sm:$0xff]  ;;  %v117_v0 = vld [vmem:[%s10791_s1 + $0x248] sm:$0xff] }
 0x161   :  { %v5696_v62 = vld [vmem:[%s10792_s0 + $0x20] sm:$0xff]  ;;  %v4741_v2 = vpack.c.bf16 %v100_v58, %v84_v57  ;;  %v261_v55 = vld [vmem:[%s10791_s1 + $0x6c8] sm:$0xff]  ;;  %v247_v57 = vld [vmem:[%s10791_s1 + $0x658] sm:$0xff] }
 0x162   :  { %4510 = vmatpush1.bf16.msra.mxu0 %v4509_v11  ;;  %v1504_v11 = vld [vmem:[%s10791_s1 + $0x2da0] sm:$0xff]  ;;  %v263_v58 = vld [vmem:[%s10791_s1 + $0x6d8] sm:$0xff] }
 0x163   :  { %4702 = vmatpush1.bf16.msra.mxu1 %v4701_v12  ;;  %4512 = vmatprep.subr.bf16.mxu0 %v4511_v13  ;;  %v1490_v12 = vld [vmem:[%s10791_s1 + $0x2d30] sm:$0xff]  ;;  %v4723_v13 = vpack.c.bf16 %v1507_v6, %v1491_v5  ;;  %v4533_v19 = vpack.c.bf16 %v1504_v11, %v1488_v10  ;;  %v5697_v5 = vld [vmem:[%s10792_s0 + $0x58] sm:$0xff] }
 0x164   :  { %4704 = vmatprep.subr.bf16.mxu1 %v4703_v17  ;;  %v1523_v17 = vld [vmem:[%s10791_s1 + $0x2e38] sm:$0xff]  ;;  %v4725_v20 = vpack.c.bf16 %v1506_v14, %v1490_v12  ;;  %v118_v10 = vld [vmem:[%s10791_s1 + $0x250] sm:$0xff]  ;;  %v149_v14 = vld [vmem:[%s10791_s1 + $0x348] sm:$0xff] }
 0x165   :  { %v134_v11 = vld [vmem:[%s10791_s1 + $0x2d0] sm:$0xff] }
 0x166   :  { %4514 = vmatpush1.bf16.msra.mxu0 %v4513_v23  ;;  %v1536_v23 = vld [vmem:[%s10791_s1 + $0x2ea0] sm:$0xff]  ;;  %v5698_v12 = vld [vmem:[%s10792_s0 + $0x50] sm:$0xff] }
 0x167   :  { %4706 = vmatpush1.bf16.msra.mxu1 %v4705_v24  ;;  %4516 = vmatprep.subr.bf16.mxu0 %v4515_v25  ;;  %v1522_v24 = vld [vmem:[%s10791_s1 + $0x2e30] sm:$0xff]  ;;  %v4727_v25 = vpack.c.bf16 %v1539_v18, %v1523_v17  ;;  %v4537_v31 = vpack.c.bf16 %v1536_v23, %v1520_v22  ;;  %v151_v17 = vld [vmem:[%s10791_s1 + $0x358] sm:$0xff]  ;;  %v164_v22 = vld [vmem:[%s10791_s1 + $0x3c0] sm:$0xff] }
 0x168   :  { %4708 = vmatprep.subr.bf16.mxu1 %v4707_v29  ;;  %v1555_v29 = vld [vmem:[%s10791_s1 + $0x2f38] sm:$0xff]  ;;  %v4729_v32 = vpack.c.bf16 %v1538_v26, %v1522_v24  ;;  %v150_v23 = vld [vmem:[%s10791_s1 + $0x350] sm:$0xff]  ;;  %v4747_v24 = vpack.c.bf16 %v165_v15, %v149_v14  ;;  %v181_v26 = vld [vmem:[%s10791_s1 + $0x448] sm:$0xff] }
 0x169   :  { %v167_v18 = vld [vmem:[%s10791_s1 + $0x3d8] sm:$0xff] }
 0x16a   :  { %4518 = vmatpush1.bf16.msra.mxu0 %v4517_v35  ;;  %v1568_v35 = vld [vmem:[%s10791_s1 + $0x2fa0] sm:$0xff] }
 0x16b   :  { %4710 = vmatpush1.bf16.msra.mxu1 %v4709_v36  ;;  %4520 = vmatprep.subr.bf16.mxu0 %v4519_v37  ;;  %v1554_v36 = vld [vmem:[%s10791_s1 + $0x2f30] sm:$0xff]  ;;  %v4731_v37 = vpack.c.bf16 %v1571_v30, %v1555_v29  ;;  %v4541_v43 = vpack.c.bf16 %v1568_v35, %v1552_v34  ;;  %v4939_v29 = vpack.c.bf16 %v167_v18, %v151_v17  ;;  %v183_v30 = vld [vmem:[%s10791_s1 + $0x458] sm:$0xff]  ;;  %v292_v17 = vld [vmem:[%s10791_s1 + $0x7c0] sm:$0xff] }
 0x16c   :  { %4712 = vmatprep.subr.bf16.mxu1 %v4711_v41  ;;  %v55_v41 = vld [vmem:[%s10791_s1 + $0x58] sm:$0xff]  ;;  %v4733_v44 = vpack.c.bf16 %v1570_v38, %v1554_v36  ;;  %v4751_v35 = vpack.c.bf16 %v197_v27, %v181_v26  ;;  %v180_v36 = vld [vmem:[%s10791_s1 + $0x440] sm:$0xff]  ;;  %v182_v38 = vld [vmem:[%s10791_s1 + $0x450] sm:$0xff] }
 0x16d   :  { %v278_v18 = vld [vmem:[%s10791_s1 + $0x750] sm:$0xff]  ;;  %v311_v27 = vld [vmem:[%s10791_s1 + $0x858] sm:$0xff] }
 0x16e   :  { %4522 = vmatpush1.bf16.msra.mxu0 %v4521_v47  ;;  %v68_v47 = vld [vmem:[%s10791_s1 + $0xc0] sm:$0xff] }
 0x16f   :  { %4714 = vmatpush1.bf16.msra.mxu1 %v4713_v48  ;;  %4524 = vmatprep.subr.bf16.mxu0 %v4523_v49  ;;  %v4927_v48 = vpack.c.bf16 %v71_v42, %v55_v41  ;;  %v54_v49 = vld [vmem:[%s10791_s1 + $0x50] sm:$0xff]  ;;  %v213_v41 = vld [vmem:[%s10791_s1 + $0x548] sm:$0xff] }
 0x170   :  { %4716 = vmatprep.subr.bf16.mxu1 %v4715_v53  ;;  %v4737_v53 = vpack.c.bf16 %v68_v47, %v52_v46  ;;  %v4929_v56 = vpack.c.bf16 %v70_v50, %v54_v49  ;;  %v229_v42 = vld [vmem:[%s10791_s1 + $0x5c8] sm:$0xff]  ;;  %v4945_v47 = vpack.c.bf16 %v198_v40, %v182_v38  ;;  %v212_v49 = vld [vmem:[%s10791_s1 + $0x540] sm:$0xff]  ;;  %v326_v40 = vld [vmem:[%s10791_s1 + $0x8d0] sm:$0xff] }
 0x171   :  { %v228_v50 = vld [vmem:[%s10791_s1 + $0x5c0] sm:$0xff] }
 0x172   :  { %4526 = vmatpush1.bf16.msra.mxu0 %v4525_v59  ;;  %v4739_v59 = vpack.c.bf16 %v101_v52, %v85_v51  ;;  %v214_v51 = vld [vmem:[%s10791_s1 + $0x550] sm:$0xff] }
 0x173   :  { %4718 = vmatpush1.bf16.msra.mxu1 %v4717_v60  ;;  %4528 = vmatprep.subr.bf16.mxu0 %v4527_v61  ;;  %v86_v60 = vld [vmem:[%s10791_s1 + $0x150] sm:$0xff] }
 0x174   :  { %4720 = vmatprep.subr.bf16.mxu1 %v4719_v1  ;;  %v102_v61 = vld [vmem:[%s10791_s1 + $0x1d0] sm:$0xff]  ;;  %v133_v1 = vld [vmem:[%s10791_s1 + $0x2c8] sm:$0xff] }
 0x175   :  { %v4933_v6 = vpack.c.bf16 %v102_v61, %v86_v60  ;;  %v4759_v61 = vpack.c.bf16 %v261_v55, %v245_v54  ;;  %v340_v54 = vld [vmem:[%s10791_s1 + $0x940] sm:$0xff] }
 0x176   :  { %4530 = vmatpush1.bf16.msra.mxu0 %v4529_v7  ;;  %v116_v7 = vld [vmem:[%s10791_s1 + $0x240] sm:$0xff] }
 0x177   :  { %4722 = vmatpush1.bf16.msra.mxu1 %v4721_v8  ;;  %4532 = vmatprep.subr.bf16.mxu0 %v4531_v9  ;;  %v132_v8 = vld [vmem:[%s10791_s1 + $0x2c0] sm:$0xff]  ;;  %v4743_v9 = vpack.c.bf16 %v133_v1, %v117_v0  ;;  %v246_v0 = vld [vmem:[%s10791_s1 + $0x650] sm:$0xff] }
 0x178   :  { %4724 = vmatprep.subr.bf16.mxu1 %v4723_v13  ;;  %v4935_v13 = vpack.c.bf16 %v135_v4, %v119_v3  ;;  %v4745_v16 = vpack.c.bf16 %v132_v8, %v116_v7  ;;  %v262_v3 = vld [vmem:[%s10791_s1 + $0x6d0] sm:$0xff]  ;;  %v277_v4 = vld [vmem:[%s10791_s1 + $0x748] sm:$0xff]  ;;  %v279_v8 = vld [vmem:[%s10791_s1 + $0x758] sm:$0xff] }
 0x179   :  { %v4953_v14 = vpack.c.bf16 %v262_v3, %v246_v0  ;;  %v356_v55 = vld [vmem:[%s10791_s1 + $0x9c0] sm:$0xff] }
 0x17a   :  { %4534 = vmatpush1.bf16.msra.mxu0 %v4533_v19  ;;  %v5699_v19 = vld [vmem:[%s10792_s0 + $0x88] sm:$0xff] }
 0x17b   :  { %4726 = vmatpush1.bf16.msra.mxu1 %v4725_v20  ;;  %4536 = vmatprep.subr.bf16.mxu0 %v4535_v21  ;;  %v4937_v20 = vpack.c.bf16 %v134_v11, %v118_v10  ;;  %v148_v21 = vld [vmem:[%s10791_s1 + $0x340] sm:$0xff] }
 0x17c   :  { %4728 = vmatprep.subr.bf16.mxu1 %v4727_v25  ;;  %v166_v25 = vld [vmem:[%s10791_s1 + $0x3d0] sm:$0xff] }
 0x17d   :  { %v4941_v34 = vpack.c.bf16 %v166_v25, %v150_v23  ;;  %v325_v23 = vld [vmem:[%s10791_s1 + $0x8c8] sm:$0xff] }
 0x17e   :  { %4538 = vmatpush1.bf16.msra.mxu0 %v4537_v31  ;;  %v199_v31 = vld [vmem:[%s10791_s1 + $0x4d8] sm:$0xff] }
 0x17f   :  { %4730 = vmatpush1.bf16.msra.mxu1 %v4729_v32  ;;  %4540 = vmatprep.subr.bf16.mxu0 %v4539_v33  ;;  %v4749_v32 = vpack.c.bf16 %v164_v22, %v148_v21  ;;  %v5701_v33 = vld [vmem:[%s10792_s0 + $0xb8] sm:$0xff]  ;;  %v4943_v39 = vpack.c.bf16 %v199_v31, %v183_v30  ;;  %v294_v21 = vld [vmem:[%s10791_s1 + $0x7d0] sm:$0xff]  ;;  %v309_v22 = vld [vmem:[%s10791_s1 + $0x848] sm:$0xff] }
 0x180   :  { %4732 = vmatprep.subr.bf16.mxu1 %v4731_v37  ;;  %v196_v37 = vld [vmem:[%s10791_s1 + $0x4c0] sm:$0xff] }
 0x181   :  { %v4753_v46 = vpack.c.bf16 %v196_v37, %v180_v36  ;;  %v324_v36 = vld [vmem:[%s10791_s1 + $0x8c0] sm:$0xff]  ;;  %v310_v37 = vld [vmem:[%s10791_s1 + $0x850] sm:$0xff] }
 0x182   :  { %4542 = vmatpush1.bf16.msra.mxu0 %v4541_v43  ;;  %v5702_v43 = vld [vmem:[%s10792_s0 + $0xb0] sm:$0xff] }
 0x183   :  { %4734 = vmatpush1.bf16.msra.mxu1 %v4733_v44  ;;  %4736 = vmatprep.subr.bf16.mxu0 %v4735_v45  ;;  %v215_v44 = vld [vmem:[%s10791_s1 + $0x558] sm:$0xff] }
 0x184   :  { %4928 = vmatprep.subr.bf16.mxu1 %v4927_v48  ;;  %v231_v45 = vld [vmem:[%s10791_s1 + $0x5d8] sm:$0xff]  ;;  %v4755_v48 = vpack.c.bf16 %v229_v42, %v213_v41  ;;  %v341_v41 = vld [vmem:[%s10791_s1 + $0x948] sm:$0xff] }
 0x185   :  { %2357 = vmatmul.mubr.f32.vlgmr.msra.gmra.mrb[8].mxu0 %v5696_v62  ;;  %v4947_v52 = vpack.c.bf16 %v231_v45, %v215_v44  ;;  %v357_v42 = vld [vmem:[%s10791_s1 + $0x9c8] sm:$0xff] }
 0x186   :  { %2624 = vmatmul.mubr.f32.vlgmr.msra.gmra.mrb[8].mxu1 %v5696_v62  ;;  %4738 = vmatpush1.bf16.msra.mxu0 %v4737_v53  ;;  %v230_v53 = vld [vmem:[%s10791_s1 + $0x5d0] sm:$0xff]  ;;  %v244_v62 = vld [vmem:[%s10791_s1 + $0x640] sm:$0xff] }
 0x187   :  { %4930 = vmatpush1.bf16.msra.mxu1 %v4929_v56  ;;  %2362 = vmatprep.mubr.f32.mxu0 %v5697_v5  ;;  %v5703_v56 = vld [vmem:[%s10792_s0 + $0x8] sm:$0xff]  ;;  %v4949_v60 = vpack.c.bf16 %v230_v53, %v214_v51  ;;  %v4771_v53 = vpack.c.bf16 %v357_v42, %v341_v41  ;;  %v471_v42 = vld [vmem:[%s10791_s1 + $0xd58] sm:$0xff] }
 0x188   :  { %2629 = vmatprep.mubr.f32.mxu1 %v5697_v5  ;;  %4740 = vmatprep.subr.bf16.mxu0 %v4739_v59  ;;  %v4757_v59 = vpack.c.bf16 %v228_v50, %v212_v49  ;;  %v293_v5 = vld [vmem:[%s10791_s1 + $0x7c8] sm:$0xff] }
 0x189   :  { %2363 = vmatmul.mubr.f32.gmra.mrb[10].mxu0 %v5698_v12  ;;  %4932 = vmatprep.subr.bf16.mxu1 %v4931_v63  ;;  %v260_v63 = vld [vmem:[%s10791_s1 + $0x6c0] sm:$0xff]  ;;  %v4763_v15 = vpack.c.bf16 %v293_v5, %v277_v4  ;;  %v4773_v5 = vpack.c.bf16 %v356_v55, %v340_v54  ;;  %v485_v41 = vld [vmem:[%s10791_s1 + $0xdc8] sm:$0xff]  ;;  %v503_v55 = vld [vmem:[%s10791_s1 + $0xe58] sm:$0xff] }
 0x18a   :  { %2630 = vmatmul.mubr.f32.gmra.mrb[10].mxu1 %v5698_v12  ;;  %4742 = vmatpush1.bf16.msra.mxu0 %v4741_v2  ;;  %v4951_v2 = vpack.c.bf16 %v263_v58, %v247_v57  ;;  %v4761_v12 = vpack.c.bf16 %v260_v63, %v244_v62  ;;  %v517_v54 = vld [vmem:[%s10791_s1 + $0xec8] sm:$0xff] }
 0x18b   :  { %4934 = vmatpush1.bf16.msra.mxu1 %v4933_v6  ;;  %2368 = vmatprep.mubr.f32.mxu0 %v5699_v19 }
 0x18c   :  { %2635 = vmatprep.mubr.f32.mxu1 %v5699_v19  ;;  %4744 = vmatprep.subr.bf16.mxu0 %v4743_v9  ;;  %v295_v9 = vld [vmem:[%s10791_s1 + $0x7d8] sm:$0xff] }
 0x18d   :  { %2369 = vmatmul.mubr.f32.gmra.mrb[12].mxu0 %v5700_v28  ;;  %4936 = vmatprep.subr.bf16.mxu1 %v4935_v13 }
 0x18e   :  { %2636 = vmatmul.mubr.f32.gmra.mrb[12].mxu1 %v5700_v28  ;;  %4746 = vmatpush1.bf16.msra.mxu0 %v4745_v16  ;;  %v276_v16 = vld [vmem:[%s10791_s1 + $0x740] sm:$0xff]  ;;  %v327_v28 = vld [vmem:[%s10791_s1 + $0x8d8] sm:$0xff] }
 0x18f   :  { %4938 = vmatpush1.bf16.msra.mxu1 %v4937_v20  ;;  %2374 = vmatprep.mubr.f32.mxu0 %v5701_v33  ;;  %v4955_v20 = vpack.c.bf16 %v295_v9, %v279_v8  ;;  %v4765_v31 = vpack.c.bf16 %v292_v17, %v276_v16  ;;  %v372_v9 = vld [vmem:[%s10791_s1 + $0xa40] sm:$0xff]  ;;  %v407_v17 = vld [vmem:[%s10791_s1 + $0xb58] sm:$0xff] }
 0x190   :  { %2641 = vmatprep.mubr.f32.mxu1 %v5701_v33  ;;  %4748 = vmatprep.subr.bf16.mxu0 %v4747_v24  ;;  %v4957_v33 = vpack.c.bf16 %v294_v21, %v278_v18  ;;  %v423_v18 = vld [vmem:[%s10791_s1 + $0xbd8] sm:$0xff] }
 0x191   :  { %2375 = vmatmul.mubr.f32.gmra.mrb[14].mxu0 %v5702_v43  ;;  %4940 = vmatprep.subr.bf16.mxu1 %v4939_v29 }
 0x192   :  { %2642 = vmatmul.mubr.f32.gmra.mrb[14].mxu1 %v5702_v43  ;;  %4750 = vmatpush1.bf16.msra.mxu0 %v4749_v32 }
 0x193   :  { %4942 = vmatpush1.bf16.msra.mxu1 %v4941_v34  ;;  %4752 = vmatprep.subr.bf16.mxu0 %v4751_v35  ;;  %v4767_v34 = vpack.c.bf16 %v325_v23, %v309_v22  ;;  %v308_v35 = vld [vmem:[%s10791_s1 + $0x840] sm:$0xff] }
 0x194   :  { %4944 = vmatprep.subr.bf16.mxu1 %v4943_v39  ;;  %2712 = vmatprep.mubr.f32.mxu0 %v5703_v56  ;;  %v4959_v39 = vpack.c.bf16 %v327_v28, %v311_v27  ;;  %v4769_v50 = vpack.c.bf16 %v324_v36, %v308_v35  ;;  %v404_v22 = vld [vmem:[%s10791_s1 + $0xb40] sm:$0xff]  ;;  %v422_v27 = vld [vmem:[%s10791_s1 + $0xbd0] sm:$0xff]  ;;  %v437_v28 = vld [vmem:[%s10791_s1 + $0xc48] sm:$0xff] }
 0x195   :  { %2979 = vmatprep.mubr.f32.mxu1 %v5703_v56  ;;  %v342_v56 = vld [vmem:[%s10791_s1 + $0x950] sm:$0xff]  ;;  %v420_v23 = vld [vmem:[%s10791_s1 + $0xbc0] sm:$0xff] }
 0x196   :  { %4754 = vmatpush1.bf16.msra.mxu0 %v4753_v46  ;;  %v343_v46 = vld [vmem:[%s10791_s1 + $0x958] sm:$0xff]  ;;  %v436_v35 = vld [vmem:[%s10791_s1 + $0xc40] sm:$0xff] }
 0x197   :  { %4946 = vmatpush1.bf16.msra.mxu1 %v4945_v47  ;;  %4756 = vmatprep.subr.bf16.mxu0 %v4755_v48  ;;  %v359_v47 = vld [vmem:[%s10791_s1 + $0x9d8] sm:$0xff]  ;;  %v452_v36 = vld [vmem:[%s10791_s1 + $0xcc0] sm:$0xff] }
 0x198   :  { %v1824_v1 = vpop.f32.mrb[0].mxu0  ;;  %4948 = vmatprep.subr.bf16.mxu1 %v4947_v52  ;;  %v4961_v52 = vpack.c.bf16 %v326_v40, %v310_v37  ;;  %v4963_v58 = vpack.c.bf16 %v359_v47, %v343_v46  ;;  %v438_v37 = vld [vmem:[%s10791_s1 + $0xc50] sm:$0xff]  ;;  %v469_v40 = vld [vmem:[%s10791_s1 + $0xd48] sm:$0xff] }
 0x199   :  { %v2091_v6 = vpop.f32.mrb[0].mxu1  ;;  %v1826_v7 = vpop.f32.mrb[1].mxu0  ;;  %v4787_v47 = vpack.c.bf16 %v485_v41, %v469_v40  ;;  %v629_v40 = vld [vmem:[%s10791_s1 + $0x1248] sm:$0xff] }
 0x19a   :  { %v3716_v10 = vmax.f32 %v1824_v1, %v1826_v7  ;;  %v2093_v11 = vpop.f32.mrb[1].mxu1  ;;  %4758 = vmatpush1.bf16.msra.mxu0 %v4757_v59  ;;  %v358_v59 = vld [vmem:[%s10791_s1 + $0x9d0] sm:$0xff]  ;;  %v375_v1 = vld [vmem:[%s10791_s1 + $0xa58] sm:$0xff]  ;;  %v645_v41 = vld [vmem:[%s10791_s1 + $0x12c8] sm:$0xff] }
 0x19b   :  { %v3720_v13 = vmax.f32 %v2091_v6, %v2093_v11  ;;  %4950 = vmatpush1.bf16.msra.mxu1 %v4949_v60  ;;  %4760 = vmatprep.subr.bf16.mxu0 %v4759_v61  ;;  %v373_v60 = vld [vmem:[%s10791_s1 + $0xa48] sm:$0xff]  ;;  %v4965_v7 = vpack.c.bf16 %v358_v59, %v342_v56  ;;  %v374_v11 = vld [vmem:[%s10791_s1 + $0xa50] sm:$0xff]  ;;  %v519_v56 = vld [vmem:[%s10791_s1 + $0xed8] sm:$0xff] }
 0x19c   :  { %v1830_v19 = vpop.f32.mrb[2].mxu0  ;;  %4952 = vmatprep.subr.bf16.mxu1 %v4951_v2  ;;  %v389_v61 = vld [vmem:[%s10791_s1 + $0xac8] sm:$0xff]  ;;  %v391_v2 = vld [vmem:[%s10791_s1 + $0xad8] sm:$0xff] }
 0x19d   :  { %v8430_v24 = vmax.f32 %v3716_v10, %v3720_v13  ;;  %v2097_v25 = vpop.f32.mrb[2].mxu1  ;;  %v1832_v26 = vpop.f32.mrb[3].mxu0  ;;  %v4775_v8 = vpack.c.bf16 %v389_v61, %v373_v60  ;;  %v388_v10 = vld [vmem:[%s10791_s1 + $0xac0] sm:$0xff]  ;;  %v390_v13 = vld [vmem:[%s10791_s1 + $0xad0] sm:$0xff] }
 0x19e   :  { %v3717_v29 = vmax.f32 %v1830_v19, %v1832_v26  ;;  %v2099_v30 = vpop.f32.mrb[3].mxu1  ;;  %4762 = vmatpush1.bf16.msra.mxu0 %v4761_v12  ;;  %v4967_v12 = vpack.c.bf16 %v391_v2, %v375_v1  ;;  %v4777_v19 = vpack.c.bf16 %v388_v10, %v372_v9  ;;  %v4971_v26 = vpack.c.bf16 %v423_v18, %v407_v17  ;;  %v500_v60 = vld [vmem:[%s10791_s1 + $0xe40] sm:$0xff]  ;;  %v518_v1 = vld [vmem:[%s10791_s1 + $0xed0] sm:$0xff]  ;;  %v533_v2 = vld [vmem:[%s10791_s1 + $0xf48] sm:$0xff] }
 0x19f   :  { %v3721_v32 = vmax.f32 %v2097_v25, %v2099_v30  ;;  %4954 = vmatpush1.bf16.msra.mxu1 %v4953_v14  ;;  %4764 = vmatprep.subr.bf16.mxu0 %v4763_v15  ;;  %v405_v14 = vld [vmem:[%s10791_s1 + $0xb48] sm:$0xff]  ;;  %v406_v25 = vld [vmem:[%s10791_s1 + $0xb50] sm:$0xff]  ;;  %v439_v30 = vld [vmem:[%s10791_s1 + $0xc58] sm:$0xff] }
 0x1a0   :  { %v1836_v38 = vpop.f32.mrb[4].mxu0  ;;  %4956 = vmatprep.subr.bf16.mxu1 %v4955_v20  ;;  %v421_v15 = vld [vmem:[%s10791_s1 + $0xbc8] sm:$0xff]  ;;  %v4969_v20 = vpack.c.bf16 %v390_v13, %v374_v11  ;;  %v516_v61 = vld [vmem:[%s10791_s1 + $0xec0] sm:$0xff]  ;;  %v534_v11 = vld [vmem:[%s10791_s1 + $0xf50] sm:$0xff] }
 0x1a1   :  { %v8456_v43 = vmax.f32 %v3717_v29, %v3721_v32  ;;  %v2103_v44 = vpop.f32.mrb[4].mxu1  ;;  %v1838_v45 = vpop.f32.mrb[5].mxu0  ;;  %v4779_v21 = vpack.c.bf16 %v421_v15, %v405_v14  ;;  %v453_v29 = vld [vmem:[%s10791_s1 + $0xcc8] sm:$0xff]  ;;  %v4781_v32 = vpack.c.bf16 %v420_v23, %v404_v22  ;;  %v532_v9 = vld [vmem:[%s10791_s1 + $0xf40] sm:$0xff]  ;;  %v550_v13 = vld [vmem:[%s10791_s1 + $0xfd0] sm:$0xff] }
 0x1a2   :  { %v3718_v48 = vmax.f32 %v1836_v38, %v1838_v45  ;;  %v2105_v49 = vpop.f32.mrb[5].mxu1  ;;  %4766 = vmatpush1.bf16.msra.mxu0 %v4765_v31  ;;  %v455_v31 = vld [vmem:[%s10791_s1 + $0xcd8] sm:$0xff]  ;;  %v4785_v45 = vpack.c.bf16 %v452_v36, %v436_v35  ;;  %v548_v10 = vld [vmem:[%s10791_s1 + $0xfc0] sm:$0xff]  ;;  %v565_v14 = vld [vmem:[%s10791_s1 + $0x1048] sm:$0xff] }
 0x1a3   :  { %v3722_v51 = vmax.f32 %v2103_v44, %v2105_v49  ;;  %4958 = vmatpush1.bf16.msra.mxu1 %v4957_v33  ;;  %4768 = vmatprep.subr.bf16.mxu0 %v4767_v34  ;;  %v4973_v33 = vpack.c.bf16 %v422_v27, %v406_v25  ;;  %v4783_v34 = vpack.c.bf16 %v453_v29, %v437_v28  ;;  %v487_v44 = vld [vmem:[%s10791_s1 + $0xdd8] sm:$0xff]  ;;  %v484_v49 = vld [vmem:[%s10791_s1 + $0xdc0] sm:$0xff]  ;;  %v581_v15 = vld [vmem:[%s10791_s1 + $0x10c8] sm:$0xff] }
 0x1a4   :  { %v1842_v57 = vpop.f32.mrb[6].mxu0  ;;  %4960 = vmatprep.subr.bf16.mxu1 %v4959_v39  ;;  %v4975_v38 = vpack.c.bf16 %v455_v31, %v439_v30  ;;  %v454_v39 = vld [vmem:[%s10791_s1 + $0xcd0] sm:$0xff]  ;;  %v567_v17 = vld [vmem:[%s10791_s1 + $0x1058] sm:$0xff]  ;;  %v564_v22 = vld [vmem:[%s10791_s1 + $0x1040] sm:$0xff] }
 0x1a5   :  { %v8482_v62 = vmax.f32 %v3718_v48, %v3722_v51  ;;  %v2109_v63 = vpop.f32.mrb[6].mxu1  ;;  %v1844_v0 = vpop.f32.mrb[7].mxu0  ;;  %v4977_v46 = vpack.c.bf16 %v454_v39, %v438_v37  ;;  %v468_v48 = vld [vmem:[%s10791_s1 + $0xd40] sm:$0xff]  ;;  %v4979_v51 = vpack.c.bf16 %v487_v44, %v471_v42  ;;  %v583_v18 = vld [vmem:[%s10791_s1 + $0x10d8] sm:$0xff]  ;;  %v566_v25 = vld [vmem:[%s10791_s1 + $0x1050] sm:$0xff] }
 0x1a6   :  { %v3719_v3 = vmax.f32 %v1842_v57, %v1844_v0  ;;  %v2111_v4 = vpop.f32.mrb[7].mxu1  ;;  %4770 = vmatpush1.bf16.msra.mxu0 %v4769_v50  ;;  %v470_v50 = vld [vmem:[%s10791_s1 + $0xd50] sm:$0xff]  ;;  %v4789_v57 = vpack.c.bf16 %v484_v49, %v468_v48  ;;  %v4983_v0 = vpack.c.bf16 %v519_v56, %v503_v55  ;;  %v580_v23 = vld [vmem:[%s10791_s1 + $0x10c0] sm:$0xff]  ;;  %v597_v28 = vld [vmem:[%s10791_s1 + $0x1148] sm:$0xff]  ;;  %v4807_v48 = vpack.c.bf16 %v645_v41, %v629_v40 }
 0x1a7   :  { %v3723_v6 = vmax.f32 %v2109_v63, %v2111_v4  ;;  %4962 = vmatpush1.bf16.msra.mxu1 %v4961_v52  ;;  %4772 = vmatprep.subr.bf16.mxu0 %v4771_v53  ;;  %v486_v52 = vld [vmem:[%s10791_s1 + $0xdd0] sm:$0xff]  ;;  %v501_v53 = vld [vmem:[%s10791_s1 + $0xe48] sm:$0xff]  ;;  %v535_v4 = vld [vmem:[%s10791_s1 + $0xf58] sm:$0xff] }
 0x1a8   :  { %4964 = vmatprep.subr.bf16.mxu1 %v4963_v58  ;;  %v4981_v58 = vpack.c.bf16 %v486_v52, %v470_v50  ;;  %v4791_v59 = vpack.c.bf16 %v517_v54, %v501_v53  ;;  %v502_v63 = vld [vmem:[%s10791_s1 + $0xe50] sm:$0xff]  ;;  %v613_v29 = vld [vmem:[%s10791_s1 + $0x11c8] sm:$0xff]  ;;  %v599_v30 = vld [vmem:[%s10791_s1 + $0x1158] sm:$0xff] }
 0x1a9   :  { %v8508_v16 = vmax.f32 %v3719_v3, %v3723_v6  ;;  %v549_v3 = vld [vmem:[%s10791_s1 + $0xfc8] sm:$0xff]  ;;  %v4793_v6 = vpack.c.bf16 %v516_v61, %v500_v60  ;;  %v582_v27 = vld [vmem:[%s10791_s1 + $0x10d0] sm:$0xff]  ;;  %v615_v31 = vld [vmem:[%s10791_s1 + $0x11d8] sm:$0xff] }
 0x1aa   :  { %4774 = vmatpush1.bf16.msra.mxu0 %v4773_v5  ;;  %v551_v5 = vld [vmem:[%s10791_s1 + $0xfd8] sm:$0xff]  ;;  %v596_v35 = vld [vmem:[%s10791_s1 + $0x1140] sm:$0xff]  ;;  %v598_v37 = vld [vmem:[%s10791_s1 + $0x1150] sm:$0xff] }
 0x1ab   :  { %4966 = vmatpush1.bf16.msra.mxu1 %v4965_v7  ;;  %4776 = vmatprep.subr.bf16.mxu0 %v4775_v8  ;;  %v4985_v7 = vpack.c.bf16 %v518_v1, %v502_v63  ;;  %v4795_v8 = vpack.c.bf16 %v549_v3, %v533_v2  ;;  %v612_v36 = vld [vmem:[%s10791_s1 + $0x11c0] sm:$0xff]  ;;  %v614_v39 = vld [vmem:[%s10791_s1 + $0x11d0] sm:$0xff]  ;;  %v631_v44 = vld [vmem:[%s10791_s1 + $0x1258] sm:$0xff] }
 0x1ac   :  { %4968 = vmatprep.subr.bf16.mxu1 %v4967_v12  ;;  %v4987_v12 = vpack.c.bf16 %v551_v5, %v535_v4  ;;  %v5704_v42 = vld [vmem:[%s10792_s0] sm:$0xff]  ;;  %v646_v53 = vld [vmem:[%s10791_s1 + $0x12d0] sm:$0xff]  ;;  %v661_v54 = vld [vmem:[%s10791_s1 + $0x1348] sm:$0xff] }
 0x1ad   :  { %v628_v49 = vld [vmem:[%s10791_s1 + $0x1240] sm:$0xff]  ;;  %v677_v55 = vld [vmem:[%s10791_s1 + $0x13c8] sm:$0xff]  ;;  %v5705_v56 = vld [vmem:[%s10792_s0 + $0x38] sm:$0xff] }
 0x1ae   :  { %4778 = vmatpush1.bf16.msra.mxu0 %v4777_v19  ;;  %v4797_v19 = vpack.c.bf16 %v548_v10, %v532_v9  ;;  %v644_v50 = vld [vmem:[%s10791_s1 + $0x12c0] sm:$0xff]  ;;  %v4811_v63 = vpack.c.bf16 %v677_v55, %v661_v54  ;;  %v662_v2 = vld [vmem:[%s10791_s1 + $0x1350] sm:$0xff]  ;;  %v693_v5 = vld [vmem:[%s10791_s1 + $0x1448] sm:$0xff] }
 0x1af   :  { %4970 = vmatpush1.bf16.msra.mxu1 %v4969_v20  ;;  %4780 = vmatprep.subr.bf16.mxu0 %v4779_v21  ;;  %v4989_v20 = vpack.c.bf16 %v550_v13, %v534_v11  ;;  %v4799_v21 = vpack.c.bf16 %v581_v15, %v565_v14  ;;  %v4809_v60 = vpack.c.bf16 %v644_v50, %v628_v49  ;;  %v676_v1 = vld [vmem:[%s10791_s1 + $0x13c0] sm:$0xff]  ;;  %v678_v4 = vld [vmem:[%s10791_s1 + $0x13d0] sm:$0xff]  ;;  %v711_v9 = vld [vmem:[%s10791_s1 + $0x14d8] sm:$0xff] }
 0x1b0   :  { %4972 = vmatprep.subr.bf16.mxu1 %v4971_v26  ;;  %v4991_v26 = vpack.c.bf16 %v583_v18, %v567_v17  ;;  %v5708_v10 = vld [vmem:[%s10792_s0 + $0x60] sm:$0xff]  ;;  %v694_v17 = vld [vmem:[%s10791_s1 + $0x1450] sm:$0xff]  ;;  %v789_v49 = vld [vmem:[%s10791_s1 + $0x1748] sm:$0xff] }
 0x1b1   :  { %v692_v14 = vld [vmem:[%s10791_s1 + $0x1440] sm:$0xff]  ;;  %v805_v50 = vld [vmem:[%s10791_s1 + $0x17c8] sm:$0xff] }
 0x1b2   :  { %4782 = vmatpush1.bf16.msra.mxu0 %v4781_v32  ;;  %v4801_v32 = vpack.c.bf16 %v580_v23, %v564_v22  ;;  %v708_v15 = vld [vmem:[%s10791_s1 + $0x14c0] sm:$0xff]  ;;  %v5709_v22 = vld [vmem:[%s10792_s0 + $0x98] sm:$0xff]  ;;  %v4827_v55 = vpack.c.bf16 %v805_v50, %v789_v49  ;;  %v949_v49 = vld [vmem:[%s10791_s1 + $0x1c48] sm:$0xff] }
 0x1b3   :  { %4974 = vmatpush1.bf16.msra.mxu1 %v4973_v33  ;;  %4784 = vmatprep.subr.bf16.mxu0 %v4783_v34  ;;  %v4993_v33 = vpack.c.bf16 %v582_v27, %v566_v25  ;;  %v4803_v34 = vpack.c.bf16 %v613_v29, %v597_v28  ;;  %v727_v23 = vld [vmem:[%s10791_s1 + $0x1558] sm:$0xff]  ;;  %v4817_v27 = vpack.c.bf16 %v708_v15, %v692_v14  ;;  %v965_v50 = vld [vmem:[%s10791_s1 + $0x1cc8] sm:$0xff] }
 0x1b4   :  { %4976 = vmatprep.subr.bf16.mxu1 %v4975_v38  ;;  %v4995_v38 = vpack.c.bf16 %v615_v31, %v599_v30  ;;  %v743_v25 = vld [vmem:[%s10791_s1 + $0x15d8] sm:$0xff]  ;;  %v724_v30 = vld [vmem:[%s10791_s1 + $0x1540] sm:$0xff] }
 0x1b5   :  { %v740_v31 = vld [vmem:[%s10791_s1 + $0x15c0] sm:$0xff] }
 0x1b6   :  { %4786 = vmatpush1.bf16.msra.mxu0 %v4785_v45  ;;  %v647_v45 = vld [vmem:[%s10791_s1 + $0x12d8] sm:$0xff]  ;;  %v4821_v40 = vpack.c.bf16 %v740_v31, %v724_v30  ;;  %v884_v31 = vld [vmem:[%s10791_s1 + $0x1a40] sm:$0xff] }
 0x1b7   :  { %4978 = vmatpush1.bf16.msra.mxu1 %v4977_v46  ;;  %4788 = vmatprep.subr.bf16.mxu0 %v4787_v47  ;;  %v4805_v46 = vpack.c.bf16 %v612_v36, %v596_v35  ;;  %v4997_v47 = vpack.c.bf16 %v614_v39, %v598_v37  ;;  %v4999_v52 = vpack.c.bf16 %v647_v45, %v631_v44  ;;  %v757_v35 = vld [vmem:[%s10791_s1 + $0x1648] sm:$0xff]  ;;  %v5711_v37 = vld [vmem:[%s10792_s0 + $0x18] sm:$0xff]  ;;  %v756_v44 = vld [vmem:[%s10791_s1 + $0x1640] sm:$0xff] }
 0x1b8   :  { %4980 = vmatprep.subr.bf16.mxu1 %v4979_v51  ;;  %v630_v51 = vld [vmem:[%s10791_s1 + $0x1250] sm:$0xff]  ;;  %v773_v36 = vld [vmem:[%s10791_s1 + $0x16c8] sm:$0xff]  ;;  %v775_v39 = vld [vmem:[%s10791_s1 + $0x16d8] sm:$0xff] }
 0x1b9   :  { %v5001_v61 = vpack.c.bf16 %v646_v53, %v630_v51  ;;  %v772_v45 = vld [vmem:[%s10791_s1 + $0x16c0] sm:$0xff]  ;;  %v791_v51 = vld [vmem:[%s10791_s1 + $0x1758] sm:$0xff] }
 0x1ba   :  { %4790 = vmatpush1.bf16.msra.mxu0 %v4789_v57  ;;  %v663_v57 = vld [vmem:[%s10791_s1 + $0x1358] sm:$0xff]  ;;  %v4825_v53 = vpack.c.bf16 %v772_v45, %v756_v44  ;;  %v916_v44 = vld [vmem:[%s10791_s1 + $0x1b40] sm:$0xff] }
 0x1bb   :  { %4982 = vmatpush1.bf16.msra.mxu1 %v4981_v58  ;;  %4792 = vmatprep.subr.bf16.mxu0 %v4791_v59  ;;  %v679_v58 = vld [vmem:[%s10791_s1 + $0x13d8] sm:$0xff]  ;;  %v5706_v59 = vld [vmem:[%s10792_s0 + $0x30] sm:$0xff]  ;;  %v932_v45 = vld [vmem:[%s10791_s1 + $0x1bc0] sm:$0xff] }
 0x1bc   :  { %4984 = vmatprep.subr.bf16.mxu1 %v4983_v0  ;;  %v660_v0 = vld [vmem:[%s10791_s1 + $0x1340] sm:$0xff]  ;;  %v5003_v3 = vpack.c.bf16 %v679_v58, %v663_v57  ;;  %v790_v58 = vld [vmem:[%s10791_s1 + $0x1750] sm:$0xff] }
 0x1bd   :  { %v4813_v11 = vpack.c.bf16 %v676_v1, %v660_v0  ;;  %v804_v57 = vld [vmem:[%s10791_s1 + $0x17c0] sm:$0xff]  ;;  %v823_v0 = vld [vmem:[%s10791_s1 + $0x1858] sm:$0xff] }
 0x1be   :  { %4794 = vmatpush1.bf16.msra.mxu0 %v4793_v6  ;;  %v709_v6 = vld [vmem:[%s10791_s1 + $0x14c8] sm:$0xff]  ;;  %v839_v1 = vld [vmem:[%s10791_s1 + $0x18d8] sm:$0xff] }
 0x1bf   :  { %4986 = vmatpush1.bf16.msra.mxu1 %v4985_v7  ;;  %4796 = vmatprep.subr.bf16.mxu0 %v4795_v8  ;;  %v5707_v7 = vld [vmem:[%s10792_s0 + $0x68] sm:$0xff]  ;;  %v695_v8 = vld [vmem:[%s10791_s1 + $0x1458] sm:$0xff]  ;;  %v4815_v13 = vpack.c.bf16 %v709_v6, %v693_v5  ;;  %v820_v5 = vld [vmem:[%s10791_s1 + $0x1840] sm:$0xff] }
 0x1c0   :  { %4988 = vmatprep.subr.bf16.mxu1 %v4987_v12  ;;  %v5005_v12 = vpack.c.bf16 %v678_v4, %v662_v2  ;;  %v5007_v18 = vpack.c.bf16 %v711_v9, %v695_v8  ;;  %v836_v6 = vld [vmem:[%s10791_s1 + $0x18c0] sm:$0xff]  ;;  %v5023_v8 = vpack.c.bf16 %v839_v1, %v823_v0  ;;  %v838_v9 = vld [vmem:[%s10791_s1 + $0x18d0] sm:$0xff]  ;;  %v983_v0 = vld [vmem:[%s10791_s1 + $0x1d58] sm:$0xff] }
 0x1c1   :  { %v4833_v14 = vpack.c.bf16 %v836_v6, %v820_v5  ;;  %v999_v1 = vld [vmem:[%s10791_s1 + $0x1dd8] sm:$0xff]  ;;  %v980_v5 = vld [vmem:[%s10791_s1 + $0x1d40] sm:$0xff] }
 0x1c2   :  { %4798 = vmatpush1.bf16.msra.mxu0 %v4797_v19  ;;  %v710_v19 = vld [vmem:[%s10791_s1 + $0x14d0] sm:$0xff]  ;;  %v996_v6 = vld [vmem:[%s10791_s1 + $0x1dc0] sm:$0xff] }
 0x1c3   :  { %4990 = vmatpush1.bf16.msra.mxu1 %v4989_v20  ;;  %4800 = vmatprep.subr.bf16.mxu0 %v4799_v21  ;;  %v725_v20 = vld [vmem:[%s10791_s1 + $0x1548] sm:$0xff]  ;;  %v5009_v28 = vpack.c.bf16 %v710_v19, %v694_v17  ;;  %v868_v19 = vld [vmem:[%s10791_s1 + $0x19c0] sm:$0xff] }
 0x1c4   :  { %4992 = vmatprep.subr.bf16.mxu1 %v4991_v26  ;;  %v741_v21 = vld [vmem:[%s10791_s1 + $0x15c8] sm:$0xff]  ;;  %v5710_v26 = vld [vmem:[%s10792_s0 + $0x90] sm:$0xff] }
 0x1c5   :  { %2713 = vmatmul.mubr.f32.vlgmr.msra.gmra.mrb[16].mxu0 %v5704_v42  ;;  %v4819_v29 = vpack.c.bf16 %v741_v21, %v725_v20  ;;  %v854_v20 = vld [vmem:[%s10791_s1 + $0x1950] sm:$0xff] }
 0x1c6   :  { %4802 = vmatpush1.bf16.msra.mxu0 %v4801_v32  ;;  %2980 = vmatmul.mubr.f32.vlgmr.msra.gmra.mrb[16].mxu1 %v5704_v42  ;;  %v726_v32 = vld [vmem:[%s10791_s1 + $0x1550] sm:$0xff]  ;;  %v4823_v42 = vpack.c.bf16 %v773_v36, %v757_v35  ;;  %v917_v36 = vld [vmem:[%s10791_s1 + $0x1b48] sm:$0xff] }
 0x1c7   :  { %4994 = vmatpush1.bf16.msra.mxu1 %v4993_v33  ;;  %4804 = vmatprep.subr.bf16.mxu0 %v4803_v34  ;;  %v5011_v33 = vpack.c.bf16 %v743_v25, %v727_v23  ;;  %v742_v34 = vld [vmem:[%s10791_s1 + $0x15d0] sm:$0xff]  ;;  %v885_v23 = vld [vmem:[%s10791_s1 + $0x1a48] sm:$0xff] }
 0x1c8   :  { %4996 = vmatprep.subr.bf16.mxu1 %v4995_v38  ;;  %2718 = vmatprep.mubr.f32.mxu0 %v5705_v56  ;;  %v759_v38 = vld [vmem:[%s10791_s1 + $0x1658] sm:$0xff]  ;;  %v5013_v41 = vpack.c.bf16 %v742_v34, %v726_v32  ;;  %v901_v25 = vld [vmem:[%s10791_s1 + $0x1ac8] sm:$0xff]  ;;  %v900_v32 = vld [vmem:[%s10791_s1 + $0x1ac0] sm:$0xff] }
 0x1c9   :  { %2985 = vmatprep.mubr.f32.mxu1 %v5705_v56  ;;  %2719 = vmatmul.mubr.f32.gmra.mrb[18].mxu0 %v5706_v59  ;;  %v788_v56 = vld [vmem:[%s10791_s1 + $0x1740] sm:$0xff]  ;;  %v4839_v30 = vpack.c.bf16 %v901_v25, %v885_v23  ;;  %v902_v35 = vld [vmem:[%s10791_s1 + $0x1ad0] sm:$0xff]  ;;  %v1045_v23 = vld [vmem:[%s10791_s1 + $0x1f48] sm:$0xff] }
 0x1ca   :  { %4806 = vmatpush1.bf16.msra.mxu0 %v4805_v46  ;;  %2986 = vmatmul.mubr.f32.gmra.mrb[18].mxu1 %v5706_v59  ;;  %v758_v46 = vld [vmem:[%s10791_s1 + $0x1650] sm:$0xff]  ;;  %v4829_v2 = vpack.c.bf16 %v804_v57, %v788_v56  ;;  %v948_v56 = vld [vmem:[%s10791_s1 + $0x1c40] sm:$0xff]  ;;  %v1061_v25 = vld [vmem:[%s10791_s1 + $0x1fc8] sm:$0xff] }
 0x1cb   :  { %4998 = vmatpush1.bf16.msra.mxu1 %v4997_v47  ;;  %4808 = vmatprep.subr.bf16.mxu0 %v4807_v48  ;;  %v5015_v47 = vpack.c.bf16 %v775_v39, %v759_v38  ;;  %v774_v48 = vld [vmem:[%s10791_s1 + $0x16d0] sm:$0xff]  ;;  %v919_v38 = vld [vmem:[%s10791_s1 + $0x1b58] sm:$0xff]  ;;  %v964_v57 = vld [vmem:[%s10791_s1 + $0x1cc0] sm:$0xff] }
 0x1cc   :  { %5000 = vmatprep.subr.bf16.mxu1 %v4999_v52  ;;  %2724 = vmatprep.mubr.f32.mxu0 %v5707_v7  ;;  %v807_v52 = vld [vmem:[%s10791_s1 + $0x17d8] sm:$0xff]  ;;  %v5017_v54 = vpack.c.bf16 %v774_v48, %v758_v46  ;;  %v918_v46 = vld [vmem:[%s10791_s1 + $0x1b50] sm:$0xff] }
 0x1cd   :  { %2991 = vmatprep.mubr.f32.mxu1 %v5707_v7  ;;  %2725 = vmatmul.mubr.f32.gmra.mrb[20].mxu0 %v5708_v10  ;;  %v5019_v59 = vpack.c.bf16 %v807_v52, %v791_v51  ;;  %v822_v7 = vld [vmem:[%s10791_s1 + $0x1850] sm:$0xff]  ;;  %v935_v39 = vld [vmem:[%s10791_s1 + $0x1bd8] sm:$0xff] }
 0x1ce   :  { %4810 = vmatpush1.bf16.msra.mxu0 %v4809_v60  ;;  %2992 = vmatmul.mubr.f32.gmra.mrb[20].mxu1 %v5708_v10  ;;  %v806_v60 = vld [vmem:[%s10791_s1 + $0x17d0] sm:$0xff]  ;;  %v853_v10 = vld [vmem:[%s10791_s1 + $0x1948] sm:$0xff]  ;;  %v5025_v15 = vpack.c.bf16 %v838_v9, %v822_v7  ;;  %v951_v51 = vld [vmem:[%s10791_s1 + $0x1c58] sm:$0xff] }
 0x1cf   :  { %5002 = vmatpush1.bf16.msra.mxu1 %v5001_v61  ;;  %4812 = vmatprep.subr.bf16.mxu0 %v4811_v63  ;;  %v821_v61 = vld [vmem:[%s10791_s1 + $0x1848] sm:$0xff]  ;;  %v934_v48 = vld [vmem:[%s10791_s1 + $0x1bd0] sm:$0xff]  ;;  %v967_v52 = vld [vmem:[%s10791_s1 + $0x1cd8] sm:$0xff] }
 0x1d0   :  { %5004 = vmatprep.subr.bf16.mxu1 %v5003_v3  ;;  %2730 = vmatprep.mubr.f32.mxu0 %v5709_v22  ;;  %v837_v63 = vld [vmem:[%s10791_s1 + $0x18c8] sm:$0xff]  ;;  %v5021_v3 = vpack.c.bf16 %v806_v60, %v790_v58  ;;  %v950_v58 = vld [vmem:[%s10791_s1 + $0x1c50] sm:$0xff] }
 0x1d1   :  { %2997 = vmatprep.mubr.f32.mxu1 %v5709_v22  ;;  %2731 = vmatmul.mubr.f32.gmra.mrb[22].mxu0 %v5710_v26  ;;  %v4831_v4 = vpack.c.bf16 %v837_v63, %v821_v61  ;;  %v870_v22 = vld [vmem:[%s10791_s1 + $0x19d0] sm:$0xff]  ;;  %v981_v61 = vld [vmem:[%s10791_s1 + $0x1d48] sm:$0xff] }
 0x1d2   :  { %4814 = vmatpush1.bf16.msra.mxu0 %v4813_v11  ;;  %2998 = vmatmul.mubr.f32.gmra.mrb[22].mxu1 %v5710_v26  ;;  %v869_v11 = vld [vmem:[%s10791_s1 + $0x19c8] sm:$0xff]  ;;  %v887_v26 = vld [vmem:[%s10791_s1 + $0x1a58] sm:$0xff]  ;;  %v966_v60 = vld [vmem:[%s10791_s1 + $0x1cd0] sm:$0xff] }
 0x1d3   :  { %5006 = vmatpush1.bf16.msra.mxu1 %v5005_v12  ;;  %4816 = vmatprep.subr.bf16.mxu0 %v4815_v13  ;;  %v855_v12 = vld [vmem:[%s10791_s1 + $0x1958] sm:$0xff]  ;;  %v4835_v17 = vpack.c.bf16 %v869_v11, %v853_v10  ;;  %v997_v63 = vld [vmem:[%s10791_s1 + $0x1dc8] sm:$0xff]  ;;  %v982_v7 = vld [vmem:[%s10791_s1 + $0x1d50] sm:$0xff] }
 0x1d4   :  { %5008 = vmatprep.subr.bf16.mxu1 %v5007_v18  ;;  %2801 = vmatprep.mubr.f32.mxu0 %v5711_v37  ;;  %v871_v13 = vld [vmem:[%s10791_s1 + $0x19d8] sm:$0xff]  ;;  %v852_v18 = vld [vmem:[%s10791_s1 + $0x1940] sm:$0xff]  ;;  %v998_v9 = vld [vmem:[%s10791_s1 + $0x1dd0] sm:$0xff] }
 0x1d5   :  { %3068 = vmatprep.mubr.f32.mxu1 %v5711_v37  ;;  %v5027_v21 = vpack.c.bf16 %v871_v13, %v855_v12  ;;  %v933_v37 = vld [vmem:[%s10791_s1 + $0x1bc8] sm:$0xff]  ;;  %v1015_v12 = vld [vmem:[%s10791_s1 + $0x1e58] sm:$0xff] }
 0x1d6   :  { %4818 = vmatpush1.bf16.msra.mxu0 %v4817_v27  ;;  %v903_v27 = vld [vmem:[%s10791_s1 + $0x1ad8] sm:$0xff]  ;;  %v1013_v10 = vld [vmem:[%s10791_s1 + $0x1e48] sm:$0xff] }
 0x1d7   :  { %5010 = vmatpush1.bf16.msra.mxu1 %v5009_v28  ;;  %4820 = vmatprep.subr.bf16.mxu0 %v4819_v29  ;;  %v4837_v28 = vpack.c.bf16 %v868_v19, %v852_v18  ;;  %v5029_v29 = vpack.c.bf16 %v870_v22, %v854_v20  ;;  %v5031_v34 = vpack.c.bf16 %v903_v27, %v887_v26  ;;  %v1029_v11 = vld [vmem:[%s10791_s1 + $0x1ec8] sm:$0xff]  ;;  %v1031_v13 = vld [vmem:[%s10791_s1 + $0x1ed8] sm:$0xff]  ;;  %v1012_v18 = vld [vmem:[%s10791_s1 + $0x1e40] sm:$0xff] }
 0x1d8   :  { %5012 = vmatprep.subr.bf16.mxu1 %v5011_v33  ;;  %v886_v33 = vld [vmem:[%s10791_s1 + $0x1a50] sm:$0xff]  ;;  %v1028_v19 = vld [vmem:[%s10791_s1 + $0x1ec0] sm:$0xff]  ;;  %v1047_v26 = vld [vmem:[%s10791_s1 + $0x1f58] sm:$0xff] }
 0x1d9   :  { %v1014_v20 = vld [vmem:[%s10791_s1 + $0x1e50] sm:$0xff]  ;;  %v1063_v27 = vld [vmem:[%s10791_s1 + $0x1fd8] sm:$0xff] }
 0x1da   :  { %4822 = vmatpush1.bf16.msra.mxu0 %v4821_v40  ;;  %v4841_v40 = vpack.c.bf16 %v900_v32, %v884_v31  ;;  %v1030_v22 = vld [vmem:[%s10791_s1 + $0x1ed0] sm:$0xff]  ;;  %v1044_v31 = vld [vmem:[%s10791_s1 + $0x1f40] sm:$0xff] }
 0x1db   :  { %5014 = vmatpush1.bf16.msra.mxu1 %v5013_v41  ;;  %4824 = vmatprep.subr.bf16.mxu0 %v4823_v42  ;;  %v5033_v41 = vpack.c.bf16 %v902_v35, %v886_v33  ;;  %v4843_v42 = vpack.c.bf16 %v933_v37, %v917_v36  ;;  %v1060_v32 = vld [vmem:[%s10791_s1 + $0x1fc0] sm:$0xff]  ;;  %v1046_v33 = vld [vmem:[%s10791_s1 + $0x1f50] sm:$0xff]  ;;  %v1077_v36 = vld [vmem:[%s10791_s1 + $0x2048] sm:$0xff] }
 0x1dc   :  { %5016 = vmatprep.subr.bf16.mxu1 %v5015_v47  ;;  %v5035_v47 = vpack.c.bf16 %v935_v39, %v919_v38  ;;  %v1062_v35 = vld [vmem:[%s10791_s1 + $0x1fd0] sm:$0xff]  ;;  %v1093_v37 = vld [vmem:[%s10791_s1 + $0x20c8] sm:$0xff]  ;;  %v1079_v38 = vld [vmem:[%s10791_s1 + $0x2058] sm:$0xff] }
 0x1dd   :  { %v1095_v39 = vld [vmem:[%s10791_s1 + $0x20d8] sm:$0xff] }
 0x1de   :  { %4826 = vmatpush1.bf16.msra.mxu0 %v4825_v53  ;;  %v4845_v53 = vpack.c.bf16 %v932_v45, %v916_v44  ;;  %v1076_v44 = vld [vmem:[%s10791_s1 + $0x2040] sm:$0xff] }
 0x1df   :  { %5018 = vmatpush1.bf16.msra.mxu1 %v5017_v54  ;;  %4828 = vmatprep.subr.bf16.mxu0 %v4827_v55  ;;  %v5037_v54 = vpack.c.bf16 %v934_v48, %v918_v46  ;;  %v4847_v55 = vpack.c.bf16 %v965_v50, %v949_v49  ;;  %v1092_v45 = vld [vmem:[%s10791_s1 + $0x20c0] sm:$0xff]  ;;  %v1078_v46 = vld [vmem:[%s10791_s1 + $0x2050] sm:$0xff]  ;;  %v1109_v49 = vld [vmem:[%s10791_s1 + $0x2148] sm:$0xff] }
 0x1e0   :  { %5020 = vmatprep.subr.bf16.mxu1 %v5019_v59  ;;  %v5039_v59 = vpack.c.bf16 %v967_v52, %v951_v51  ;;  %v1094_v48 = vld [vmem:[%s10791_s1 + $0x20d0] sm:$0xff]  ;;  %v1125_v50 = vld [vmem:[%s10791_s1 + $0x21c8] sm:$0xff]  ;;  %v1111_v51 = vld [vmem:[%s10791_s1 + $0x2158] sm:$0xff] }
 0x1e1   :  { %v1127_v52 = vld [vmem:[%s10791_s1 + $0x21d8] sm:$0xff] }
 0x1e2   :  { %4830 = vmatpush1.bf16.msra.mxu0 %v4829_v2  ;;  %v4849_v2 = vpack.c.bf16 %v964_v57, %v948_v56  ;;  %v1108_v56 = vld [vmem:[%s10791_s1 + $0x2140] sm:$0xff] }
 0x1e3   :  { %5022 = vmatpush1.bf16.msra.mxu1 %v5021_v3  ;;  %4832 = vmatprep.subr.bf16.mxu0 %v4831_v4  ;;  %v5041_v3 = vpack.c.bf16 %v966_v60, %v950_v58  ;;  %v4851_v4 = vpack.c.bf16 %v997_v63, %v981_v61  ;;  %v1124_v57 = vld [vmem:[%s10791_s1 + $0x21c0] sm:$0xff]  ;;  %v1110_v58 = vld [vmem:[%s10791_s1 + $0x2150] sm:$0xff]  ;;  %v1141_v61 = vld [vmem:[%s10791_s1 + $0x2248] sm:$0xff] }
 0x1e4   :  { %5024 = vmatprep.subr.bf16.mxu1 %v5023_v8  ;;  %v5043_v8 = vpack.c.bf16 %v999_v1, %v983_v0  ;;  %v1126_v60 = vld [vmem:[%s10791_s1 + $0x21d0] sm:$0xff]  ;;  %v1157_v63 = vld [vmem:[%s10791_s1 + $0x22c8] sm:$0xff]  ;;  %v1143_v1 = vld [vmem:[%s10791_s1 + $0x2258] sm:$0xff] }
 0x1e5   :  { %v5712_v0 = vld [vmem:[%s10792_s0 + $0x10] sm:$0xff] }
 0x1e6   :  { %4834 = vmatpush1.bf16.msra.mxu0 %v4833_v14  ;;  %v4853_v14 = vpack.c.bf16 %v996_v6, %v980_v5  ;;  %v4871_v5 = vpack.c.bf16 %v1157_v63, %v1141_v61  ;;  %v1140_v6 = vld [vmem:[%s10791_s1 + $0x2240] sm:$0xff] }
 0x1e7   :  { %5026 = vmatpush1.bf16.msra.mxu1 %v5025_v15  ;;  %4836 = vmatprep.subr.bf16.mxu0 %v4835_v17  ;;  %v5045_v15 = vpack.c.bf16 %v998_v9, %v982_v7  ;;  %v4855_v17 = vpack.c.bf16 %v1029_v11, %v1013_v10  ;;  %v1156_v7 = vld [vmem:[%s10791_s1 + $0x22c0] sm:$0xff]  ;;  %v1158_v10 = vld [vmem:[%s10791_s1 + $0x22d0] sm:$0xff]  ;;  %v1173_v11 = vld [vmem:[%s10791_s1 + $0x2348] sm:$0xff] }
 0x1e8   :  { %5028 = vmatprep.subr.bf16.mxu1 %v5027_v21  ;;  %v5047_v21 = vpack.c.bf16 %v1031_v13, %v1015_v12  ;;  %v1189_v12 = vld [vmem:[%s10791_s1 + $0x23c8] sm:$0xff] }
 0x1e9   :  { %v5713_v13 = vld [vmem:[%s10792_s0 + $0x48] sm:$0xff] }
 0x1ea   :  { %4838 = vmatpush1.bf16.msra.mxu0 %v4837_v28  ;;  %v4857_v28 = vpack.c.bf16 %v1028_v19, %v1012_v18  ;;  %v4873_v18 = vpack.c.bf16 %v1156_v7, %v1140_v6  ;;  %v1301_v6 = vld [vmem:[%s10791_s1 + $0x2748] sm:$0xff] }
 0x1eb   :  { %5030 = vmatpush1.bf16.msra.mxu1 %v5029_v29  ;;  %4840 = vmatprep.subr.bf16.mxu0 %v4839_v30  ;;  %v5049_v29 = vpack.c.bf16 %v1030_v22, %v1014_v20  ;;  %v4859_v30 = vpack.c.bf16 %v1061_v25, %v1045_v23  ;;  %v4875_v20 = vpack.c.bf16 %v1189_v12, %v1173_v11  ;;  %v1188_v22 = vld [vmem:[%s10791_s1 + $0x23c0] sm:$0xff]  ;;  %v1174_v23 = vld [vmem:[%s10791_s1 + $0x2350] sm:$0xff]  ;;  %v1317_v7 = vld [vmem:[%s10791_s1 + $0x27c8] sm:$0xff] }
 0x1ec   :  { %5032 = vmatprep.subr.bf16.mxu1 %v5031_v34  ;;  %v5051_v34 = vpack.c.bf16 %v1063_v27, %v1047_v26  ;;  %v1190_v26 = vld [vmem:[%s10791_s1 + $0x23d0] sm:$0xff]  ;;  %v1205_v27 = vld [vmem:[%s10791_s1 + $0x2448] sm:$0xff]  ;;  %v4891_v12 = vpack.c.bf16 %v1317_v7, %v1301_v6 }
 0x1ed   :  { %v1461_v6 = vld [vmem:[%s10791_s1 + $0x2c48] sm:$0xff] }
 0x1ee   :  { %4842 = vmatpush1.bf16.msra.mxu0 %v4841_v40  ;;  %v4861_v40 = vpack.c.bf16 %v1060_v32, %v1044_v31  ;;  %v1223_v31 = vld [vmem:[%s10791_s1 + $0x24d8] sm:$0xff]  ;;  %v5716_v32 = vld [vmem:[%s10792_s0 + $0x70] sm:$0xff]  ;;  %v1477_v7 = vld [vmem:[%s10791_s1 + $0x2cc8] sm:$0xff] }
 0x1ef   :  { %5034 = vmatpush1.bf16.msra.mxu1 %v5033_v41  ;;  %4844 = vmatprep.subr.bf16.mxu0 %v4843_v42  ;;  %v5053_v41 = vpack.c.bf16 %v1062_v35, %v1046_v33  ;;  %v4863_v42 = vpack.c.bf16 %v1093_v37, %v1077_v36  ;;  %v1204_v36 = vld [vmem:[%s10791_s1 + $0x2440] sm:$0xff] }
 0x1f0   :  { %5036 = vmatprep.subr.bf16.mxu1 %v5035_v47  ;;  %v5055_v47 = vpack.c.bf16 %v1095_v39, %v1079_v38  ;;  %v1220_v37 = vld [vmem:[%s10791_s1 + $0x24c0] sm:$0xff]  ;;  %v1206_v38 = vld [vmem:[%s10791_s1 + $0x2450] sm:$0xff] }
 0x1f2   :  { %4846 = vmatpush1.bf16.msra.mxu0 %v4845_v53  ;;  %v4865_v53 = vpack.c.bf16 %v1092_v45, %v1076_v44  ;;  %v5717_v44 = vld [vmem:[%s10792_s0 + $0xa8] sm:$0xff]  ;;  %v1239_v45 = vld [vmem:[%s10791_s1 + $0x2558] sm:$0xff] }
 0x1f3   :  { %5038 = vmatpush1.bf16.msra.mxu1 %v5037_v54  ;;  %4848 = vmatprep.subr.bf16.mxu0 %v4847_v55  ;;  %v5057_v54 = vpack.c.bf16 %v1094_v48, %v1078_v46  ;;  %v4867_v55 = vpack.c.bf16 %v1125_v50, %v1109_v49  ;;  %v1255_v46 = vld [vmem:[%s10791_s1 + $0x25d8] sm:$0xff]  ;;  %v4881_v48 = vpack.c.bf16 %v1220_v37, %v1204_v36 }
 0x1f4   :  { %5040 = vmatprep.subr.bf16.mxu1 %v5039_v59  ;;  %v5059_v59 = vpack.c.bf16 %v1127_v52, %v1111_v51  ;;  %v1236_v51 = vld [vmem:[%s10791_s1 + $0x2540] sm:$0xff] }
 0x1f5   :  { %v1252_v52 = vld [vmem:[%s10791_s1 + $0x25c0] sm:$0xff] }
 0x1f6   :  { %4850 = vmatpush1.bf16.msra.mxu0 %v4849_v2  ;;  %v1159_v2 = vld [vmem:[%s10791_s1 + $0x22d8] sm:$0xff]  ;;  %v4885_v61 = vpack.c.bf16 %v1252_v52, %v1236_v51  ;;  %v1396_v52 = vld [vmem:[%s10791_s1 + $0x2a40] sm:$0xff] }
 0x1f7   :  { %5042 = vmatpush1.bf16.msra.mxu1 %v5041_v3  ;;  %4852 = vmatprep.subr.bf16.mxu0 %v4851_v4  ;;  %v4869_v3 = vpack.c.bf16 %v1124_v57, %v1108_v56  ;;  %v5061_v4 = vpack.c.bf16 %v1126_v60, %v1110_v58  ;;  %v5063_v9 = vpack.c.bf16 %v1159_v2, %v1143_v1  ;;  %v1269_v56 = vld [vmem:[%s10791_s1 + $0x2648] sm:$0xff]  ;;  %v1287_v60 = vld [vmem:[%s10791_s1 + $0x26d8] sm:$0xff]  ;;  %v1268_v1 = vld [vmem:[%s10791_s1 + $0x2640] sm:$0xff] }
 0x1f8   :  { %5044 = vmatprep.subr.bf16.mxu1 %v5043_v8  ;;  %v1142_v8 = vld [vmem:[%s10791_s1 + $0x2250] sm:$0xff]  ;;  %v1285_v57 = vld [vmem:[%s10791_s1 + $0x26c8] sm:$0xff]  ;;  %v1284_v2 = vld [vmem:[%s10791_s1 + $0x26c0] sm:$0xff] }
 0x1f9   :  { %v5065_v19 = vpack.c.bf16 %v1158_v10, %v1142_v8  ;;  %v5719_v58 = vld [vmem:[%s10792_s0 + $0x28] sm:$0xff]  ;;  %v1303_v8 = vld [vmem:[%s10791_s1 + $0x2758] sm:$0xff]  ;;  %v4889_v10 = vpack.c.bf16 %v1284_v2, %v1268_v1  ;;  %v1428_v1 = vld [vmem:[%s10791_s1 + $0x2b40] sm:$0xff] }
 0x1fa   :  { %4854 = vmatpush1.bf16.msra.mxu0 %v4853_v14  ;;  %v1175_v14 = vld [vmem:[%s10791_s1 + $0x2358] sm:$0xff]  ;;  %v1444_v2 = vld [vmem:[%s10791_s1 + $0x2bc0] sm:$0xff] }
 0x1fb   :  { %5046 = vmatpush1.bf16.msra.mxu1 %v5045_v15  ;;  %4856 = vmatprep.subr.bf16.mxu0 %v4855_v17  ;;  %v1191_v15 = vld [vmem:[%s10791_s1 + $0x23d8] sm:$0xff]  ;;  %v5714_v17 = vld [vmem:[%s10792_s0 + $0x40] sm:$0xff] }
 0x1fc   :  { %5048 = vmatprep.subr.bf16.mxu1 %v5047_v21  ;;  %v1172_v21 = vld [vmem:[%s10791_s1 + $0x2340] sm:$0xff]  ;;  %v5067_v25 = vpack.c.bf16 %v1191_v15, %v1175_v14  ;;  %v1302_v15 = vld [vmem:[%s10791_s1 + $0x2750] sm:$0xff] }
 0x1fd   :  { %v4877_v33 = vpack.c.bf16 %v1188_v22, %v1172_v21  ;;  %v1316_v14 = vld [vmem:[%s10791_s1 + $0x27c0] sm:$0xff]  ;;  %v1335_v21 = vld [vmem:[%s10791_s1 + $0x2858] sm:$0xff] }
 0x1fe   :  { %4858 = vmatpush1.bf16.msra.mxu0 %v4857_v28  ;;  %v1221_v28 = vld [vmem:[%s10791_s1 + $0x24c8] sm:$0xff]  ;;  %v1351_v22 = vld [vmem:[%s10791_s1 + $0x28d8] sm:$0xff] }
 0x1ff   :  { %5050 = vmatpush1.bf16.msra.mxu1 %v5049_v29  ;;  %4860 = vmatprep.subr.bf16.mxu0 %v4859_v30  ;;  %v5715_v29 = vld [vmem:[%s10792_s0 + $0x78] sm:$0xff]  ;;  %v4879_v35 = vpack.c.bf16 %v1221_v28, %v1205_v27  ;;  %v1332_v27 = vld [vmem:[%s10791_s1 + $0x2840] sm:$0xff] }
 0x200   :  { %5052 = vmatprep.subr.bf16.mxu1 %v5051_v34  ;;  %v1207_v30 = vld [vmem:[%s10791_s1 + $0x2458] sm:$0xff]  ;;  %v5069_v34 = vpack.c.bf16 %v1190_v26, %v1174_v23  ;;  %v1348_v28 = vld [vmem:[%s10791_s1 + $0x28c0] sm:$0xff] }
 0x201   :  { %v5071_v39 = vpack.c.bf16 %v1223_v31, %v1207_v30  ;;  %v5087_v30 = vpack.c.bf16 %v1351_v22, %v1335_v21  ;;  %v1350_v31 = vld [vmem:[%s10791_s1 + $0x28d0] sm:$0xff]  ;;  %v4897_v36 = vpack.c.bf16 %v1348_v28, %v1332_v27  ;;  %v1495_v21 = vld [vmem:[%s10791_s1 + $0x2d58] sm:$0xff]  ;;  %v1492_v27 = vld [vmem:[%s10791_s1 + $0x2d40] sm:$0xff] }
 0x202   :  { %4862 = vmatpush1.bf16.msra.mxu0 %v4861_v40  ;;  %v1222_v40 = vld [vmem:[%s10791_s1 + $0x24d0] sm:$0xff]  ;;  %v1511_v22 = vld [vmem:[%s10791_s1 + $0x2dd8] sm:$0xff]  ;;  %v1508_v28 = vld [vmem:[%s10791_s1 + $0x2dc0] sm:$0xff] }
 0x203   :  { %5054 = vmatpush1.bf16.msra.mxu1 %v5053_v41  ;;  %4864 = vmatprep.subr.bf16.mxu0 %v4863_v42  ;;  %v1237_v41 = vld [vmem:[%s10791_s1 + $0x2548] sm:$0xff]  ;;  %v5073_v49 = vpack.c.bf16 %v1222_v40, %v1206_v38  ;;  %v1380_v40 = vld [vmem:[%s10791_s1 + $0x29c0] sm:$0xff] }
 0x204   :  { %5056 = vmatprep.subr.bf16.mxu1 %v5055_v47  ;;  %v1253_v42 = vld [vmem:[%s10791_s1 + $0x25c8] sm:$0xff]  ;;  %v5718_v47 = vld [vmem:[%s10792_s0 + $0xa0] sm:$0xff] }
 0x205   :  { %2802 = vmatmul.mubr.f32.vlgmr.msra.gmra.mrb[16].mxu0 %v5712_v0  ;;  %v4883_v50 = vpack.c.bf16 %v1253_v42, %v1237_v41  ;;  %v1366_v41 = vld [vmem:[%s10791_s1 + $0x2950] sm:$0xff] }
 0x206   :  { %4866 = vmatpush1.bf16.msra.mxu0 %v4865_v53  ;;  %3069 = vmatmul.mubr.f32.vlgmr.msra.gmra.mrb[16].mxu1 %v5712_v0  ;;  %v1238_v53 = vld [vmem:[%s10791_s1 + $0x2550] sm:$0xff]  ;;  %v4887_v0 = vpack.c.bf16 %v1285_v57, %v1269_v56  ;;  %v1429_v57 = vld [vmem:[%s10791_s1 + $0x2b48] sm:$0xff] }
 0x207   :  { %5058 = vmatpush1.bf16.msra.mxu1 %v5057_v54  ;;  %4868 = vmatprep.subr.bf16.mxu0 %v4867_v55  ;;  %v5075_v54 = vpack.c.bf16 %v1255_v46, %v1239_v45  ;;  %v1254_v55 = vld [vmem:[%s10791_s1 + $0x25d0] sm:$0xff]  ;;  %v1397_v45 = vld [vmem:[%s10791_s1 + $0x2a48] sm:$0xff] }
 0x208   :  { %5060 = vmatprep.subr.bf16.mxu1 %v5059_v59  ;;  %2807 = vmatprep.mubr.f32.mxu0 %v5713_v13  ;;  %v1271_v59 = vld [vmem:[%s10791_s1 + $0x2658] sm:$0xff]  ;;  %v5077_v63 = vpack.c.bf16 %v1254_v55, %v1238_v53  ;;  %v1413_v46 = vld [vmem:[%s10791_s1 + $0x2ac8] sm:$0xff]  ;;  %v1412_v53 = vld [vmem:[%s10791_s1 + $0x2ac0] sm:$0xff] }
 0x209   :  { %3074 = vmatprep.mubr.f32.mxu1 %v5713_v13  ;;  %2808 = vmatmul.mubr.f32.gmra.mrb[18].mxu0 %v5714_v17  ;;  %v1300_v13 = vld [vmem:[%s10791_s1 + $0x2740] sm:$0xff]  ;;  %v4903_v51 = vpack.c.bf16 %v1413_v46, %v1397_v45  ;;  %v1414_v56 = vld [vmem:[%s10791_s1 + $0x2ad0] sm:$0xff]  ;;  %v1557_v45 = vld [vmem:[%s10791_s1 + $0x2f48] sm:$0xff] }
 0x20a   :  { %4870 = vmatpush1.bf16.msra.mxu0 %v4869_v3  ;;  %3075 = vmatmul.mubr.f32.gmra.mrb[18].mxu1 %v5714_v17  ;;  %v1270_v3 = vld [vmem:[%s10791_s1 + $0x2650] sm:$0xff]  ;;  %v4893_v23 = vpack.c.bf16 %v1316_v14, %v1300_v13  ;;  %v1460_v13 = vld [vmem:[%s10791_s1 + $0x2c40] sm:$0xff]  ;;  %v1573_v46 = vld [vmem:[%s10791_s1 + $0x2fc8] sm:$0xff] }
 0x20b   :  { %5062 = vmatpush1.bf16.msra.mxu1 %v5061_v4  ;;  %4872 = vmatprep.subr.bf16.mxu0 %v4871_v5  ;;  %v5079_v4 = vpack.c.bf16 %v1287_v60, %v1271_v59  ;;  %v1286_v5 = vld [vmem:[%s10791_s1 + $0x26d0] sm:$0xff]  ;;  %v1431_v59 = vld [vmem:[%s10791_s1 + $0x2b58] sm:$0xff]  ;;  %v1476_v14 = vld [vmem:[%s10791_s1 + $0x2cc0] sm:$0xff] }
 0x20c   :  { %5064 = vmatprep.subr.bf16.mxu1 %v5063_v9  ;;  %2813 = vmatprep.mubr.f32.mxu0 %v5715_v29  ;;  %v1319_v9 = vld [vmem:[%s10791_s1 + $0x27d8] sm:$0xff]  ;;  %v5081_v11 = vpack.c.bf16 %v1286_v5, %v1270_v3  ;;  %v1430_v3 = vld [vmem:[%s10791_s1 + $0x2b50] sm:$0xff] }
 0x20d   :  { %3080 = vmatprep.mubr.f32.mxu1 %v5715_v29  ;;  %2814 = vmatmul.mubr.f32.gmra.mrb[20].mxu0 %v5716_v32  ;;  %v5083_v17 = vpack.c.bf16 %v1319_v9, %v1303_v8  ;;  %v1334_v29 = vld [vmem:[%s10791_s1 + $0x2850] sm:$0xff]  ;;  %v1447_v60 = vld [vmem:[%s10791_s1 + $0x2bd8] sm:$0xff] }
 0x20e   :  { %4874 = vmatpush1.bf16.msra.mxu0 %v4873_v18  ;;  %3081 = vmatmul.mubr.f32.gmra.mrb[20].mxu1 %v5716_v32  ;;  %v1318_v18 = vld [vmem:[%s10791_s1 + $0x27d0] sm:$0xff]  ;;  %v1365_v32 = vld [vmem:[%s10791_s1 + $0x2948] sm:$0xff]  ;;  %v5089_v37 = vpack.c.bf16 %v1350_v31, %v1334_v29  ;;  %v1463_v8 = vld [vmem:[%s10791_s1 + $0x2c58] sm:$0xff] }
 0x20f   :  { %5066 = vmatpush1.bf16.msra.mxu1 %v5065_v19  ;;  %4876 = vmatprep.subr.bf16.mxu0 %v4875_v20  ;;  %v1333_v19 = vld [vmem:[%s10791_s1 + $0x2848] sm:$0xff]  ;;  %v1446_v5 = vld [vmem:[%s10791_s1 + $0x2bd0] sm:$0xff]  ;;  %v1479_v9 = vld [vmem:[%s10791_s1 + $0x2cd8] sm:$0xff] }
 0x210   :  { %5068 = vmatprep.subr.bf16.mxu1 %v5067_v25  ;;  %2819 = vmatprep.mubr.f32.mxu0 %v5717_v44  ;;  %v1349_v20 = vld [vmem:[%s10791_s1 + $0x28c8] sm:$0xff]  ;;  %v5085_v25 = vpack.c.bf16 %v1318_v18, %v1302_v15  ;;  %v1462_v15 = vld [vmem:[%s10791_s1 + $0x2c50] sm:$0xff] }
 0x211   :  { %3086 = vmatprep.mubr.f32.mxu1 %v5717_v44  ;;  %2820 = vmatmul.mubr.f32.gmra.mrb[22].mxu0 %v5718_v47  ;;  %v4895_v26 = vpack.c.bf16 %v1349_v20, %v1333_v19  ;;  %v1382_v44 = vld [vmem:[%s10791_s1 + $0x29d0] sm:$0xff]  ;;  %v1493_v19 = vld [vmem:[%s10791_s1 + $0x2d48] sm:$0xff] }
 0x212   :  { %4878 = vmatpush1.bf16.msra.mxu0 %v4877_v33  ;;  %3087 = vmatmul.mubr.f32.gmra.mrb[22].mxu1 %v5718_v47  ;;  %v1381_v33 = vld [vmem:[%s10791_s1 + $0x29c8] sm:$0xff]  ;;  %v1399_v47 = vld [vmem:[%s10791_s1 + $0x2a58] sm:$0xff]  ;;  %v1478_v18 = vld [vmem:[%s10791_s1 + $0x2cd0] sm:$0xff] }
 0x213   :  { %5070 = vmatpush1.bf16.msra.mxu1 %v5069_v34  ;;  %4880 = vmatprep.subr.bf16.mxu0 %v4879_v35  ;;  %v1367_v34 = vld [vmem:[%s10791_s1 + $0x2958] sm:$0xff]  ;;  %v4899_v38 = vpack.c.bf16 %v1381_v33, %v1365_v32  ;;  %v1509_v20 = vld [vmem:[%s10791_s1 + $0x2dc8] sm:$0xff]  ;;  %v1494_v29 = vld [vmem:[%s10791_s1 + $0x2d50] sm:$0xff] }
 0x214   :  { %5072 = vmatprep.subr.bf16.mxu1 %v5071_v39  ;;  %2890 = vmatprep.mubr.f32.mxu0 %v5719_v58  ;;  %v1383_v35 = vld [vmem:[%s10791_s1 + $0x29d8] sm:$0xff]  ;;  %v1364_v39 = vld [vmem:[%s10791_s1 + $0x2940] sm:$0xff]  ;;  %v1510_v31 = vld [vmem:[%s10791_s1 + $0x2dd0] sm:$0xff] }
 0x215   :  { %3157 = vmatprep.mubr.f32.mxu1 %v5719_v58  ;;  %v5091_v42 = vpack.c.bf16 %v1383_v35, %v1367_v34  ;;  %v1445_v58 = vld [vmem:[%s10791_s1 + $0x2bc8] sm:$0xff]  ;;  %v1527_v34 = vld [vmem:[%s10791_s1 + $0x2e58] sm:$0xff] }
 0x216   :  { %4882 = vmatpush1.bf16.msra.mxu0 %v4881_v48  ;;  %v1415_v48 = vld [vmem:[%s10791_s1 + $0x2ad8] sm:$0xff]  ;;  %v1525_v32 = vld [vmem:[%s10791_s1 + $0x2e48] sm:$0xff] }
 0x217   :  { %5074 = vmatpush1.bf16.msra.mxu1 %v5073_v49  ;;  %4884 = vmatprep.subr.bf16.mxu0 %v4883_v50  ;;  %v4901_v49 = vpack.c.bf16 %v1380_v40, %v1364_v39  ;;  %v5093_v50 = vpack.c.bf16 %v1382_v44, %v1366_v41  ;;  %v5095_v55 = vpack.c.bf16 %v1415_v48, %v1399_v47  ;;  %v1541_v33 = vld [vmem:[%s10791_s1 + $0x2ec8] sm:$0xff]  ;;  %v1543_v35 = vld [vmem:[%s10791_s1 + $0x2ed8] sm:$0xff]  ;;  %v1524_v39 = vld [vmem:[%s10791_s1 + $0x2e40] sm:$0xff] }
 0x218   :  { %5076 = vmatprep.subr.bf16.mxu1 %v5075_v54  ;;  %v1398_v54 = vld [vmem:[%s10791_s1 + $0x2a50] sm:$0xff]  ;;  %v1540_v40 = vld [vmem:[%s10791_s1 + $0x2ec0] sm:$0xff]  ;;  %v1559_v47 = vld [vmem:[%s10791_s1 + $0x2f58] sm:$0xff] }
 0x219   :  { %v1526_v41 = vld [vmem:[%s10791_s1 + $0x2e50] sm:$0xff]  ;;  %v1575_v48 = vld [vmem:[%s10791_s1 + $0x2fd8] sm:$0xff] }
 0x21a   :  { %4886 = vmatpush1.bf16.msra.mxu0 %v4885_v61  ;;  %v4905_v61 = vpack.c.bf16 %v1412_v53, %v1396_v52  ;;  %v1542_v44 = vld [vmem:[%s10791_s1 + $0x2ed0] sm:$0xff]  ;;  %v1556_v52 = vld [vmem:[%s10791_s1 + $0x2f40] sm:$0xff] }
 0x21b   :  { %5078 = vmatpush1.bf16.msra.mxu1 %v5077_v63  ;;  %4888 = vmatprep.subr.bf16.mxu0 %v4887_v0  ;;  %v5097_v63 = vpack.c.bf16 %v1414_v56, %v1398_v54  ;;  %v4907_v0 = vpack.c.bf16 %v1445_v58, %v1429_v57  ;;  %v1572_v53 = vld [vmem:[%s10791_s1 + $0x2fc0] sm:$0xff]  ;;  %v1558_v54 = vld [vmem:[%s10791_s1 + $0x2f50] sm:$0xff]  ;;  %v57_v57 = vld [vmem:[%s10791_s1 + $0x68] sm:$0xff] }
 0x21c   :  { %5080 = vmatprep.subr.bf16.mxu1 %v5079_v4  ;;  %v5099_v4 = vpack.c.bf16 %v1447_v60, %v1431_v59  ;;  %v1574_v56 = vld [vmem:[%s10791_s1 + $0x2fd0] sm:$0xff]  ;;  %v73_v58 = vld [vmem:[%s10791_s1 + $0xe8] sm:$0xff]  ;;  %v59_v59 = vld [vmem:[%s10791_s1 + $0x78] sm:$0xff] }
 0x21d   :  { %v75_v60 = vld [vmem:[%s10791_s1 + $0xf8] sm:$0xff] }
 0x21e   :  { %4890 = vmatpush1.bf16.msra.mxu0 %v4889_v10  ;;  %v4909_v10 = vpack.c.bf16 %v1444_v2, %v1428_v1  ;;  %v56_v1 = vld [vmem:[%s10791_s1 + $0x60] sm:$0xff] }
 0x21f   :  { %5082 = vmatpush1.bf16.msra.mxu1 %v5081_v11  ;;  %4892 = vmatprep.subr.bf16.mxu0 %v4891_v12  ;;  %v5101_v11 = vpack.c.bf16 %v1446_v5, %v1430_v3  ;;  %v4911_v12 = vpack.c.bf16 %v1477_v7, %v1461_v6  ;;  %v72_v2 = vld [vmem:[%s10791_s1 + $0xe0] sm:$0xff]  ;;  %v5311_v3 = vpack.c.bf16 %v75_v60, %v59_v59  ;;  %v74_v5 = vld [vmem:[%s10791_s1 + $0xf0] sm:$0xff]  ;;  %v89_v6 = vld [vmem:[%s10791_s1 + $0x168] sm:$0xff] }
 0x220   :  { %5084 = vmatprep.subr.bf16.mxu1 %v5083_v17  ;;  %v5103_v17 = vpack.c.bf16 %v1479_v9, %v1463_v8  ;;  %v105_v7 = vld [vmem:[%s10791_s1 + $0x1e8] sm:$0xff]  ;;  %v5121_v8 = vpack.c.bf16 %v72_v2, %v56_v1  ;;  %v91_v9 = vld [vmem:[%s10791_s1 + $0x178] sm:$0xff]  ;;  %v200_v59 = vld [vmem:[%s10791_s1 + $0x4e0] sm:$0xff] }
 0x221   :  { %v186_v60 = vld [vmem:[%s10791_s1 + $0x470] sm:$0xff]  ;;  %v233_v1 = vld [vmem:[%s10791_s1 + $0x5e8] sm:$0xff] }
 0x222   :  { %4894 = vmatpush1.bf16.msra.mxu0 %v4893_v23  ;;  %v4913_v23 = vpack.c.bf16 %v1476_v14, %v1460_v13  ;;  %v104_v13 = vld [vmem:[%s10791_s1 + $0x1e0] sm:$0xff]  ;;  %v5123_v14 = vpack.c.bf16 %v105_v7, %v89_v6  ;;  %v5726_v2 = vld [vmem:[%s10792_s0 + $0xb0] sm:$0xff] }
 0x223   :  { %5086 = vmatpush1.bf16.msra.mxu1 %v5085_v25  ;;  %4896 = vmatprep.subr.bf16.mxu0 %v4895_v26  ;;  %v5105_v25 = vpack.c.bf16 %v1478_v18, %v1462_v15  ;;  %v4915_v26 = vpack.c.bf16 %v1509_v20, %v1493_v19  ;;  %v90_v15 = vld [vmem:[%s10791_s1 + $0x170] sm:$0xff]  ;;  %v5720_v18 = vld [vmem:[%s10792_s0 + $0x20] sm:$0xff]  ;;  %v121_v20 = vld [vmem:[%s10791_s1 + $0x268] sm:$0xff] }
 0x224   :  { %5088 = vmatprep.subr.bf16.mxu1 %v5087_v30  ;;  %v5107_v30 = vpack.c.bf16 %v1511_v22, %v1495_v21  ;;  %v137_v21 = vld [vmem:[%s10791_s1 + $0x2e8] sm:$0xff] }
 0x226   :  { %4898 = vmatpush1.bf16.msra.mxu0 %v4897_v36  ;;  %v4917_v36 = vpack.c.bf16 %v1508_v28, %v1492_v27  ;;  %v120_v28 = vld [vmem:[%s10791_s1 + $0x260] sm:$0xff] }
 0x227   :  { %5090 = vmatpush1.bf16.msra.mxu1 %v5089_v37  ;;  %4900 = vmatprep.subr.bf16.mxu0 %v4899_v38  ;;  %v5109_v37 = vpack.c.bf16 %v1510_v31, %v1494_v29  ;;  %v4919_v38 = vpack.c.bf16 %v1541_v33, %v1525_v32  ;;  %v136_v29 = vld [vmem:[%s10791_s1 + $0x2e0] sm:$0xff]  ;;  %v122_v31 = vld [vmem:[%s10791_s1 + $0x270] sm:$0xff] }
 0x228   :  { %5092 = vmatprep.subr.bf16.mxu1 %v5091_v42  ;;  %v5111_v42 = vpack.c.bf16 %v1543_v35, %v1527_v34  ;;  %v138_v32 = vld [vmem:[%s10791_s1 + $0x2f0] sm:$0xff]  ;;  %v153_v35 = vld [vmem:[%s10791_s1 + $0x368] sm:$0xff] }
 0x229   :  { %v5722_v33 = vld [vmem:[%s10792_s0 + $0x50] sm:$0xff] }
 0x22a   :  { %4902 = vmatpush1.bf16.msra.mxu0 %v4901_v49  ;;  %v4921_v49 = vpack.c.bf16 %v1540_v40, %v1524_v39  ;;  %v171_v39 = vld [vmem:[%s10791_s1 + $0x3f8] sm:$0xff]  ;;  %v5723_v40 = vld [vmem:[%s10792_s0 + $0x88] sm:$0xff] }
 0x22b   :  { %5094 = vmatpush1.bf16.msra.mxu1 %v5093_v50  ;;  %4904 = vmatprep.subr.bf16.mxu0 %v4903_v51  ;;  %v5113_v50 = vpack.c.bf16 %v1542_v44, %v1526_v41  ;;  %v4923_v51 = vpack.c.bf16 %v1573_v46, %v1557_v45  ;;  %v5321_v41 = vpack.c.bf16 %v138_v32, %v122_v31  ;;  %v168_v44 = vld [vmem:[%s10791_s1 + $0x3e0] sm:$0xff]  ;;  %v154_v45 = vld [vmem:[%s10791_s1 + $0x370] sm:$0xff] }
 0x22c   :  { %5096 = vmatprep.subr.bf16.mxu1 %v5095_v55  ;;  %v5115_v55 = vpack.c.bf16 %v1575_v48, %v1559_v47  ;;  %v170_v47 = vld [vmem:[%s10791_s1 + $0x3f0] sm:$0xff]  ;;  %v185_v48 = vld [vmem:[%s10791_s1 + $0x468] sm:$0xff] }
 0x22e   :  { %4906 = vmatpush1.bf16.msra.mxu0 %v4905_v61  ;;  %v4925_v61 = vpack.c.bf16 %v1572_v53, %v1556_v52  ;;  %v187_v52 = vld [vmem:[%s10791_s1 + $0x478] sm:$0xff] }
 0x22f   :  { %5098 = vmatpush1.bf16.msra.mxu1 %v5097_v63  ;;  %4908 = vmatprep.subr.bf16.mxu0 %v4907_v0  ;;  %v5117_v63 = vpack.c.bf16 %v1574_v56, %v1558_v54  ;;  %v5119_v0 = vpack.c.bf16 %v73_v58, %v57_v57  ;;  %v203_v53 = vld [vmem:[%s10791_s1 + $0x4f8] sm:$0xff]  ;;  %v5325_v56 = vpack.c.bf16 %v170_v47, %v154_v45  ;;  %v184_v58 = vld [vmem:[%s10791_s1 + $0x460] sm:$0xff]  ;;  %v298_v45 = vld [vmem:[%s10791_s1 + $0x7f0] sm:$0xff] }
 0x230   :  { %5100 = vmatprep.subr.bf16.mxu1 %v5099_v4  ;;  %v58_v4 = vld [vmem:[%s10791_s1 + $0x70] sm:$0xff] }
 0x232   :  { %4910 = vmatpush1.bf16.msra.mxu0 %v4909_v10  ;;  %v107_v10 = vld [vmem:[%s10791_s1 + $0x1f8] sm:$0xff] }
 0x233   :  { %5102 = vmatpush1.bf16.msra.mxu1 %v5101_v11  ;;  %4912 = vmatprep.subr.bf16.mxu0 %v4911_v12  ;;  %v5313_v11 = vpack.c.bf16 %v74_v5, %v58_v4  ;;  %v88_v12 = vld [vmem:[%s10791_s1 + $0x160] sm:$0xff]  ;;  %v5315_v19 = vpack.c.bf16 %v107_v10, %v91_v9  ;;  %v235_v4 = vld [vmem:[%s10791_s1 + $0x5f8] sm:$0xff]  ;;  %v5137_v5 = vpack.c.bf16 %v200_v59, %v184_v58  ;;  %v218_v10 = vld [vmem:[%s10791_s1 + $0x570] sm:$0xff] }
 0x234   :  { %5104 = vmatprep.subr.bf16.mxu1 %v5103_v17  ;;  %v106_v17 = vld [vmem:[%s10791_s1 + $0x1f0] sm:$0xff]  ;;  %v5125_v22 = vpack.c.bf16 %v104_v13, %v88_v12  ;;  %v232_v9 = vld [vmem:[%s10791_s1 + $0x5e0] sm:$0xff]  ;;  %v249_v13 = vld [vmem:[%s10791_s1 + $0x668] sm:$0xff] }
 0x235   :  { %v5317_v27 = vpack.c.bf16 %v106_v17, %v90_v15  ;;  %v234_v12 = vld [vmem:[%s10791_s1 + $0x5f0] sm:$0xff]  ;;  %v5727_v15 = vld [vmem:[%s10792_s0 + $0x8] sm:$0xff]  ;;  %v251_v17 = vld [vmem:[%s10791_s1 + $0x678] sm:$0xff] }
 0x236   :  { %4914 = vmatpush1.bf16.msra.mxu0 %v4913_v23  ;;  %v123_v23 = vld [vmem:[%s10791_s1 + $0x278] sm:$0xff]  ;;  %v312_v59 = vld [vmem:[%s10791_s1 + $0x860] sm:$0xff] }
 0x237   :  { %5106 = vmatpush1.bf16.msra.mxu1 %v5105_v25  ;;  %4916 = vmatprep.subr.bf16.mxu0 %v4915_v26  ;;  %v139_v25 = vld [vmem:[%s10791_s1 + $0x2f8] sm:$0xff] }
 0x238   :  { %5108 = vmatprep.subr.bf16.mxu1 %v5107_v30  ;;  %v5721_v26 = vld [vmem:[%s10792_s0 + $0x58] sm:$0xff]  ;;  %v5127_v30 = vpack.c.bf16 %v137_v21, %v121_v20  ;;  %v5319_v34 = vpack.c.bf16 %v139_v25, %v123_v23  ;;  %v5333_v20 = vpack.c.bf16 %v234_v12, %v218_v10  ;;  %v264_v23 = vld [vmem:[%s10791_s1 + $0x6e0] sm:$0xff]  ;;  %v250_v25 = vld [vmem:[%s10791_s1 + $0x670] sm:$0xff] }
 0x239   :  { %v347_v10 = vld [vmem:[%s10791_s1 + $0x978] sm:$0xff] }
 0x23a   :  { %4918 = vmatpush1.bf16.msra.mxu0 %v4917_v36  ;;  %v169_v36 = vld [vmem:[%s10791_s1 + $0x3e8] sm:$0xff] }
 0x23b   :  { %5110 = vmatpush1.bf16.msra.mxu1 %v5109_v37  ;;  %4920 = vmatprep.subr.bf16.mxu0 %v4919_v38  ;;  %v5129_v37 = vpack.c.bf16 %v136_v29, %v120_v28  ;;  %v155_v38 = vld [vmem:[%s10791_s1 + $0x378] sm:$0xff]  ;;  %v5131_v46 = vpack.c.bf16 %v169_v36, %v153_v35  ;;  %v266_v28 = vld [vmem:[%s10791_s1 + $0x6f0] sm:$0xff]  ;;  %v281_v29 = vld [vmem:[%s10791_s1 + $0x768] sm:$0xff] }
 0x23c   :  { %5112 = vmatprep.subr.bf16.mxu1 %v5111_v42  ;;  %v152_v42 = vld [vmem:[%s10791_s1 + $0x360] sm:$0xff] }
 0x23d   :  { %v5133_v54 = vpack.c.bf16 %v168_v44, %v152_v42  ;;  %v296_v42 = vld [vmem:[%s10791_s1 + $0x7e0] sm:$0xff]  ;;  %v282_v44 = vld [vmem:[%s10791_s1 + $0x770] sm:$0xff] }
 0x23e   :  { %4922 = vmatpush1.bf16.msra.mxu0 %v4921_v49  ;;  %v201_v49 = vld [vmem:[%s10791_s1 + $0x4e8] sm:$0xff]  ;;  %v5341_v58 = vpack.c.bf16 %v298_v45, %v282_v44  ;;  %v378_v44 = vld [vmem:[%s10791_s1 + $0xa70] sm:$0xff] }
 0x23f   :  { %5114 = vmatpush1.bf16.msra.mxu1 %v5113_v50  ;;  %4924 = vmatprep.subr.bf16.mxu0 %v4923_v51  ;;  %v5724_v50 = vld [vmem:[%s10792_s0 + $0x80] sm:$0xff]  ;;  %v5323_v51 = vpack.c.bf16 %v171_v39, %v155_v38  ;;  %v5135_v57 = vpack.c.bf16 %v201_v49, %v185_v48  ;;  %v313_v48 = vld [vmem:[%s10791_s1 + $0x868] sm:$0xff] }
 0x240   :  { %5116 = vmatprep.subr.bf16.mxu1 %v5115_v55  ;;  %v5725_v55 = vld [vmem:[%s10792_s0 + $0xb8] sm:$0xff]  ;;  %v280_v38 = vld [vmem:[%s10791_s1 + $0x760] sm:$0xff]  ;;  %v329_v49 = vld [vmem:[%s10791_s1 + $0x8e8] sm:$0xff] }
 0x242   :  { %4926 = vmatpush1.bf16.msra.mxu0 %v4925_v61  ;;  %v5327_v61 = vpack.c.bf16 %v203_v53, %v187_v52  ;;  %v315_v53 = vld [vmem:[%s10791_s1 + $0x878] sm:$0xff] }
 0x243   :  { %5118 = vmatpush1.bf16.msra.mxu1 %v5117_v63  ;;  %5120 = vmatprep.subr.bf16.mxu0 %v5119_v0  ;;  %v202_v63 = vld [vmem:[%s10791_s1 + $0x4f0] sm:$0xff]  ;;  %v217_v0 = vld [vmem:[%s10791_s1 + $0x568] sm:$0xff] }
 0x244   :  { %5312 = vmatprep.subr.bf16.mxu1 %v5311_v3  ;;  %v219_v3 = vld [vmem:[%s10791_s1 + $0x578] sm:$0xff]  ;;  %v5329_v6 = vpack.c.bf16 %v202_v63, %v186_v60  ;;  %v5139_v7 = vpack.c.bf16 %v233_v1, %v217_v0  ;;  %v5151_v63 = vpack.c.bf16 %v329_v49, %v313_v48  ;;  %v328_v0 = vld [vmem:[%s10791_s1 + $0x8e0] sm:$0xff]  ;;  %v314_v1 = vld [vmem:[%s10791_s1 + $0x870] sm:$0xff] }
 0x245   :  { %2891 = vmatmul.mubr.f32.vlgmr.msra.gmra.mrb[16].mxu0 %v5720_v18  ;;  %v425_v48 = vld [vmem:[%s10791_s1 + $0xbe8] sm:$0xff] }
 0x246   :  { %3158 = vmatmul.mubr.f32.vlgmr.msra.gmra.mrb[16].mxu1 %v5720_v18  ;;  %5122 = vmatpush1.bf16.msra.mxu0 %v5121_v8  ;;  %v216_v8 = vld [vmem:[%s10791_s1 + $0x560] sm:$0xff]  ;;  %v267_v18 = vld [vmem:[%s10791_s1 + $0x6f8] sm:$0xff] }
 0x247   :  { %5314 = vmatpush1.bf16.msra.mxu1 %v5313_v11  ;;  %2896 = vmatprep.mubr.f32.mxu0 %v5721_v26  ;;  %v5331_v11 = vpack.c.bf16 %v235_v4, %v219_v3 }
 0x248   :  { %3163 = vmatprep.mubr.f32.mxu1 %v5721_v26  ;;  %5124 = vmatprep.subr.bf16.mxu0 %v5123_v14  ;;  %v265_v14 = vld [vmem:[%s10791_s1 + $0x6e8] sm:$0xff] }
 0x249   :  { %2897 = vmatmul.mubr.f32.gmra.mrb[18].mxu0 %v5722_v33  ;;  %5316 = vmatprep.subr.bf16.mxu1 %v5315_v19  ;;  %v5141_v19 = vpack.c.bf16 %v232_v9, %v216_v8  ;;  %v5143_v21 = vpack.c.bf16 %v265_v14, %v249_v13  ;;  %v5153_v14 = vpack.c.bf16 %v328_v0, %v312_v59  ;;  %v410_v59 = vld [vmem:[%s10791_s1 + $0xb70] sm:$0xff]  ;;  %v441_v0 = vld [vmem:[%s10791_s1 + $0xc68] sm:$0xff] }
 0x24a   :  { %3164 = vmatmul.mubr.f32.gmra.mrb[18].mxu1 %v5722_v33  ;;  %5126 = vmatpush1.bf16.msra.mxu0 %v5125_v22  ;;  %v248_v22 = vld [vmem:[%s10791_s1 + $0x660] sm:$0xff]  ;;  %v283_v33 = vld [vmem:[%s10791_s1 + $0x778] sm:$0xff] }
 0x24b   :  { %5318 = vmatpush1.bf16.msra.mxu1 %v5317_v27  ;;  %2902 = vmatprep.mubr.f32.mxu0 %v5723_v40  ;;  %v5335_v27 = vpack.c.bf16 %v267_v18, %v251_v17  ;;  %v344_v17 = vld [vmem:[%s10791_s1 + $0x960] sm:$0xff] }
 0x24c   :  { %3169 = vmatprep.mubr.f32.mxu1 %v5723_v40  ;;  %5128 = vmatprep.subr.bf16.mxu0 %v5127_v30  ;;  %v297_v30 = vld [vmem:[%s10791_s1 + $0x7e8] sm:$0xff]  ;;  %v5337_v40 = vpack.c.bf16 %v266_v28, %v250_v25 }
 0x24d   :  { %2903 = vmatmul.mubr.f32.gmra.mrb[20].mxu0 %v5724_v50  ;;  %5320 = vmatprep.subr.bf16.mxu1 %v5319_v34  ;;  %v299_v34 = vld [vmem:[%s10791_s1 + $0x7f8] sm:$0xff]  ;;  %v393_v28 = vld [vmem:[%s10791_s1 + $0xae8] sm:$0xff] }
 0x24e   :  { %3170 = vmatmul.mubr.f32.gmra.mrb[20].mxu1 %v5724_v50  ;;  %5130 = vmatpush1.bf16.msra.mxu0 %v5129_v37  ;;  %v5145_v37 = vpack.c.bf16 %v264_v23, %v248_v22  ;;  %v5339_v47 = vpack.c.bf16 %v299_v34, %v283_v33  ;;  %v346_v22 = vld [vmem:[%s10791_s1 + $0x970] sm:$0xff]  ;;  %v395_v33 = vld [vmem:[%s10791_s1 + $0xaf8] sm:$0xff] }
 0x24f   :  { %5322 = vmatpush1.bf16.msra.mxu1 %v5321_v41  ;;  %2908 = vmatprep.mubr.f32.mxu0 %v5725_v55  ;;  %v5147_v41 = vpack.c.bf16 %v297_v30, %v281_v29  ;;  %v362_v23 = vld [vmem:[%s10791_s1 + $0x9f0] sm:$0xff] }
 0x250   :  { %3175 = vmatprep.mubr.f32.mxu1 %v5725_v55  ;;  %5132 = vmatprep.subr.bf16.mxu0 %v5131_v46 }
 0x251   :  { %2909 = vmatmul.mubr.f32.gmra.mrb[22].mxu0 %v5726_v2  ;;  %5324 = vmatprep.subr.bf16.mxu1 %v5323_v51 }
 0x252   :  { %3176 = vmatmul.mubr.f32.gmra.mrb[22].mxu1 %v5726_v2  ;;  %5134 = vmatpush1.bf16.msra.mxu0 %v5133_v54  ;;  %v331_v54 = vld [vmem:[%s10791_s1 + $0x8f8] sm:$0xff]  ;;  %v330_v2 = vld [vmem:[%s10791_s1 + $0x8f0] sm:$0xff] }
 0x253   :  { %5326 = vmatpush1.bf16.msra.mxu1 %v5325_v56  ;;  %5136 = vmatprep.subr.bf16.mxu0 %v5135_v57  ;;  %v5149_v57 = vpack.c.bf16 %v296_v42, %v280_v38  ;;  %v5343_v4 = vpack.c.bf16 %v331_v54, %v315_v53  ;;  %v392_v42 = vld [vmem:[%s10791_s1 + $0xae0] sm:$0xff] }
 0x254   :  { %5328 = vmatprep.subr.bf16.mxu1 %v5327_v61  ;;  %3246 = vmatprep.mubr.f32.mxu0 %v5727_v15 }
 0x255   :  { %3513 = vmatprep.mubr.f32.mxu1 %v5727_v15  ;;  %v5345_v15 = vpack.c.bf16 %v330_v2, %v314_v1  ;;  %v457_v1 = vld [vmem:[%s10791_s1 + $0xce8] sm:$0xff]  ;;  %v443_v2 = vld [vmem:[%s10791_s1 + $0xc78] sm:$0xff] }
 0x256   :  { %5138 = vmatpush1.bf16.msra.mxu0 %v5137_v5  ;;  %v345_v5 = vld [vmem:[%s10791_s1 + $0x968] sm:$0xff] }
 0x257   :  { %5330 = vmatpush1.bf16.msra.mxu1 %v5329_v6  ;;  %5140 = vmatprep.subr.bf16.mxu0 %v5139_v7  ;;  %v361_v6 = vld [vmem:[%s10791_s1 + $0x9e8] sm:$0xff] }
 0x258   :  { %v2358_v26 = vpop.f32.mrb[8].mxu0  ;;  %5332 = vmatprep.subr.bf16.mxu1 %v5331_v11  ;;  %v363_v11 = vld [vmem:[%s10791_s1 + $0x9f8] sm:$0xff] }
 0x259   :  { %v2625_v31 = vpop.f32.mrb[8].mxu1  ;;  %v2360_v32 = vpop.f32.mrb[9].mxu0 }
 0x25a   :  { %v3724_v35 = vmax.f32 %v2358_v26, %v2360_v32  ;;  %v2627_v36 = vpop.f32.mrb[9].mxu1  ;;  %5142 = vmatpush1.bf16.msra.mxu0 %v5141_v19  ;;  %v5347_v26 = vpack.c.bf16 %v363_v11, %v347_v10  ;;  %v379_v32 = vld [vmem:[%s10791_s1 + $0xa78] sm:$0xff]  ;;  %v442_v10 = vld [vmem:[%s10791_s1 + $0xc70] sm:$0xff] }
 0x25b   :  { %v3728_v39 = vmax.f32 %v2625_v31, %v2627_v36  ;;  %5334 = vmatpush1.bf16.msra.mxu1 %v5333_v20  ;;  %5144 = vmatprep.subr.bf16.mxu0 %v5143_v21  ;;  %v5155_v20 = vpack.c.bf16 %v361_v6, %v345_v5  ;;  %v360_v21 = vld [vmem:[%s10791_s1 + $0x9e0] sm:$0xff]  ;;  %v5351_v45 = vpack.c.bf16 %v395_v33, %v379_v32  ;;  %v523_v32 = vld [vmem:[%s10791_s1 + $0xef8] sm:$0xff] }
 0x25c   :  { %v2364_v46 = vpop.f32.mrb[10].mxu0  ;;  %5336 = vmatprep.subr.bf16.mxu1 %v5335_v27  ;;  %v377_v27 = vld [vmem:[%s10791_s1 + $0xa68] sm:$0xff]  ;;  %v5157_v36 = vpack.c.bf16 %v360_v21, %v344_v17  ;;  %v5167_v6 = vpack.c.bf16 %v457_v1, %v441_v0  ;;  %v491_v17 = vld [vmem:[%s10791_s1 + $0xdf8] sm:$0xff] }
 0x25d   :  { %v9662_v50 = vmax.f32 %v3724_v35, %v3728_v39  ;;  %v2631_v51 = vpop.f32.mrb[10].mxu1  ;;  %v2366_v52 = vpop.f32.mrb[11].mxu0 }
 0x25e   :  { %v3725_v55 = vmax.f32 %v2364_v46, %v2366_v52  ;;  %v2633_v56 = vpop.f32.mrb[11].mxu1  ;;  %5146 = vmatpush1.bf16.msra.mxu0 %v5145_v37  ;;  %v5349_v37 = vpack.c.bf16 %v362_v23, %v346_v22  ;;  %v394_v46 = vld [vmem:[%s10791_s1 + $0xaf0] sm:$0xff]  ;;  %v427_v52 = vld [vmem:[%s10791_s1 + $0xbf8] sm:$0xff]  ;;  %v472_v22 = vld [vmem:[%s10791_s1 + $0xd60] sm:$0xff] }
 0x25f   :  { %v3764_v60 = vmax.f32 %v8430_v24, %v9662_v50  ;;  %v3729_v61 = vmax.f32 %v2631_v51, %v2633_v56  ;;  %5338 = vmatpush1.bf16.msra.mxu1 %v5337_v40  ;;  %5148 = vmatprep.subr.bf16.mxu0 %v5147_v41  ;;  %v5159_v40 = vpack.c.bf16 %v393_v28, %v377_v27  ;;  %v376_v41 = vld [vmem:[%s10791_s1 + $0xa60] sm:$0xff]  ;;  %v411_v51 = vld [vmem:[%s10791_s1 + $0xb78] sm:$0xff]  ;;  %v490_v27 = vld [vmem:[%s10791_s1 + $0xdf0] sm:$0xff] }
 0x260   :  { %v2370_v3 = vpop.f32.mrb[12].mxu0  ;;  %5340 = vmatprep.subr.bf16.mxu1 %v5339_v47  ;;  %v409_v47 = vld [vmem:[%s10791_s1 + $0xb68] sm:$0xff]  ;;  %v5161_v53 = vpack.c.bf16 %v392_v42, %v376_v41  ;;  %v488_v23 = vld [vmem:[%s10791_s1 + $0xde0] sm:$0xff]  ;;  %v522_v41 = vld [vmem:[%s10791_s1 + $0xef0] sm:$0xff] }
 0x261   :  { %v9690_v7 = vmax.f32 %v3725_v55, %v3729_v61  ;;  %v2637_v8 = vpop.f32.mrb[12].mxu1  ;;  %v2372_v9 = vpop.f32.mrb[13].mxu0  ;;  %v5353_v55 = vpack.c.bf16 %v394_v46, %v378_v44  ;;  %v5163_v56 = vpack.c.bf16 %v425_v48, %v409_v47  ;;  %v5355_v61 = vpack.c.bf16 %v427_v52, %v411_v51  ;;  %v505_v28 = vld [vmem:[%s10791_s1 + $0xe68] sm:$0xff]  ;;  %v555_v46 = vld [vmem:[%s10791_s1 + $0xff8] sm:$0xff]  ;;  %v536_v52 = vld [vmem:[%s10791_s1 + $0xf60] sm:$0xff] }
 0x262   :  { %v3726_v12 = vmax.f32 %v2370_v3, %v2372_v9  ;;  %v2639_v13 = vpop.f32.mrb[13].mxu1  ;;  %5150 = vmatpush1.bf16.msra.mxu0 %v5149_v57  ;;  %v408_v57 = vld [vmem:[%s10791_s1 + $0xb60] sm:$0xff]  ;;  %v459_v3 = vld [vmem:[%s10791_s1 + $0xcf8] sm:$0xff]  ;;  %v5173_v33 = vpack.c.bf16 %v488_v23, %v472_v22  ;;  %v537_v42 = vld [vmem:[%s10791_s1 + $0xf68] sm:$0xff] }
 0x263   :  { %v3765_v18 = vmax.f32 %v8456_v43, %v9690_v7  ;;  %v3730_v19 = vmax.f32 %v2637_v8, %v2639_v13  ;;  %5342 = vmatpush1.bf16.msra.mxu1 %v5341_v58  ;;  %5152 = vmatprep.subr.bf16.mxu0 %v5151_v63  ;;  %v424_v58 = vld [vmem:[%s10791_s1 + $0xbe0] sm:$0xff]  ;;  %v426_v63 = vld [vmem:[%s10791_s1 + $0xbf0] sm:$0xff]  ;;  %v5359_v11 = vpack.c.bf16 %v459_v3, %v443_v2  ;;  %v473_v13 = vld [vmem:[%s10791_s1 + $0xd68] sm:$0xff] }
 0x264   :  { %v2376_v25 = vpop.f32.mrb[14].mxu0  ;;  %5344 = vmatprep.subr.bf16.mxu1 %v5343_v4  ;;  %v5165_v4 = vpack.c.bf16 %v424_v58, %v408_v57  ;;  %v5357_v5 = vpack.c.bf16 %v426_v63, %v410_v59  ;;  %v440_v8 = vld [vmem:[%s10791_s1 + $0xc60] sm:$0xff]  ;;  %v553_v44 = vld [vmem:[%s10791_s1 + $0xfe8] sm:$0xff]  ;;  %v554_v57 = vld [vmem:[%s10791_s1 + $0xff0] sm:$0xff] }
 0x265   :  { %v9718_v29 = vmax.f32 %v3726_v12, %v3730_v19  ;;  %v2643_v30 = vpop.f32.mrb[14].mxu1  ;;  %v2378_v31 = vpop.f32.mrb[15].mxu0  ;;  %v456_v9 = vld [vmem:[%s10791_s1 + $0xce0] sm:$0xff]  ;;  %v458_v12 = vld [vmem:[%s10791_s1 + $0xcf0] sm:$0xff]  ;;  %v5179_v51 = vpack.c.bf16 %v553_v44, %v537_v42  ;;  %v569_v58 = vld [vmem:[%s10791_s1 + $0x1068] sm:$0xff] }
 0x266   :  { %v3727_v34 = vmax.f32 %v2376_v25, %v2378_v31  ;;  %v2645_v35 = vpop.f32.mrb[15].mxu1  ;;  %5154 = vmatpush1.bf16.msra.mxu0 %v5153_v14  ;;  %v489_v14 = vld [vmem:[%s10791_s1 + $0xde8] sm:$0xff]  ;;  %v5169_v19 = vpack.c.bf16 %v456_v9, %v440_v8  ;;  %v474_v25 = vld [vmem:[%s10791_s1 + $0xd70] sm:$0xff]  ;;  %v507_v31 = vld [vmem:[%s10791_s1 + $0xe78] sm:$0xff] }
 0x267   :  { %v3766_v38 = vmax.f32 %v8482_v62, %v9718_v29  ;;  %v3731_v39 = vmax.f32 %v2643_v30, %v2645_v35  ;;  %5346 = vmatpush1.bf16.msra.mxu1 %v5345_v15  ;;  %5156 = vmatprep.subr.bf16.mxu0 %v5155_v20  ;;  %v475_v15 = vld [vmem:[%s10791_s1 + $0xd78] sm:$0xff]  ;;  %v5361_v20 = vpack.c.bf16 %v458_v12, %v442_v10  ;;  %v521_v30 = vld [vmem:[%s10791_s1 + $0xee8] sm:$0xff]  ;;  %v568_v3 = vld [vmem:[%s10791_s1 + $0x1060] sm:$0xff] }
 0x268   :  { %5348 = vmatprep.subr.bf16.mxu1 %v5347_v26  ;;  %v5171_v21 = vpack.c.bf16 %v489_v14, %v473_v13  ;;  %v5363_v26 = vpack.c.bf16 %v491_v17, %v475_v15  ;;  %v5175_v35 = vpack.c.bf16 %v521_v30, %v505_v28  ;;  %v585_v59 = vld [vmem:[%s10791_s1 + $0x10e8] sm:$0xff]  ;;  %v587_v63 = vld [vmem:[%s10791_s1 + $0x10f8] sm:$0xff]  ;;  %v586_v8 = vld [vmem:[%s10791_s1 + $0x10f0] sm:$0xff] }
 0x269   :  { %v9746_v49 = vmax.f32 %v3727_v34, %v3731_v39  ;;  %v5365_v34 = vpack.c.bf16 %v490_v27, %v474_v25  ;;  %v506_v39 = vld [vmem:[%s10791_s1 + $0xe70] sm:$0xff]  ;;  %v5183_v2 = vpack.c.bf16 %v585_v59, %v569_v58  ;;  %v601_v9 = vld [vmem:[%s10791_s1 + $0x1168] sm:$0xff]  ;;  %v619_v12 = vld [vmem:[%s10791_s1 + $0x11f8] sm:$0xff] }
 0x26a   :  { %5158 = vmatpush1.bf16.msra.mxu0 %v5157_v36  ;;  %v504_v36 = vld [vmem:[%s10791_s1 + $0xe60] sm:$0xff]  ;;  %v5369_v48 = vpack.c.bf16 %v522_v41, %v506_v39  ;;  %v617_v10 = vld [vmem:[%s10791_s1 + $0x11e8] sm:$0xff]  ;;  %v618_v22 = vld [vmem:[%s10791_s1 + $0x11f0] sm:$0xff] }
 0x26b   :  { %v3767_v54 = vmax.f32 %v8508_v16, %v9746_v49  ;;  %5350 = vmatpush1.bf16.msra.mxu1 %v5349_v37  ;;  %5160 = vmatprep.subr.bf16.mxu0 %v5159_v40  ;;  %v520_v37 = vld [vmem:[%s10791_s1 + $0xee0] sm:$0xff]  ;;  %v5367_v40 = vpack.c.bf16 %v523_v32, %v507_v31  ;;  %v5187_v15 = vpack.c.bf16 %v617_v10, %v601_v9  ;;  %v633_v23 = vld [vmem:[%s10791_s1 + $0x1268] sm:$0xff]  ;;  %v635_v27 = vld [vmem:[%s10791_s1 + $0x1278] sm:$0xff] }
 0x26c   :  { %5352 = vmatprep.subr.bf16.mxu1 %v5351_v45  ;;  %v539_v45 = vld [vmem:[%s10791_s1 + $0xf78] sm:$0xff]  ;;  %v5177_v47 = vpack.c.bf16 %v520_v37, %v504_v36  ;;  %v600_v17 = vld [vmem:[%s10791_s1 + $0x1160] sm:$0xff]  ;;  %v649_v25 = vld [vmem:[%s10791_s1 + $0x12e8] sm:$0xff] }
 0x26d   :  { %v651_v28 = vld [vmem:[%s10791_s1 + $0x12f8] sm:$0xff]  ;;  %v5191_v32 = vpack.c.bf16 %v649_v25, %v633_v23  ;;  %v650_v37 = vld [vmem:[%s10791_s1 + $0x12f0] sm:$0xff]  ;;  %v665_v39 = vld [vmem:[%s10791_s1 + $0x1368] sm:$0xff] }
 0x26e   :  { %5162 = vmatpush1.bf16.msra.mxu0 %v5161_v53  ;;  %v552_v53 = vld [vmem:[%s10791_s1 + $0xfe0] sm:$0xff]  ;;  %v5383_v36 = vpack.c.bf16 %v651_v28, %v635_v27  ;;  %v5729_v41 = vld [vmem:[%s10792_s0 + $0x38] sm:$0xff]  ;;  %v713_v58 = vld [vmem:[%s10791_s1 + $0x14e8] sm:$0xff] }
 0x26f   :  { %5354 = vmatpush1.bf16.msra.mxu1 %v5353_v55  ;;  %5164 = vmatprep.subr.bf16.mxu0 %v5163_v56  ;;  %v538_v55 = vld [vmem:[%s10791_s1 + $0xf70] sm:$0xff]  ;;  %v5371_v56 = vpack.c.bf16 %v555_v46, %v539_v45  ;;  %v5181_v0 = vpack.c.bf16 %v552_v53, %v536_v52  ;;  %v667_v42 = vld [vmem:[%s10791_s1 + $0x1378] sm:$0xff]  ;;  %v680_v52 = vld [vmem:[%s10791_s1 + $0x13e0] sm:$0xff] }
 0x270   :  { %5356 = vmatprep.subr.bf16.mxu1 %v5355_v61  ;;  %v571_v61 = vld [vmem:[%s10791_s1 + $0x1078] sm:$0xff]  ;;  %v5373_v1 = vpack.c.bf16 %v554_v57, %v538_v55  ;;  %v5730_v45 = vld [vmem:[%s10792_s0 + $0x30] sm:$0xff]  ;;  %v697_v57 = vld [vmem:[%s10791_s1 + $0x1468] sm:$0xff] }
 0x271   :  { %v683_v44 = vld [vmem:[%s10791_s1 + $0x13f8] sm:$0xff]  ;;  %v666_v53 = vld [vmem:[%s10791_s1 + $0x1370] sm:$0xff]  ;;  %v5731_v59 = vld [vmem:[%s10792_s0 + $0x68] sm:$0xff] }
 0x272   :  { %5166 = vmatpush1.bf16.msra.mxu0 %v5165_v4  ;;  %v584_v4 = vld [vmem:[%s10791_s1 + $0x10e0] sm:$0xff]  ;;  %v5387_v55 = vpack.c.bf16 %v683_v44, %v667_v42  ;;  %v714_v9 = vld [vmem:[%s10791_s1 + $0x14f0] sm:$0xff]  ;;  %v729_v10 = vld [vmem:[%s10791_s1 + $0x1568] sm:$0xff] }
 0x273   :  { %5358 = vmatpush1.bf16.msra.mxu1 %v5357_v5  ;;  %5168 = vmatprep.subr.bf16.mxu0 %v5167_v6  ;;  %v570_v5 = vld [vmem:[%s10791_s1 + $0x1070] sm:$0xff]  ;;  %v5375_v6 = vpack.c.bf16 %v587_v63, %v571_v61  ;;  %v5185_v13 = vpack.c.bf16 %v584_v4, %v568_v3  ;;  %v699_v61 = vld [vmem:[%s10791_s1 + $0x1478] sm:$0xff]  ;;  %v5199_v3 = vpack.c.bf16 %v713_v58, %v697_v57  ;;  %v696_v4 = vld [vmem:[%s10791_s1 + $0x1460] sm:$0xff] }
 0x274   :  { %5360 = vmatprep.subr.bf16.mxu1 %v5359_v11  ;;  %v603_v11 = vld [vmem:[%s10791_s1 + $0x1178] sm:$0xff]  ;;  %v5377_v14 = vpack.c.bf16 %v586_v8, %v570_v5  ;;  %v712_v5 = vld [vmem:[%s10791_s1 + $0x14e0] sm:$0xff]  ;;  %v730_v23 = vld [vmem:[%s10791_s1 + $0x1570] sm:$0xff] }
 0x275   :  { %v715_v63 = vld [vmem:[%s10791_s1 + $0x14f8] sm:$0xff]  ;;  %v761_v27 = vld [vmem:[%s10791_s1 + $0x1668] sm:$0xff]  ;;  %v810_v57 = vld [vmem:[%s10791_s1 + $0x17f0] sm:$0xff] }
 0x276   :  { %5170 = vmatpush1.bf16.msra.mxu0 %v5169_v19  ;;  %v616_v19 = vld [vmem:[%s10791_s1 + $0x11e0] sm:$0xff]  ;;  %v5391_v8 = vpack.c.bf16 %v715_v63, %v699_v61  ;;  %v777_v28 = vld [vmem:[%s10791_s1 + $0x16e8] sm:$0xff]  ;;  %v827_v61 = vld [vmem:[%s10791_s1 + $0x1878] sm:$0xff] }
 0x277   :  { %5362 = vmatpush1.bf16.msra.mxu1 %v5361_v20  ;;  %5172 = vmatprep.subr.bf16.mxu0 %v5171_v21  ;;  %v602_v20 = vld [vmem:[%s10791_s1 + $0x1170] sm:$0xff]  ;;  %v5379_v21 = vpack.c.bf16 %v619_v12, %v603_v11  ;;  %v5189_v30 = vpack.c.bf16 %v616_v19, %v600_v17  ;;  %v745_v11 = vld [vmem:[%s10791_s1 + $0x15e8] sm:$0xff]  ;;  %v5733_v12 = vld [vmem:[%s10792_s0 + $0x98] sm:$0xff]  ;;  %v5201_v17 = vpack.c.bf16 %v712_v5, %v696_v4 }
 0x278   :  { %5364 = vmatprep.subr.bf16.mxu1 %v5363_v26  ;;  %v5728_v26 = vld [vmem:[%s10792_s0] sm:$0xff]  ;;  %v5381_v31 = vpack.c.bf16 %v618_v22, %v602_v20  ;;  %v5203_v20 = vpack.c.bf16 %v745_v11, %v729_v10  ;;  %v793_v42 = vld [vmem:[%s10791_s1 + $0x1768] sm:$0xff]  ;;  %v843_v63 = vld [vmem:[%s10791_s1 + $0x18f8] sm:$0xff] }
 0x279   :  { %v744_v22 = vld [vmem:[%s10791_s1 + $0x15e0] sm:$0xff]  ;;  %v809_v44 = vld [vmem:[%s10791_s1 + $0x17e8] sm:$0xff]  ;;  %v826_v5 = vld [vmem:[%s10791_s1 + $0x1870] sm:$0xff] }
 0x27a   :  { %5174 = vmatpush1.bf16.msra.mxu0 %v5173_v33  ;;  %v632_v33 = vld [vmem:[%s10791_s1 + $0x1260] sm:$0xff]  ;;  %v825_v58 = vld [vmem:[%s10791_s1 + $0x1868] sm:$0xff]  ;;  %v859_v11 = vld [vmem:[%s10791_s1 + $0x1978] sm:$0xff] }
 0x27b   :  { %5366 = vmatpush1.bf16.msra.mxu1 %v5365_v34  ;;  %5176 = vmatprep.subr.bf16.mxu0 %v5175_v35  ;;  %v648_v34 = vld [vmem:[%s10791_s1 + $0x12e0] sm:$0xff]  ;;  %v634_v35 = vld [vmem:[%s10791_s1 + $0x1270] sm:$0xff]  ;;  %v873_v10 = vld [vmem:[%s10791_s1 + $0x19e8] sm:$0xff] }
 0x27c   :  { %5368 = vmatprep.subr.bf16.mxu1 %v5367_v40  ;;  %v681_v40 = vld [vmem:[%s10791_s1 + $0x13e8] sm:$0xff]  ;;  %v5193_v46 = vpack.c.bf16 %v648_v34, %v632_v33  ;;  %v840_v4 = vld [vmem:[%s10791_s1 + $0x18e0] sm:$0xff] }
 0x27e   :  { %5178 = vmatpush1.bf16.msra.mxu0 %v5177_v47  ;;  %v5385_v47 = vpack.c.bf16 %v650_v37, %v634_v35  ;;  %v5207_v35 = vpack.c.bf16 %v777_v28, %v761_v27  ;;  %v776_v37 = vld [vmem:[%s10791_s1 + $0x16e0] sm:$0xff]  ;;  %v907_v27 = vld [vmem:[%s10791_s1 + $0x1af8] sm:$0xff] }
 0x27f   :  { %5370 = vmatpush1.bf16.msra.mxu1 %v5369_v48  ;;  %5180 = vmatprep.subr.bf16.mxu0 %v5179_v51  ;;  %v5195_v48 = vpack.c.bf16 %v681_v40, %v665_v39  ;;  %v664_v51 = vld [vmem:[%s10791_s1 + $0x1360] sm:$0xff]  ;;  %v762_v39 = vld [vmem:[%s10791_s1 + $0x1670] sm:$0xff] }
 0x280   :  { %5372 = vmatprep.subr.bf16.mxu1 %v5371_v56  ;;  %v682_v56 = vld [vmem:[%s10791_s1 + $0x13f0] sm:$0xff] }
 0x282   :  { %5182 = vmatpush1.bf16.msra.mxu0 %v5181_v0  ;;  %v5732_v0 = vld [vmem:[%s10792_s0 + $0x60] sm:$0xff] }
 0x283   :  { %5374 = vmatpush1.bf16.msra.mxu1 %v5373_v1  ;;  %5184 = vmatprep.subr.bf16.mxu0 %v5183_v2  ;;  %v5197_v1 = vpack.c.bf16 %v680_v52, %v664_v51  ;;  %v5389_v2 = vpack.c.bf16 %v682_v56, %v666_v53  ;;  %v5211_v51 = vpack.c.bf16 %v809_v44, %v793_v42  ;;  %v792_v52 = vld [vmem:[%s10791_s1 + $0x1760] sm:$0xff] }
 0x284   :  { %5376 = vmatprep.subr.bf16.mxu1 %v5375_v6  ;;  %v698_v6 = vld [vmem:[%s10791_s1 + $0x1470] sm:$0xff]  ;;  %v808_v53 = vld [vmem:[%s10791_s1 + $0x17e0] sm:$0xff] }
 0x285   :  { %3247 = vmatmul.mubr.f32.vlgmr.msra.gmra.mrb[24].mxu0 %v5728_v26  ;;  %v5393_v19 = vpack.c.bf16 %v714_v9, %v698_v6  ;;  %v5407_v6 = vpack.c.bf16 %v843_v63, %v827_v61  ;;  %v857_v9 = vld [vmem:[%s10791_s1 + $0x1968] sm:$0xff]  ;;  %v952_v63 = vld [vmem:[%s10791_s1 + $0x1c60] sm:$0xff] }
 0x286   :  { %5186 = vmatpush1.bf16.msra.mxu0 %v5185_v13  ;;  %3514 = vmatmul.mubr.f32.vlgmr.msra.gmra.mrb[24].mxu1 %v5728_v26  ;;  %v731_v13 = vld [vmem:[%s10791_s1 + $0x1578] sm:$0xff]  ;;  %v746_v26 = vld [vmem:[%s10791_s1 + $0x15f0] sm:$0xff] }
 0x287   :  { %5378 = vmatpush1.bf16.msra.mxu1 %v5377_v14  ;;  %5188 = vmatprep.subr.bf16.mxu0 %v5187_v15  ;;  %v747_v14 = vld [vmem:[%s10791_s1 + $0x15f8] sm:$0xff]  ;;  %v5734_v15 = vld [vmem:[%s10792_s0 + $0x90] sm:$0xff]  ;;  %v5397_v34 = vpack.c.bf16 %v746_v26, %v730_v23  ;;  %v889_v23 = vld [vmem:[%s10791_s1 + $0x1a68] sm:$0xff] }
 0x288   :  { %5380 = vmatprep.subr.bf16.mxu1 %v5379_v21  ;;  %3252 = vmatprep.mubr.f32.mxu0 %v5729_v41  ;;  %v728_v21 = vld [vmem:[%s10791_s1 + $0x1560] sm:$0xff]  ;;  %v5395_v25 = vpack.c.bf16 %v747_v14, %v731_v13  ;;  %v891_v26 = vld [vmem:[%s10791_s1 + $0x1a78] sm:$0xff] }
 0x289   :  { %3519 = vmatprep.mubr.f32.mxu1 %v5729_v41  ;;  %3253 = vmatmul.mubr.f32.gmra.mrb[26].mxu0 %v5730_v45  ;;  %v5205_v33 = vpack.c.bf16 %v744_v22, %v728_v21  ;;  %v778_v41 = vld [vmem:[%s10791_s1 + $0x16f0] sm:$0xff] }
 0x28a   :  { %5190 = vmatpush1.bf16.msra.mxu0 %v5189_v30  ;;  %3520 = vmatmul.mubr.f32.gmra.mrb[26].mxu1 %v5730_v45  ;;  %v5735_v30 = vld [vmem:[%s10792_s0 + $0x18] sm:$0xff]  ;;  %v874_v22 = vld [vmem:[%s10791_s1 + $0x19f0] sm:$0xff] }
 0x28b   :  { %5382 = vmatpush1.bf16.msra.mxu1 %v5381_v31  ;;  %5192 = vmatprep.subr.bf16.mxu0 %v5191_v32  ;;  %v763_v31 = vld [vmem:[%s10791_s1 + $0x1678] sm:$0xff] }
 0x28c   :  { %5384 = vmatprep.subr.bf16.mxu1 %v5383_v36  ;;  %3258 = vmatprep.mubr.f32.mxu0 %v5731_v59  ;;  %v779_v32 = vld [vmem:[%s10791_s1 + $0x16f8] sm:$0xff]  ;;  %v760_v36 = vld [vmem:[%s10791_s1 + $0x1660] sm:$0xff] }
 0x28d   :  { %3525 = vmatprep.mubr.f32.mxu1 %v5731_v59  ;;  %3259 = vmatmul.mubr.f32.gmra.mrb[28].mxu0 %v5732_v0  ;;  %v5399_v40 = vpack.c.bf16 %v779_v32, %v763_v31  ;;  %v795_v45 = vld [vmem:[%s10791_s1 + $0x1778] sm:$0xff]  ;;  %v841_v59 = vld [vmem:[%s10791_s1 + $0x18e8] sm:$0xff]  ;;  %v888_v32 = vld [vmem:[%s10791_s1 + $0x1a60] sm:$0xff] }
 0x28e   :  { %5194 = vmatpush1.bf16.msra.mxu0 %v5193_v46  ;;  %3526 = vmatmul.mubr.f32.gmra.mrb[28].mxu1 %v5732_v0  ;;  %v811_v46 = vld [vmem:[%s10791_s1 + $0x17f8] sm:$0xff]  ;;  %v5213_v0 = vpack.c.bf16 %v808_v53, %v792_v52  ;;  %v938_v52 = vld [vmem:[%s10791_s1 + $0x1bf0] sm:$0xff]  ;;  %v953_v53 = vld [vmem:[%s10791_s1 + $0x1c68] sm:$0xff] }
 0x28f   :  { %5386 = vmatpush1.bf16.msra.mxu1 %v5385_v47  ;;  %5196 = vmatprep.subr.bf16.mxu0 %v5195_v48  ;;  %v5209_v47 = vpack.c.bf16 %v776_v37, %v760_v36  ;;  %v5401_v48 = vpack.c.bf16 %v778_v41, %v762_v39  ;;  %v5403_v56 = vpack.c.bf16 %v811_v46, %v795_v45  ;;  %v906_v36 = vld [vmem:[%s10791_s1 + $0x1af0] sm:$0xff]  ;;  %v921_v37 = vld [vmem:[%s10791_s1 + $0x1b68] sm:$0xff]  ;;  %v939_v41 = vld [vmem:[%s10791_s1 + $0x1bf8] sm:$0xff] }
 0x290   :  { %5388 = vmatprep.subr.bf16.mxu1 %v5387_v55  ;;  %3264 = vmatprep.mubr.f32.mxu0 %v5733_v12  ;;  %v794_v55 = vld [vmem:[%s10791_s1 + $0x1770] sm:$0xff]  ;;  %v937_v39 = vld [vmem:[%s10791_s1 + $0x1be8] sm:$0xff]  ;;  %v920_v46 = vld [vmem:[%s10791_s1 + $0x1b60] sm:$0xff] }
 0x291   :  { %3531 = vmatprep.mubr.f32.mxu1 %v5733_v12  ;;  %3265 = vmatmul.mubr.f32.gmra.mrb[30].mxu0 %v5734_v15  ;;  %v875_v12 = vld [vmem:[%s10791_s1 + $0x19f8] sm:$0xff]  ;;  %v5227_v45 = vpack.c.bf16 %v937_v39, %v921_v37 }
 0x292   :  { %5198 = vmatpush1.bf16.msra.mxu0 %v5197_v1  ;;  %3532 = vmatmul.mubr.f32.gmra.mrb[30].mxu1 %v5734_v15  ;;  %v5405_v1 = vpack.c.bf16 %v810_v57, %v794_v55  ;;  %v5219_v15 = vpack.c.bf16 %v873_v10, %v857_v9  ;;  %v5411_v21 = vpack.c.bf16 %v875_v12, %v859_v11  ;;  %v969_v55 = vld [vmem:[%s10791_s1 + $0x1ce8] sm:$0xff]  ;;  %v971_v57 = vld [vmem:[%s10791_s1 + $0x1cf8] sm:$0xff]  ;;  %v984_v12 = vld [vmem:[%s10791_s1 + $0x1d60] sm:$0xff] }
 0x293   :  { %5390 = vmatpush1.bf16.msra.mxu1 %v5389_v2  ;;  %5200 = vmatprep.subr.bf16.mxu0 %v5199_v3  ;;  %v5215_v2 = vpack.c.bf16 %v841_v59, %v825_v58  ;;  %v824_v3 = vld [vmem:[%s10791_s1 + $0x1860] sm:$0xff]  ;;  %v5231_v61 = vpack.c.bf16 %v969_v55, %v953_v53 }
 0x294   :  { %5392 = vmatprep.subr.bf16.mxu1 %v5391_v8  ;;  %3335 = vmatprep.mubr.f32.mxu0 %v5735_v30  ;;  %v842_v8 = vld [vmem:[%s10791_s1 + $0x18f0] sm:$0xff]  ;;  %v5217_v13 = vpack.c.bf16 %v840_v4, %v824_v3  ;;  %v985_v4 = vld [vmem:[%s10791_s1 + $0x1d68] sm:$0xff] }
 0x295   :  { %3602 = vmatprep.mubr.f32.mxu1 %v5735_v30  ;;  %v5409_v14 = vpack.c.bf16 %v842_v8, %v826_v5  ;;  %v970_v3 = vld [vmem:[%s10791_s1 + $0x1cf0] sm:$0xff]  ;;  %v1001_v5 = vld [vmem:[%s10791_s1 + $0x1de8] sm:$0xff]  ;;  %v1003_v8 = vld [vmem:[%s10791_s1 + $0x1df8] sm:$0xff] }
 0x296   :  { %5202 = vmatpush1.bf16.msra.mxu0 %v5201_v17  ;;  %v856_v17 = vld [vmem:[%s10791_s1 + $0x1960] sm:$0xff]  ;;  %v5235_v11 = vpack.c.bf16 %v1001_v5, %v985_v4 }
 0x297   :  { %5394 = vmatpush1.bf16.msra.mxu1 %v5393_v19  ;;  %5204 = vmatprep.subr.bf16.mxu0 %v5203_v20  ;;  %v872_v19 = vld [vmem:[%s10791_s1 + $0x19e0] sm:$0xff]  ;;  %v858_v20 = vld [vmem:[%s10791_s1 + $0x1970] sm:$0xff] }
 0x298   :  { %5396 = vmatprep.subr.bf16.mxu1 %v5395_v25  ;;  %v905_v25 = vld [vmem:[%s10791_s1 + $0x1ae8] sm:$0xff]  ;;  %v5221_v28 = vpack.c.bf16 %v872_v19, %v856_v17  ;;  %v5413_v30 = vpack.c.bf16 %v874_v22, %v858_v20  ;;  %v1002_v17 = vld [vmem:[%s10791_s1 + $0x1df0] sm:$0xff]  ;;  %v1035_v22 = vld [vmem:[%s10791_s1 + $0x1ef8] sm:$0xff] }
 0x299   :  { %v5223_v31 = vpack.c.bf16 %v905_v25, %v889_v23  ;;  %v1017_v19 = vld [vmem:[%s10791_s1 + $0x1e68] sm:$0xff] }
 0x29a   :  { %5206 = vmatpush1.bf16.msra.mxu0 %v5205_v33  ;;  %v904_v33 = vld [vmem:[%s10791_s1 + $0x1ae0] sm:$0xff]  ;;  %v1033_v20 = vld [vmem:[%s10791_s1 + $0x1ee8] sm:$0xff] }
 0x29b   :  { %5398 = vmatpush1.bf16.msra.mxu1 %v5397_v34  ;;  %5208 = vmatprep.subr.bf16.mxu0 %v5207_v35  ;;  %v890_v34 = vld [vmem:[%s10791_s1 + $0x1a70] sm:$0xff]  ;;  %v5415_v35 = vpack.c.bf16 %v907_v27, %v891_v26  ;;  %v5225_v42 = vpack.c.bf16 %v904_v33, %v888_v32  ;;  %v5239_v26 = vpack.c.bf16 %v1033_v20, %v1017_v19  ;;  %v1016_v27 = vld [vmem:[%s10791_s1 + $0x1e60] sm:$0xff]  ;;  %v1049_v33 = vld [vmem:[%s10791_s1 + $0x1f68] sm:$0xff] }
 0x29c   :  { %5400 = vmatprep.subr.bf16.mxu1 %v5399_v40  ;;  %v923_v40 = vld [vmem:[%s10791_s1 + $0x1b78] sm:$0xff]  ;;  %v5417_v44 = vpack.c.bf16 %v906_v36, %v890_v34  ;;  %v1034_v32 = vld [vmem:[%s10791_s1 + $0x1ef0] sm:$0xff]  ;;  %v1065_v34 = vld [vmem:[%s10791_s1 + $0x1fe8] sm:$0xff] }
 0x29d   :  { %v1067_v36 = vld [vmem:[%s10791_s1 + $0x1ff8] sm:$0xff] }
 0x29e   :  { %5210 = vmatpush1.bf16.msra.mxu0 %v5209_v47  ;;  %v936_v47 = vld [vmem:[%s10791_s1 + $0x1be0] sm:$0xff]  ;;  %v1163_v19 = vld [vmem:[%s10791_s1 + $0x22f8] sm:$0xff] }
 0x29f   :  { %5402 = vmatpush1.bf16.msra.mxu1 %v5401_v48  ;;  %5212 = vmatprep.subr.bf16.mxu0 %v5211_v51  ;;  %v922_v48 = vld [vmem:[%s10791_s1 + $0x1b70] sm:$0xff]  ;;  %v5419_v51 = vpack.c.bf16 %v939_v41, %v923_v40  ;;  %v5229_v58 = vpack.c.bf16 %v936_v47, %v920_v46  ;;  %v5243_v40 = vpack.c.bf16 %v1065_v34, %v1049_v33  ;;  %v1048_v41 = vld [vmem:[%s10791_s1 + $0x1f60] sm:$0xff]  ;;  %v1081_v47 = vld [vmem:[%s10791_s1 + $0x2068] sm:$0xff] }
 0x2a0   :  { %5404 = vmatprep.subr.bf16.mxu1 %v5403_v56  ;;  %v955_v56 = vld [vmem:[%s10791_s1 + $0x1c78] sm:$0xff]  ;;  %v5421_v59 = vpack.c.bf16 %v938_v52, %v922_v48  ;;  %v1066_v46 = vld [vmem:[%s10791_s1 + $0x1ff0] sm:$0xff]  ;;  %v1097_v48 = vld [vmem:[%s10791_s1 + $0x20e8] sm:$0xff] }
 0x2a1   :  { %v1099_v52 = vld [vmem:[%s10791_s1 + $0x20f8] sm:$0xff] }
 0x2a2   :  { %5214 = vmatpush1.bf16.msra.mxu0 %v5213_v0  ;;  %v968_v0 = vld [vmem:[%s10791_s1 + $0x1ce0] sm:$0xff]  ;;  %v1179_v33 = vld [vmem:[%s10791_s1 + $0x2378] sm:$0xff] }
 0x2a3   :  { %5406 = vmatpush1.bf16.msra.mxu1 %v5405_v1  ;;  %5216 = vmatprep.subr.bf16.mxu0 %v5215_v2  ;;  %v954_v1 = vld [vmem:[%s10791_s1 + $0x1c70] sm:$0xff]  ;;  %v5423_v2 = vpack.c.bf16 %v971_v57, %v955_v56  ;;  %v5233_v9 = vpack.c.bf16 %v968_v0, %v952_v63  ;;  %v5247_v56 = vpack.c.bf16 %v1097_v48, %v1081_v47  ;;  %v1080_v57 = vld [vmem:[%s10791_s1 + $0x2060] sm:$0xff]  ;;  %v1113_v0 = vld [vmem:[%s10791_s1 + $0x2168] sm:$0xff] }
 0x2a4   :  { %5408 = vmatprep.subr.bf16.mxu1 %v5407_v6  ;;  %v987_v6 = vld [vmem:[%s10791_s1 + $0x1d78] sm:$0xff]  ;;  %v5425_v10 = vpack.c.bf16 %v970_v3, %v954_v1  ;;  %v1098_v63 = vld [vmem:[%s10791_s1 + $0x20f0] sm:$0xff]  ;;  %v1129_v1 = vld [vmem:[%s10791_s1 + $0x21e8] sm:$0xff] }
 0x2a5   :  { %v1131_v3 = vld [vmem:[%s10791_s1 + $0x21f8] sm:$0xff]  ;;  %v1225_v47 = vld [vmem:[%s10791_s1 + $0x24e8] sm:$0xff] }
 0x2a6   :  { %5218 = vmatpush1.bf16.msra.mxu0 %v5217_v13  ;;  %v1000_v13 = vld [vmem:[%s10791_s1 + $0x1de0] sm:$0xff]  ;;  %v1195_v34 = vld [vmem:[%s10791_s1 + $0x23f8] sm:$0xff] }
 0x2a7   :  { %5410 = vmatpush1.bf16.msra.mxu1 %v5409_v14  ;;  %5220 = vmatprep.subr.bf16.mxu0 %v5219_v15  ;;  %v986_v14 = vld [vmem:[%s10791_s1 + $0x1d70] sm:$0xff]  ;;  %v5427_v15 = vpack.c.bf16 %v1003_v8, %v987_v6  ;;  %v5237_v23 = vpack.c.bf16 %v1000_v13, %v984_v12  ;;  %v5251_v6 = vpack.c.bf16 %v1129_v1, %v1113_v0  ;;  %v1112_v8 = vld [vmem:[%s10791_s1 + $0x2160] sm:$0xff]  ;;  %v1145_v13 = vld [vmem:[%s10791_s1 + $0x2268] sm:$0xff] }
 0x2a8   :  { %5412 = vmatprep.subr.bf16.mxu1 %v5411_v21  ;;  %v1019_v21 = vld [vmem:[%s10791_s1 + $0x1e78] sm:$0xff]  ;;  %v5429_v25 = vpack.c.bf16 %v1002_v17, %v986_v14  ;;  %v1130_v12 = vld [vmem:[%s10791_s1 + $0x21f0] sm:$0xff]  ;;  %v1161_v14 = vld [vmem:[%s10791_s1 + $0x22e8] sm:$0xff] }
 0x2a9   :  { %v1147_v17 = vld [vmem:[%s10791_s1 + $0x2278] sm:$0xff]  ;;  %v1226_v0 = vld [vmem:[%s10791_s1 + $0x24f0] sm:$0xff]  ;;  %v1241_v1 = vld [vmem:[%s10791_s1 + $0x2568] sm:$0xff] }
 0x2aa   :  { %5222 = vmatpush1.bf16.msra.mxu0 %v5221_v28  ;;  %v1032_v28 = vld [vmem:[%s10791_s1 + $0x1ee0] sm:$0xff]  ;;  %v5739_v48 = vld [vmem:[%s10792_s0 + $0x78] sm:$0xff] }
 0x2ab   :  { %5414 = vmatpush1.bf16.msra.mxu1 %v5413_v30  ;;  %5224 = vmatprep.subr.bf16.mxu0 %v5223_v31  ;;  %v1018_v30 = vld [vmem:[%s10791_s1 + $0x1e70] sm:$0xff]  ;;  %v5431_v31 = vpack.c.bf16 %v1035_v22, %v1019_v21  ;;  %v5241_v37 = vpack.c.bf16 %v1032_v28, %v1016_v27  ;;  %v5255_v22 = vpack.c.bf16 %v1161_v14, %v1145_v13 }
 0x2ac   :  { %5416 = vmatprep.subr.bf16.mxu1 %v5415_v35  ;;  %v1051_v35 = vld [vmem:[%s10791_s1 + $0x1f78] sm:$0xff]  ;;  %v5433_v39 = vpack.c.bf16 %v1034_v32, %v1018_v30  ;;  %v5447_v27 = vpack.c.bf16 %v1163_v19, %v1147_v17  ;;  %v1162_v28 = vld [vmem:[%s10791_s1 + $0x22f0] sm:$0xff]  ;;  %v1177_v30 = vld [vmem:[%s10791_s1 + $0x2368] sm:$0xff] }
 0x2ad   :  { %v5737_v32 = vld [vmem:[%s10792_s0 + $0x48] sm:$0xff]  ;;  %v1242_v13 = vld [vmem:[%s10791_s1 + $0x2570] sm:$0xff] }
 0x2ae   :  { %5226 = vmatpush1.bf16.msra.mxu0 %v5225_v42  ;;  %v1064_v42 = vld [vmem:[%s10791_s1 + $0x1fe0] sm:$0xff]  ;;  %v1273_v17 = vld [vmem:[%s10791_s1 + $0x2668] sm:$0xff] }
 0x2af   :  { %5418 = vmatpush1.bf16.msra.mxu1 %v5417_v44  ;;  %5228 = vmatprep.subr.bf16.mxu0 %v5227_v45  ;;  %v1050_v44 = vld [vmem:[%s10791_s1 + $0x1f70] sm:$0xff]  ;;  %v5435_v45 = vpack.c.bf16 %v1067_v36, %v1051_v35  ;;  %v5245_v53 = vpack.c.bf16 %v1064_v42, %v1048_v41  ;;  %v5738_v35 = vld [vmem:[%s10792_s0 + $0x40] sm:$0xff]  ;;  %v1289_v19 = vld [vmem:[%s10791_s1 + $0x26e8] sm:$0xff] }
 0x2b0   :  { %5420 = vmatprep.subr.bf16.mxu1 %v5419_v51  ;;  %v1083_v51 = vld [vmem:[%s10791_s1 + $0x2078] sm:$0xff]  ;;  %v5437_v55 = vpack.c.bf16 %v1066_v46, %v1050_v44  ;;  %v1192_v41 = vld [vmem:[%s10791_s1 + $0x23e0] sm:$0xff]  ;;  %v1178_v42 = vld [vmem:[%s10791_s1 + $0x2370] sm:$0xff]  ;;  %v5451_v44 = vpack.c.bf16 %v1195_v34, %v1179_v33 }
 0x2b1   :  { %v1209_v46 = vld [vmem:[%s10791_s1 + $0x2468] sm:$0xff] }
 0x2b2   :  { %5230 = vmatpush1.bf16.msra.mxu0 %v5229_v58  ;;  %v1096_v58 = vld [vmem:[%s10791_s1 + $0x20e0] sm:$0xff]  ;;  %v1305_v33 = vld [vmem:[%s10791_s1 + $0x2768] sm:$0xff] }
 0x2b3   :  { %5422 = vmatpush1.bf16.msra.mxu1 %v5421_v59  ;;  %5232 = vmatprep.subr.bf16.mxu0 %v5231_v61  ;;  %v1082_v59 = vld [vmem:[%s10791_s1 + $0x2070] sm:$0xff]  ;;  %v5439_v61 = vpack.c.bf16 %v1099_v52, %v1083_v51  ;;  %v5249_v4 = vpack.c.bf16 %v1096_v58, %v1080_v57  ;;  %v1211_v51 = vld [vmem:[%s10791_s1 + $0x2478] sm:$0xff]  ;;  %v5263_v57 = vpack.c.bf16 %v1225_v47, %v1209_v46  ;;  %v1208_v58 = vld [vmem:[%s10791_s1 + $0x2460] sm:$0xff] }
 0x2b4   :  { %5424 = vmatprep.subr.bf16.mxu1 %v5423_v2  ;;  %v1115_v2 = vld [vmem:[%s10791_s1 + $0x2178] sm:$0xff]  ;;  %v5441_v5 = vpack.c.bf16 %v1098_v63, %v1082_v59  ;;  %v1224_v59 = vld [vmem:[%s10791_s1 + $0x24e0] sm:$0xff]  ;;  %v1321_v34 = vld [vmem:[%s10791_s1 + $0x27e8] sm:$0xff] }
 0x2b5   :  { %v1227_v52 = vld [vmem:[%s10791_s1 + $0x24f8] sm:$0xff]  ;;  %v1322_v46 = vld [vmem:[%s10791_s1 + $0x27f0] sm:$0xff]  ;;  %v1337_v47 = vld [vmem:[%s10791_s1 + $0x2868] sm:$0xff] }
 0x2b6   :  { %5234 = vmatpush1.bf16.msra.mxu0 %v5233_v9  ;;  %v1128_v9 = vld [vmem:[%s10791_s1 + $0x21e0] sm:$0xff]  ;;  %v5455_v63 = vpack.c.bf16 %v1227_v52, %v1211_v51  ;;  %v1339_v51 = vld [vmem:[%s10791_s1 + $0x2878] sm:$0xff] }
 0x2b7   :  { %5426 = vmatpush1.bf16.msra.mxu1 %v5425_v10  ;;  %5236 = vmatprep.subr.bf16.mxu0 %v5235_v11  ;;  %v1114_v10 = vld [vmem:[%s10791_s1 + $0x2170] sm:$0xff]  ;;  %v5443_v11 = vpack.c.bf16 %v1131_v3, %v1115_v2  ;;  %v5253_v20 = vpack.c.bf16 %v1128_v9, %v1112_v8  ;;  %v1257_v2 = vld [vmem:[%s10791_s1 + $0x25e8] sm:$0xff]  ;;  %v5265_v8 = vpack.c.bf16 %v1224_v59, %v1208_v58  ;;  %v1355_v52 = vld [vmem:[%s10791_s1 + $0x28f8] sm:$0xff] }
 0x2b8   :  { %5428 = vmatprep.subr.bf16.mxu1 %v5427_v15  ;;  %v5736_v15 = vld [vmem:[%s10792_s0 + $0x10] sm:$0xff]  ;;  %v5445_v21 = vpack.c.bf16 %v1130_v12, %v1114_v10  ;;  %v5741_v3 = vld [vmem:[%s10792_s0 + $0xa8] sm:$0xff]  ;;  %v5267_v10 = vpack.c.bf16 %v1257_v2, %v1241_v1  ;;  %v1256_v12 = vld [vmem:[%s10791_s1 + $0x25e0] sm:$0xff] }
 0x2b9   :  { %v1352_v58 = vld [vmem:[%s10791_s1 + $0x28e0] sm:$0xff]  ;;  %v1338_v59 = vld [vmem:[%s10791_s1 + $0x2870] sm:$0xff]  ;;  %v1385_v1 = vld [vmem:[%s10791_s1 + $0x29e8] sm:$0xff] }
 0x2ba   :  { %5238 = vmatpush1.bf16.msra.mxu0 %v5237_v23  ;;  %v1144_v23 = vld [vmem:[%s10791_s1 + $0x2260] sm:$0xff]  ;;  %v1371_v2 = vld [vmem:[%s10791_s1 + $0x2978] sm:$0xff] }
 0x2bb   :  { %5430 = vmatpush1.bf16.msra.mxu1 %v5429_v25  ;;  %5240 = vmatprep.subr.bf16.mxu0 %v5239_v26  ;;  %v1160_v25 = vld [vmem:[%s10791_s1 + $0x22e0] sm:$0xff]  ;;  %v1146_v26 = vld [vmem:[%s10791_s1 + $0x2270] sm:$0xff] }
 0x2bc   :  { %5432 = vmatprep.subr.bf16.mxu1 %v5431_v31  ;;  %v1193_v31 = vld [vmem:[%s10791_s1 + $0x23e8] sm:$0xff]  ;;  %v5257_v36 = vpack.c.bf16 %v1160_v25, %v1144_v23 }
 0x2be   :  { %5242 = vmatpush1.bf16.msra.mxu0 %v5241_v37  ;;  %v5449_v37 = vpack.c.bf16 %v1162_v28, %v1146_v26  ;;  %v5271_v26 = vpack.c.bf16 %v1289_v19, %v1273_v17  ;;  %v1288_v28 = vld [vmem:[%s10791_s1 + $0x26e0] sm:$0xff]  ;;  %v1419_v17 = vld [vmem:[%s10791_s1 + $0x2af8] sm:$0xff] }
 0x2bf   :  { %5434 = vmatpush1.bf16.msra.mxu1 %v5433_v39  ;;  %5244 = vmatprep.subr.bf16.mxu0 %v5243_v40  ;;  %v5259_v39 = vpack.c.bf16 %v1193_v31, %v1177_v30  ;;  %v1176_v40 = vld [vmem:[%s10791_s1 + $0x2360] sm:$0xff]  ;;  %v1274_v30 = vld [vmem:[%s10791_s1 + $0x2670] sm:$0xff] }
 0x2c0   :  { %5436 = vmatprep.subr.bf16.mxu1 %v5435_v45  ;;  %v1194_v45 = vld [vmem:[%s10791_s1 + $0x23f0] sm:$0xff] }
 0x2c2   :  { %5246 = vmatpush1.bf16.msra.mxu0 %v5245_v53  ;;  %v5740_v53 = vld [vmem:[%s10792_s0 + $0x70] sm:$0xff] }
 0x2c3   :  { %5438 = vmatpush1.bf16.msra.mxu1 %v5437_v55  ;;  %5248 = vmatprep.subr.bf16.mxu0 %v5247_v56  ;;  %v5261_v55 = vpack.c.bf16 %v1192_v41, %v1176_v40  ;;  %v5453_v56 = vpack.c.bf16 %v1194_v45, %v1178_v42  ;;  %v5275_v40 = vpack.c.bf16 %v1321_v34, %v1305_v33  ;;  %v1304_v41 = vld [vmem:[%s10791_s1 + $0x2760] sm:$0xff] }
 0x2c4   :  { %5440 = vmatprep.subr.bf16.mxu1 %v5439_v61  ;;  %v1210_v61 = vld [vmem:[%s10791_s1 + $0x2470] sm:$0xff]  ;;  %v1320_v42 = vld [vmem:[%s10791_s1 + $0x27e0] sm:$0xff] }
 0x2c5   :  { %3336 = vmatmul.mubr.f32.vlgmr.msra.gmra.mrb[24].mxu0 %v5736_v15  ;;  %v5457_v9 = vpack.c.bf16 %v1226_v0, %v1210_v61  ;;  %v5471_v61 = vpack.c.bf16 %v1355_v52, %v1339_v51  ;;  %v1369_v0 = vld [vmem:[%s10791_s1 + $0x2968] sm:$0xff]  ;;  %v1464_v52 = vld [vmem:[%s10791_s1 + $0x2c60] sm:$0xff] }
 0x2c6   :  { %5250 = vmatpush1.bf16.msra.mxu0 %v5249_v4  ;;  %3603 = vmatmul.mubr.f32.vlgmr.msra.gmra.mrb[24].mxu1 %v5736_v15  ;;  %v1243_v4 = vld [vmem:[%s10791_s1 + $0x2578] sm:$0xff]  ;;  %v1258_v15 = vld [vmem:[%s10791_s1 + $0x25f0] sm:$0xff] }
 0x2c7   :  { %5442 = vmatpush1.bf16.msra.mxu1 %v5441_v5  ;;  %5252 = vmatprep.subr.bf16.mxu0 %v5251_v6  ;;  %v1259_v5 = vld [vmem:[%s10791_s1 + $0x25f8] sm:$0xff]  ;;  %v5742_v6 = vld [vmem:[%s10792_s0 + $0xa0] sm:$0xff]  ;;  %v5461_v25 = vpack.c.bf16 %v1258_v15, %v1242_v13  ;;  %v1401_v13 = vld [vmem:[%s10791_s1 + $0x2a68] sm:$0xff] }
 0x2c8   :  { %5444 = vmatprep.subr.bf16.mxu1 %v5443_v11  ;;  %3341 = vmatprep.mubr.f32.mxu0 %v5737_v32  ;;  %v1240_v11 = vld [vmem:[%s10791_s1 + $0x2560] sm:$0xff]  ;;  %v5459_v14 = vpack.c.bf16 %v1259_v5, %v1243_v4  ;;  %v1403_v15 = vld [vmem:[%s10791_s1 + $0x2a78] sm:$0xff] }
 0x2c9   :  { %3608 = vmatprep.mubr.f32.mxu1 %v5737_v32  ;;  %3342 = vmatmul.mubr.f32.gmra.mrb[26].mxu0 %v5738_v35  ;;  %v5269_v23 = vpack.c.bf16 %v1256_v12, %v1240_v11  ;;  %v1290_v32 = vld [vmem:[%s10791_s1 + $0x26f0] sm:$0xff] }
 0x2ca   :  { %5254 = vmatpush1.bf16.msra.mxu0 %v5253_v20  ;;  %3609 = vmatmul.mubr.f32.gmra.mrb[26].mxu1 %v5738_v35  ;;  %v5743_v20 = vld [vmem:[%s10792_s0 + $0x28] sm:$0xff]  ;;  %v1307_v35 = vld [vmem:[%s10791_s1 + $0x2778] sm:$0xff]  ;;  %v1386_v12 = vld [vmem:[%s10791_s1 + $0x29f0] sm:$0xff] }
 0x2cb   :  { %5446 = vmatpush1.bf16.msra.mxu1 %v5445_v21  ;;  %5256 = vmatprep.subr.bf16.mxu0 %v5255_v22  ;;  %v1275_v21 = vld [vmem:[%s10791_s1 + $0x2678] sm:$0xff] }
 0x2cc   :  { %5448 = vmatprep.subr.bf16.mxu1 %v5447_v27  ;;  %3347 = vmatprep.mubr.f32.mxu0 %v5739_v48  ;;  %v1291_v22 = vld [vmem:[%s10791_s1 + $0x26f8] sm:$0xff]  ;;  %v1272_v27 = vld [vmem:[%s10791_s1 + $0x2660] sm:$0xff] }
 0x2cd   :  { %3614 = vmatprep.mubr.f32.mxu1 %v5739_v48  ;;  %3348 = vmatmul.mubr.f32.gmra.mrb[28].mxu0 %v5740_v53  ;;  %v5463_v31 = vpack.c.bf16 %v1291_v22, %v1275_v21  ;;  %v1353_v48 = vld [vmem:[%s10791_s1 + $0x28e8] sm:$0xff]  ;;  %v1400_v22 = vld [vmem:[%s10791_s1 + $0x2a60] sm:$0xff] }
 0x2ce   :  { %5258 = vmatpush1.bf16.msra.mxu0 %v5257_v36  ;;  %3615 = vmatmul.mubr.f32.gmra.mrb[28].mxu1 %v5740_v53  ;;  %v1323_v36 = vld [vmem:[%s10791_s1 + $0x27f8] sm:$0xff]  ;;  %v5277_v53 = vpack.c.bf16 %v1320_v42, %v1304_v41  ;;  %v1450_v41 = vld [vmem:[%s10791_s1 + $0x2bf0] sm:$0xff]  ;;  %v1465_v42 = vld [vmem:[%s10791_s1 + $0x2c68] sm:$0xff] }
 0x2cf   :  { %5450 = vmatpush1.bf16.msra.mxu1 %v5449_v37  ;;  %5260 = vmatprep.subr.bf16.mxu0 %v5259_v39  ;;  %v5273_v37 = vpack.c.bf16 %v1288_v28, %v1272_v27  ;;  %v5465_v39 = vpack.c.bf16 %v1290_v32, %v1274_v30  ;;  %v5467_v45 = vpack.c.bf16 %v1323_v36, %v1307_v35  ;;  %v1418_v27 = vld [vmem:[%s10791_s1 + $0x2af0] sm:$0xff]  ;;  %v1433_v28 = vld [vmem:[%s10791_s1 + $0x2b68] sm:$0xff]  ;;  %v1451_v32 = vld [vmem:[%s10791_s1 + $0x2bf8] sm:$0xff] }
 0x2d0   :  { %5452 = vmatprep.subr.bf16.mxu1 %v5451_v44  ;;  %3353 = vmatprep.mubr.f32.mxu0 %v5741_v3  ;;  %v1306_v44 = vld [vmem:[%s10791_s1 + $0x2770] sm:$0xff]  ;;  %v1449_v30 = vld [vmem:[%s10791_s1 + $0x2be8] sm:$0xff]  ;;  %v1432_v36 = vld [vmem:[%s10791_s1 + $0x2b60] sm:$0xff] }
 0x2d1   :  { %3620 = vmatprep.mubr.f32.mxu1 %v5741_v3  ;;  %3354 = vmatmul.mubr.f32.gmra.mrb[30].mxu0 %v5742_v6  ;;  %v1387_v3 = vld [vmem:[%s10791_s1 + $0x29f8] sm:$0xff]  ;;  %v5291_v35 = vpack.c.bf16 %v1449_v30, %v1433_v28 }
 0x2d2   :  { %5262 = vmatpush1.bf16.msra.mxu0 %v5261_v55  ;;  %3621 = vmatmul.mubr.f32.gmra.mrb[30].mxu1 %v5742_v6  ;;  %v5469_v55 = vpack.c.bf16 %v1322_v46, %v1306_v44  ;;  %v5283_v6 = vpack.c.bf16 %v1385_v1, %v1369_v0  ;;  %v5475_v11 = vpack.c.bf16 %v1387_v3, %v1371_v2  ;;  %v1481_v44 = vld [vmem:[%s10791_s1 + $0x2ce8] sm:$0xff]  ;;  %v1483_v46 = vld [vmem:[%s10791_s1 + $0x2cf8] sm:$0xff]  ;;  %v1496_v3 = vld [vmem:[%s10791_s1 + $0x2d60] sm:$0xff] }
 0x2d3   :  { %5454 = vmatpush1.bf16.msra.mxu1 %v5453_v56  ;;  %5264 = vmatprep.subr.bf16.mxu0 %v5263_v57  ;;  %v5279_v56 = vpack.c.bf16 %v1353_v48, %v1337_v47  ;;  %v1336_v57 = vld [vmem:[%s10791_s1 + $0x2860] sm:$0xff]  ;;  %v5295_v51 = vpack.c.bf16 %v1481_v44, %v1465_v42  ;;  %v3793_v44 = vld [vmem:[%s10793_s3 + $0x10] sm:$0xff] }
 0x2d4   :  { %5456 = vmatprep.subr.bf16.mxu1 %v5455_v63  ;;  %3424 = vmatprep.mubr.f32.mxu0 %v5743_v20  ;;  %v1354_v63 = vld [vmem:[%s10791_s1 + $0x28f0] sm:$0xff]  ;;  %v5281_v4 = vpack.c.bf16 %v1352_v58, %v1336_v57  ;;  %v1497_v58 = vld [vmem:[%s10791_s1 + $0x2d68] sm:$0xff] }
 0x2d5   :  { %3691 = vmatprep.mubr.f32.mxu1 %v5743_v20  ;;  %v5473_v5 = vpack.c.bf16 %v1354_v63, %v1338_v59  ;;  %v1482_v57 = vld [vmem:[%s10791_s1 + $0x2cf0] sm:$0xff]  ;;  %v1513_v59 = vld [vmem:[%s10791_s1 + $0x2de8] sm:$0xff]  ;;  %v1515_v63 = vld [vmem:[%s10791_s1 + $0x2df8] sm:$0xff] }
 0x2d6   :  { %5266 = vmatpush1.bf16.msra.mxu0 %v5265_v8  ;;  %v1368_v8 = vld [vmem:[%s10791_s1 + $0x2960] sm:$0xff]  ;;  %v5299_v2 = vpack.c.bf16 %v1513_v59, %v1497_v58  ;;  %v5747_v58 = vld [vmem:[%s10792_s0 + $0x88] sm:$0xff] }
 0x2d7   :  { %5458 = vmatpush1.bf16.msra.mxu1 %v5457_v9  ;;  %5268 = vmatprep.subr.bf16.mxu0 %v5267_v10  ;;  %v1384_v9 = vld [vmem:[%s10791_s1 + $0x29e0] sm:$0xff]  ;;  %v1370_v10 = vld [vmem:[%s10791_s1 + $0x2970] sm:$0xff] }
 0x2d8   :  { %5460 = vmatprep.subr.bf16.mxu1 %v5459_v14  ;;  %v1417_v14 = vld [vmem:[%s10791_s1 + $0x2ae8] sm:$0xff]  ;;  %v5285_v19 = vpack.c.bf16 %v1384_v9, %v1368_v8  ;;  %v5477_v20 = vpack.c.bf16 %v1386_v12, %v1370_v10  ;;  %v1514_v8 = vld [vmem:[%s10791_s1 + $0x2df0] sm:$0xff]  ;;  %v1547_v12 = vld [vmem:[%s10791_s1 + $0x2ef8] sm:$0xff] }
 0x2d9   :  { %v5287_v21 = vpack.c.bf16 %v1417_v14, %v1401_v13  ;;  %v1529_v9 = vld [vmem:[%s10791_s1 + $0x2e68] sm:$0xff] }
 0x2da   :  { %5270 = vmatpush1.bf16.msra.mxu0 %v5269_v23  ;;  %v1416_v23 = vld [vmem:[%s10791_s1 + $0x2ae0] sm:$0xff]  ;;  %v1545_v10 = vld [vmem:[%s10791_s1 + $0x2ee8] sm:$0xff] }
 0x2db   :  { %5462 = vmatpush1.bf16.msra.mxu1 %v5461_v25  ;;  %5272 = vmatprep.subr.bf16.mxu0 %v5271_v26  ;;  %v1402_v25 = vld [vmem:[%s10791_s1 + $0x2a70] sm:$0xff]  ;;  %v5479_v26 = vpack.c.bf16 %v1419_v17, %v1403_v15  ;;  %v5289_v33 = vpack.c.bf16 %v1416_v23, %v1400_v22  ;;  %v5303_v15 = vpack.c.bf16 %v1545_v10, %v1529_v9  ;;  %v1528_v17 = vld [vmem:[%s10791_s1 + $0x2e60] sm:$0xff]  ;;  %v1561_v23 = vld [vmem:[%s10791_s1 + $0x2f68] sm:$0xff] }
 0x2dc   :  { %5464 = vmatprep.subr.bf16.mxu1 %v5463_v31  ;;  %v1435_v31 = vld [vmem:[%s10791_s1 + $0x2b78] sm:$0xff]  ;;  %v5481_v34 = vpack.c.bf16 %v1418_v27, %v1402_v25  ;;  %v1546_v22 = vld [vmem:[%s10791_s1 + $0x2ef0] sm:$0xff]  ;;  %v1577_v25 = vld [vmem:[%s10791_s1 + $0x2fe8] sm:$0xff] }
 0x2dd   :  { %v1579_v27 = vld [vmem:[%s10791_s1 + $0x2ff8] sm:$0xff] }
 0x2de   :  { %5274 = vmatpush1.bf16.msra.mxu0 %v5273_v37  ;;  %v1448_v37 = vld [vmem:[%s10791_s1 + $0x2be0] sm:$0xff] }
 0x2df   :  { %5466 = vmatpush1.bf16.msra.mxu1 %v5465_v39  ;;  %5276 = vmatprep.subr.bf16.mxu0 %v5275_v40  ;;  %v1434_v39 = vld [vmem:[%s10791_s1 + $0x2b70] sm:$0xff]  ;;  %v5483_v40 = vpack.c.bf16 %v1451_v32, %v1435_v31  ;;  %v5293_v47 = vpack.c.bf16 %v1448_v37, %v1432_v36  ;;  %v5307_v31 = vpack.c.bf16 %v1577_v25, %v1561_v23  ;;  %v1560_v32 = vld [vmem:[%s10791_s1 + $0x2f60] sm:$0xff] }
 0x2e0   :  { %5468 = vmatprep.subr.bf16.mxu1 %v5467_v45  ;;  %v1467_v45 = vld [vmem:[%s10791_s1 + $0x2c78] sm:$0xff]  ;;  %v5485_v48 = vpack.c.bf16 %v1450_v41, %v1434_v39  ;;  %v1578_v36 = vld [vmem:[%s10791_s1 + $0x2ff0] sm:$0xff]  ;;  %v3791_v37 = vld [vmem:[%s10793_s3] sm:$0xff] }
 0x2e1   :  { %v3792_v39 = vld [vmem:[%s10793_s3 + $0x8] sm:$0xff] }
 0x2e2   :  { %5278 = vmatpush1.bf16.msra.mxu0 %v5277_v53  ;;  %v1480_v53 = vld [vmem:[%s10791_s1 + $0x2ce0] sm:$0xff]  ;;  %v5503_v42 = vpack.c.bf16 %v3792_v39, %v3791_v37  ;;  %v3801_v37 = vld [vmem:[%s10793_s3 + $0x50] sm:$0xff]  ;;  %v3802_v39 = vld [vmem:[%s10793_s3 + $0x58] sm:$0xff] }
 0x2e3   :  { %5470 = vmatpush1.bf16.msra.mxu1 %v5469_v55  ;;  %5280 = vmatprep.subr.bf16.mxu0 %v5279_v56  ;;  %v1466_v55 = vld [vmem:[%s10791_s1 + $0x2c70] sm:$0xff]  ;;  %v5487_v56 = vpack.c.bf16 %v1483_v46, %v1467_v45  ;;  %v5297_v0 = vpack.c.bf16 %v1480_v53, %v1464_v52  ;;  %v3794_v45 = vld [vmem:[%s10793_s3 + $0x18] sm:$0xff] }
 0x2e4   :  { %5472 = vmatprep.subr.bf16.mxu1 %v5471_v61  ;;  %v1499_v61 = vld [vmem:[%s10791_s1 + $0x2d78] sm:$0xff]  ;;  %v5489_v1 = vpack.c.bf16 %v1482_v57, %v1466_v55  ;;  %v5507_v46 = vpack.c.bf16 %v3794_v45, %v3793_v44  ;;  %v5746_v55 = vld [vmem:[%s10792_s0 + $0x50] sm:$0xff] }
 0x2e5   :  { %v5745_v52 = vld [vmem:[%s10792_s0 + $0x58] sm:$0xff]  ;;  %v3805_v45 = vld [vmem:[%s10793_s3 + $0x70] sm:$0xff] }
 0x2e6   :  { %5282 = vmatpush1.bf16.msra.mxu0 %v5281_v4  ;;  %v1512_v4 = vld [vmem:[%s10791_s1 + $0x2de0] sm:$0xff]  ;;  %v3798_v57 = vld [vmem:[%s10793_s3 + $0x38] sm:$0xff] }
 0x2e7   :  { %5474 = vmatpush1.bf16.msra.mxu1 %v5473_v5  ;;  %5284 = vmatprep.subr.bf16.mxu0 %v5283_v6  ;;  %v1498_v5 = vld [vmem:[%s10791_s1 + $0x2d70] sm:$0xff]  ;;  %v5491_v6 = vpack.c.bf16 %v1515_v63, %v1499_v61  ;;  %v5301_v13 = vpack.c.bf16 %v1512_v4, %v1496_v3  ;;  %v5748_v61 = vld [vmem:[%s10792_s0 + $0x80] sm:$0xff]  ;;  %v5749_v63 = vld [vmem:[%s10792_s0 + $0xb8] sm:$0xff] }
 0x2e8   :  { %5476 = vmatprep.subr.bf16.mxu1 %v5475_v11  ;;  %v1531_v11 = vld [vmem:[%s10791_s1 + $0x2e78] sm:$0xff]  ;;  %v5493_v14 = vpack.c.bf16 %v1514_v8, %v1498_v5 }
 0x2ea   :  { %5286 = vmatpush1.bf16.msra.mxu0 %v5285_v19  ;;  %v1544_v19 = vld [vmem:[%s10791_s1 + $0x2ee0] sm:$0xff] }
 0x2eb   :  { %5478 = vmatpush1.bf16.msra.mxu1 %v5477_v20  ;;  %5288 = vmatprep.subr.bf16.mxu0 %v5287_v21  ;;  %v1530_v20 = vld [vmem:[%s10791_s1 + $0x2e70] sm:$0xff]  ;;  %v5495_v21 = vpack.c.bf16 %v1547_v12, %v1531_v11  ;;  %v5305_v28 = vpack.c.bf16 %v1544_v19, %v1528_v17 }
 0x2ec   :  { %5480 = vmatprep.subr.bf16.mxu1 %v5479_v26  ;;  %v1563_v26 = vld [vmem:[%s10791_s1 + $0x2f78] sm:$0xff]  ;;  %v5497_v30 = vpack.c.bf16 %v1546_v22, %v1530_v20 }
 0x2ee   :  { %5290 = vmatpush1.bf16.msra.mxu0 %v5289_v33  ;;  %v1576_v33 = vld [vmem:[%s10791_s1 + $0x2fe0] sm:$0xff] }
 0x2ef   :  { %5482 = vmatpush1.bf16.msra.mxu1 %v5481_v34  ;;  %5292 = vmatprep.subr.bf16.mxu0 %v5291_v35  ;;  %v1562_v34 = vld [vmem:[%s10791_s1 + $0x2f70] sm:$0xff]  ;;  %v5499_v35 = vpack.c.bf16 %v1579_v27, %v1563_v26 }
 0x2f0   :  { %5484 = vmatprep.subr.bf16.mxu1 %v5483_v40  ;;  %v5309_v40 = vpack.c.bf16 %v1576_v33, %v1560_v32  ;;  %v5501_v41 = vpack.c.bf16 %v1578_v36, %v1562_v34  ;;  %v3799_v34 = vld [vmem:[%s10793_s3 + $0x40] sm:$0xff] }
 0x2f2   :  { %5294 = vmatpush1.bf16.msra.mxu0 %v5293_v47  ;;  %v5744_v47 = vld [vmem:[%s10792_s0 + $0x20] sm:$0xff] }
 0x2f3   :  { %5486 = vmatpush1.bf16.msra.mxu1 %v5485_v48  ;;  %5296 = vmatprep.subr.bf16.mxu0 %v5295_v51  ;;  %v3795_v48 = vld [vmem:[%s10793_s3 + $0x20] sm:$0xff]  ;;  %v3796_v51 = vld [vmem:[%s10793_s3 + $0x28] sm:$0xff] }
 0x2f4   :  { %5488 = vmatprep.subr.bf16.mxu1 %v5487_v56  ;;  %v5511_v53 = vpack.c.bf16 %v3796_v51, %v3795_v48  ;;  %v3797_v56 = vld [vmem:[%s10793_s3 + $0x30] sm:$0xff] }
 0x2f5   :  { %v5515_v59 = vpack.c.bf16 %v3798_v57, %v3797_v56 }
 0x2f6   :  { %5298 = vmatpush1.bf16.msra.mxu0 %v5297_v0  ;;  %v5750_v0 = vld [vmem:[%s10792_s0 + $0xb0] sm:$0xff] }
 0x2f7   :  { %5490 = vmatpush1.bf16.msra.mxu1 %v5489_v1  ;;  %5300 = vmatprep.subr.bf16.mxu0 %v5299_v2 }
 0x2f8   :  { %5492 = vmatprep.subr.bf16.mxu1 %v5491_v6 }
 0x2fa   :  { %5302 = vmatpush1.bf16.msra.mxu0 %v5301_v13 }
 0x2fb   :  { %5494 = vmatpush1.bf16.msra.mxu1 %v5493_v14  ;;  %5304 = vmatprep.subr.bf16.mxu0 %v5303_v15 }
 0x2fc   :  { %5496 = vmatprep.subr.bf16.mxu1 %v5495_v21 }
 0x2fe   :  { %5306 = vmatpush1.bf16.msra.mxu0 %v5305_v28 }
 0x2ff   :  { %5498 = vmatpush1.bf16.msra.mxu1 %v5497_v30  ;;  %5308 = vmatprep.subr.bf16.mxu0 %v5307_v31 }
 0x300   :  { %5500 = vmatprep.subr.bf16.mxu1 %v5499_v35  ;;  %v3800_v35 = vld [vmem:[%s10793_s3 + $0x48] sm:$0xff] }
 0x301   :  { %v5519_v36 = vpack.c.bf16 %v3800_v35, %v3799_v34  ;;  %v3908_v34 = vld [vmem:[%s10795_s4] ss:$0 sm:$0xff] }
 0x302   :  { %5310 = vmatpush1.bf16.msra.mxu0 %v5309_v40  ;;  %v5523_v40 = vpack.c.bf16 %v3802_v39, %v3801_v37 }
 0x303   :  { %5502 = vmatpush1.bf16.msra.mxu1 %v5501_v41  ;;  %5504 = vmatprep.subr.bf16.mxu0 %v5503_v42  ;;  %v3803_v41 = vld [vmem:[%s10793_s3 + $0x60] sm:$0xff] }
 0x304   :  { %5535 = vmatprep.subr.bf16.mxu1 %v5503_v42 }
 0x305   :  { %3425 = vmatmul.mubr.f32.vlgmr.msra.gmra.mrb[24].mxu0 %v5744_v47 }
 0x306   :  { %3692 = vmatmul.mubr.f32.vlgmr.msra.gmra.mrb[24].mxu1 %v5744_v47  ;;  %3430 = vmatprep.mubr.f32.mxu0 %v5745_v52 }
 0x307   :  { %3697 = vmatprep.mubr.f32.mxu1 %v5745_v52  ;;  %5506 = vmatpush3.bf16.msra.mxu0 %v5503_v42 }
 0x308   :  { %5508 = vmatprep.subr.bf16.mxu0 %v5507_v46  ;;  %5543 = vmatpush3.bf16.msra.mxu1 %v5503_v42  ;;  %v3804_v42 = vld [vmem:[%s10793_s3 + $0x68] sm:$0xff] }
 0x309   :  { %3431 = vmatmul.mubr.f32.gmra.mrb[26].mxu0 %v5746_v55  ;;  %5536 = vmatprep.subr.bf16.mxu1 %v5507_v46  ;;  %v5527_v44 = vpack.c.bf16 %v3804_v42, %v3803_v41 }
 0x30a   :  { %3698 = vmatmul.mubr.f32.gmra.mrb[26].mxu1 %v5746_v55  ;;  %3436 = vmatprep.mubr.f32.mxu0 %v5747_v58 }
 0x30b   :  { %3703 = vmatprep.mubr.f32.mxu1 %v5747_v58  ;;  %5510 = vmatpush3.bf16.msra.mxu0 %v5507_v46 }
 0x30c   :  { %5512 = vmatprep.subr.bf16.mxu0 %v5511_v53  ;;  %5544 = vmatpush3.bf16.msra.mxu1 %v5507_v46  ;;  %v3806_v46 = vld [vmem:[%s10793_s3 + $0x78] sm:$0xff] }
 0x30d   :  { %3437 = vmatmul.mubr.f32.gmra.mrb[28].mxu0 %v5748_v61  ;;  %5537 = vmatprep.subr.bf16.mxu1 %v5511_v53  ;;  %v5531_v47 = vpack.c.bf16 %v3806_v46, %v3805_v45 }
 0x30e   :  { %3704 = vmatmul.mubr.f32.gmra.mrb[28].mxu1 %v5748_v61  ;;  %3442 = vmatprep.mubr.f32.mxu0 %v5749_v63 }
 0x30f   :  { %3709 = vmatprep.mubr.f32.mxu1 %v5749_v63  ;;  %5514 = vmatpush3.bf16.msra.mxu0 %v5511_v53 }
 0x310   :  { %5516 = vmatprep.subr.bf16.mxu0 %v5515_v59  ;;  %5545 = vmatpush3.bf16.msra.mxu1 %v5511_v53 }
 0x311   :  { %3443 = vmatmul.mubr.f32.gmra.mrb[30].mxu0 %v5750_v0  ;;  %5538 = vmatprep.subr.bf16.mxu1 %v5515_v59 }
 0x312   :  { %3710 = vmatmul.mubr.f32.gmra.mrb[30].mxu1 %v5750_v0 }
 0x313   :  { %5518 = vmatpush3.bf16.msra.mxu0 %v5515_v59 }
 0x314   :  { %5546 = vmatpush3.bf16.msra.mxu1 %v5515_v59  ;;  %5520 = vmatprep.subr.bf16.mxu0 %v5519_v36 }
 0x315   :  { %5539 = vmatprep.subr.bf16.mxu1 %v5519_v36 }
 0x317   :  { %5522 = vmatpush3.bf16.msra.mxu0 %v5519_v36 }
 0x318   :  { %v2892_v1 = vpop.f32.mrb[16].mxu0  ;;  %5547 = vmatpush3.bf16.msra.mxu1 %v5519_v36  ;;  %5524 = vmatprep.subr.bf16.mxu0 %v5523_v40 }
 0x319   :  { %v3159_v2 = vpop.f32.mrb[16].mxu1  ;;  %v2894_v3 = vpop.f32.mrb[17].mxu0  ;;  %5540 = vmatprep.subr.bf16.mxu1 %v5523_v40 }
 0x31a   :  { %v3732_v4 = vmax.f32 %v2892_v1, %v2894_v3  ;;  %v3161_v5 = vpop.f32.mrb[17].mxu1  ;;  %v3907_v3 = vld [vmem:[%s10794_s2] ss:$0 sm:$0xff] }
 0x31b   :  { %v3736_v6 = vmax.f32 %v3159_v2, %v3161_v5  ;;  %5526 = vmatpush3.bf16.msra.mxu0 %v5523_v40 }
 0x31c   :  { %v2898_v8 = vpop.f32.mrb[18].mxu0  ;;  %5548 = vmatpush3.bf16.msra.mxu1 %v5523_v40  ;;  %5528 = vmatprep.subr.bf16.mxu0 %v5527_v44 }
 0x31d   :  { %v10725_v9 = vmax.f32 %v3732_v4, %v3736_v6  ;;  %v3165_v10 = vpop.f32.mrb[18].mxu1  ;;  %v2900_v11 = vpop.f32.mrb[19].mxu0  ;;  %5541 = vmatprep.subr.bf16.mxu1 %v5527_v44 }
 0x31e   :  { %v3733_v12 = vmax.f32 %v2898_v8, %v2900_v11  ;;  %v3167_v13 = vpop.f32.mrb[19].mxu1 }
 0x31f   :  { %v3737_v14 = vmax.f32 %v3165_v10, %v3167_v13  ;;  %5530 = vmatpush3.bf16.msra.mxu0 %v5527_v44 }
 0x320   :  { %v2904_v15 = vpop.f32.mrb[20].mxu0  ;;  %5549 = vmatpush3.bf16.msra.mxu1 %v5527_v44  ;;  %5532 = vmatprep.subr.bf16.mxu0 %v5531_v47 }
 0x321   :  { %v10727_v17 = vmax.f32 %v3733_v12, %v3737_v14  ;;  %v3171_v19 = vpop.f32.mrb[20].mxu1  ;;  %v2906_v20 = vpop.f32.mrb[21].mxu0  ;;  %5542 = vmatprep.subr.bf16.mxu1 %v5531_v47 }
 0x322   :  { %v3734_v21 = vmax.f32 %v2904_v15, %v2906_v20  ;;  %v3173_v22 = vpop.f32.mrb[21].mxu1 }
 0x323   :  { %v3738_v23 = vmax.f32 %v3171_v19, %v3173_v22  ;;  %5534 = vmatpush3.bf16.msra.mxu0 %v5531_v47 }
 0x324   :  { %v2910_v25 = vpop.f32.mrb[22].mxu0  ;;  %5550 = vmatpush3.bf16.msra.mxu1 %v5531_v47 }
 0x325   :  { %v10729_v26 = vmax.f32 %v3734_v21, %v3738_v23  ;;  %v3177_v27 = vpop.f32.mrb[22].mxu1  ;;  %v2912_v28 = vpop.f32.mrb[23].mxu0 }
 0x326   :  { %v3735_v30 = vmax.f32 %v2910_v25, %v2912_v28  ;;  %v3179_v31 = vpop.f32.mrb[23].mxu1 }
 0x327   :  { %v3739_v32 = vmax.f32 %v3177_v27, %v3179_v31 }
 0x329   :  { %v10731_v33 = vmax.f32 %v3735_v30, %v3739_v32 }
 0x3d8   :  { %v3426_v48 = vpop.f32.mrb[24].mxu0 }
 0x3d9   :  { %v3693_v51 = vpop.f32.mrb[24].mxu1  ;;  %v3428_v52 = vpop.f32.mrb[25].mxu0 }
 0x3da   :  { %v3740_v53 = vmax.f32 %v3426_v48, %v3428_v52  ;;  %v3695_v55 = vpop.f32.mrb[25].mxu1 }
 0x3db   :  { %v3744_v56 = vmax.f32 %v3693_v51, %v3695_v55 }
 0x3dc   :  { %v3432_v57 = vpop.f32.mrb[26].mxu0 }
 0x3dd   :  { %v3760_v58 = vmax.f32 %v3740_v53, %v3744_v56  ;;  %v3699_v59 = vpop.f32.mrb[26].mxu1  ;;  %v3434_v61 = vpop.f32.mrb[27].mxu0 }
 0x3de   :  { %v3741_v63 = vmax.f32 %v3432_v57, %v3434_v61  ;;  %v3701_v0 = vpop.f32.mrb[27].mxu1 }
 0x3df   :  { %v3768_v1 = vmax.f32 %v10725_v9, %v3760_v58  ;;  %v3745_v2 = vmax.f32 %v3699_v59, %v3701_v0 }
 0x3e0   :  { %v3438_v4 = vpop.f32.mrb[28].mxu0 }
 0x3e1   :  { %v3761_v5 = vmax.f32 %v3741_v63, %v3745_v2  ;;  %v3705_v6 = vpop.f32.mrb[28].mxu1  ;;  %v3440_v8 = vpop.f32.mrb[29].mxu0  ;;  %v3772_v10 = vmax.f32 %v3764_v60, %v3768_v1 }
 0x3e2   :  { %v3742_v11 = vmax.f32 %v3438_v4, %v3440_v8  ;;  %v3707_v12 = vpop.f32.mrb[29].mxu1 }
 0x3e3   :  { %v3769_v13 = vmax.f32 %v10727_v17, %v3761_v5  ;;  %v3746_v14 = vmax.f32 %v3705_v6, %v3707_v12  ;;  %v3783_v15 = vadd.f32 %v3907_v3, %v3772_v10 }
 0x3e4   :  { %v3444_v9 = vpop.f32.mrb[30].mxu0 }
 0x3e5   :  { %v3773_v19 = vmax.f32 %v3765_v18, %v3769_v13  ;;  %v3762_v20 = vmax.f32 %v3742_v11, %v3746_v14  ;;  %v3711_v21 = vpop.f32.mrb[30].mxu1  ;;  %v3446_v22 = vpop.f32.mrb[31].mxu0  ;;  %v3787_v23 = vmax.f32 %v3783_v15, 0.0 }
 0x3e6   :  { %v3743_v25 = vmax.f32 %v3444_v9, %v3446_v22  ;;  %v3713_v27 = vpop.f32.mrb[31].mxu1 }
 0x3e7   :  { %v3784_v28 = vadd.f32 %v3907_v3, %v3773_v19  ;;  %v3770_v24 = vmax.f32 %v10729_v26, %v3762_v20  ;;  %v3747_v50 = vmax.f32 %v3711_v21, %v3713_v27  ;;  %3961 = vmatprep.mubr.f32.mxu0 %v3787_v23 }
 0x3e9   :  { %v3788_v60 = vmax.f32 %v3784_v28, 0.0  ;;  %v3763_v17 = vmax.f32 %v3743_v25, %v3747_v50  ;;  %v3774_v30 = vmax.f32 %v3766_v38, %v3770_v24 }
 0x3eb   :  { %v3771_v43 = vmax.f32 %v10731_v33, %v3763_v17  ;;  %3962 = vmatmul.mubr.f32.vlgmr.msra.gmra.mrb[32].mxu0 %v3788_v60  ;;  %v3785_v7 = vadd.f32 %v3907_v3, %v3774_v30 }
 0x3ed   :  { %v3775_v18 = vmax.f32 %v3767_v54, %v3771_v43  ;;  %v3789_v31 = vmax.f32 %v3785_v7, 0.0 }
 0x3ef   :  { %v3786_v32 = vadd.f32 %v3907_v3, %v3775_v18  ;;  %3964 = vmatprep.mubr.f32.mxu1 %v3789_v31 }
 0x3f1   :  { %v3790_v26 = vmax.f32 %v3786_v32, 0.0 }
 0x3f3   :  { %3965 = vmatmul.mubr.f32.vlgmr.msra.gmra.mrb[32].mxu1 %v3790_v26 }
 0x4be   :  { %v3963_v35 = vpop.f32.mrb[32].mxu0 }
 0x4bf   :  { %v3886_v62 = vadd.f32 %v3963_v35, %v3908_v34  ;;  %v3880_v29 = vpop.f32.mrb[33].mxu0 }
 0x4c0   :  { %v3881_v38 = vadd.f32 %v3908_v34, %v3880_v29 }
 0x4c1   :  { %3900 = vst [vmem:[%s10796_s5 + $0x8] sm:$0xff] %v3886_v62 }
 0x4c2   :  { %3899 = vst [vmem:[%s10796_s5] sm:$0xff] %v3881_v38 }
 0x4c6   :  { %v3966_v16 = vpop.f32.mrb[32].mxu1 }
 0x4c7   :  { %v3896_v49 = vadd.f32 %v3966_v16, %v3908_v34  ;;  %v3890_v54 = vpop.f32.mrb[33].mxu1 }
 0x4c8   :  { %v3891_v33 = vadd.f32 %v3908_v34, %v3890_v54 }
 0x4c9   :  { %3902 = vst [vmem:[%s10796_s5 + $0x18] sm:$0xff] %v3896_v49 }
 0x4ca   :  { %3901 = vst [vmem:[%s10796_s5 + $0x10] sm:$0xff] %v3891_v33 }

</bundles_post_ra>
